<compile_context>
chip_gen: v7x
topology: tpu7x:2x2x1
jax: 0.10.0
libtpu: 0.0.40
codegen_flags: <defaults>
</compile_context>

<pallas_src>
import jax
import jax.numpy as jnp
from jax.experimental import pallas as pl
from jax.experimental.pallas import tpu as pltpu

# Small hyper-parameters consistent with the module (layer=1 -> LSTM dropout is a no-op).
VOCAB_SIZE = 512
INPUT_SIZE = 64
HIDDEN = 32
LAYER = 1
BATCH = 1
SEQ_LEN = 8        # len(input_feat)  (encoder steps)
TARGET_LEN = 8     # target_len       (decoder steps)


def _cell(gates, c):
    """LSTMCell gate math with pre-scaled g-gate columns.

    gates: (1, 4H) f32 where the [2H:3H] columns were computed with weights /
    biases pre-scaled by 2, so tanh(g) = 2*sigmoid(2g) - 1 falls out of the
    single full-width sigmoid (2 EUP passes/step instead of 3).
    """
    H = HIDDEN
    sig = jax.nn.sigmoid(gates)              # one full-width EUP pass
    i = sig[:, 0 * H:1 * H]
    f = sig[:, 1 * H:2 * H]
    g = 2.0 * sig[:, 2 * H:3 * H] - 1.0      # tanh via sigmoid (VPU fma)
    o = sig[:, 3 * H:4 * H]
    c_new = f * c + i * g
    h_new = o * jnp.tanh(c_new)              # second (narrow) EUP pass
    return h_new, c_new


def s2vt_kernel(x_ref, hc_ref, wpack_ref, bpack_ref, w_out_ref, b_out_ref,
                out_ref, hdec_ref):
    T = x_ref.shape[0]
    D = x_ref.shape[1]
    TL = out_ref.shape[0]
    H = HIDDEN
    bf16 = jnp.bfloat16

    # ---- unpack the coalesced inputs (all static, tile-aligned slices) -------
    wp = wpack_ref[...]                       # (D + 3H, 4H) bf16
    w1_ih = wp[0:D, :]                        # (D, 4H)
    w1_hh = wp[D:D + H, :]                    # (H, 4H)
    w2_ih_b = wp[D + H:D + 2 * H, :]          # (H, 4H) — out1 half of lstm2 W_ih
    w2_hh = wp[D + 2 * H:D + 3 * H, :]        # (H, 4H)

    bp = bpack_ref[...]                       # (3, 4H) f32 (gate-scaled)
    b1 = bp[0:1, :]
    b2 = bp[1:2, :]
    b2_dec = bp[2:3, :]

    hc = hc_ref[...]                          # (4, H) f32
    h1, c1 = hc[0:1, :], hc[1:2, :]
    h2, c2 = hc[2:3, :], hc[3:4, :]

    def rec_step(x_gates, h, c, w_hh):
        # only h @ W_hh sits on the serial recurrence chain
        gates = x_gates + jnp.dot(h.astype(bf16), w_hh,
                                  preferred_element_type=jnp.float32)
        return _cell(gates, c)

    # ---- phase 1 + 2 fused: lstm1(input_feat) and lstm2(cat(zeros, out1)) ----
    # input-side matmul hoisted as one batched (T, D) @ (D, 4H) MXU op;
    # zeros @ W2_ih[:, :H].T == 0 so only the out1 half of lstm2's W_ih remains
    # and encw_t is computed in-register right after h1_t (no VMEM round-trip).
    xw1 = jnp.dot(x_ref[...].astype(bf16), w1_ih,
                  preferred_element_type=jnp.float32) + b1            # (T, 4H)
    for t in range(T):
        h1, c1 = rec_step(xw1[t:t + 1, :], h1, c1, w1_hh)
        encw_t = jnp.dot(h1.astype(bf16), w2_ih_b,
                         preferred_element_type=jnp.float32) + b2
        h2, c2 = rec_step(encw_t, h2, c2, w2_hh)
        # (out2 of this phase is discarded in the PyTorch code; only hidden2 kept)

    # ---- phase 3: out1, hidden1 = lstm1(zero padding, hidden1) ---------------
    # zero input -> gates reduce to h1 @ W1_hh + b1.  decw_t for the decoder is
    # computed per step off the h1 chain and carried in vregs.
    decw = []
    for t in range(TL):
        h1, c1 = rec_step(b1, h1, c1, w1_hh)
        decw.append(jnp.dot(h1.astype(bf16), w2_ih_b,
                            preferred_element_type=jnp.float32) + b2_dec)

    # ---- phase 4: decoder lstm2 steps (vocab projection deferred) ------------
    # bos_emb @ W2_ih[:, :H].T + b2 was folded into b2_dec in the wrapper.
    for t in range(TL):
        h2, c2 = rec_step(decw[t], h2, c2, w2_hh)
        hdec_ref[pl.ds(t, 1), :] = h2                                  # off-chain store
        # TODO(synk): the PyTorch loop also computes `output2_vocab_emb`
        # (vocab2emb of the prediction) but never feeds it back or returns it —
        # dead code, intentionally omitted.

    # ---- phase 5: batched hidden2out + LogSoftmax, single lane-dense store ---
    logits = jnp.dot(hdec_ref[...].astype(bf16), w_out_ref[...],
                     preferred_element_type=jnp.float32) + b_out_ref[...]  # (TL, V)
    m = jnp.max(logits, axis=1, keepdims=True)
    shifted = logits - m
    logp = shifted - jnp.log(jnp.sum(jnp.exp(shifted), axis=1, keepdims=True))
    out_ref[...] = logp


def s2vt_forward(input_feat, hidden1, hidden2, params, target_len):
    """input_feat: (T, 1, INPUT_SIZE); hidden*: tuples of (LAYER, 1, HIDDEN)."""
    T = input_feat.shape[0]
    H = HIDDEN
    x = input_feat.reshape(T, INPUT_SIZE).astype(jnp.float32)
    h1 = hidden1[0].reshape(1, H).astype(jnp.float32)
    c1 = hidden1[1].reshape(1, H).astype(jnp.float32)
    h2 = hidden2[0].reshape(1, H).astype(jnp.float32)
    c2 = hidden2[1].reshape(1, H).astype(jnp.float32)
    hc = jnp.concatenate([h1, c1, h2, c2], axis=0)           # (4, H)

    (w1_ih, w1_hh, b1_ih, b1_hh,
     w2_ih, w2_hh, b2_ih, b2_hh,
     w_out, b_out, w_emb, b_emb) = params

    bf16 = jnp.bfloat16
    # Gate order is PyTorch's (i, f, g, o).  The g-gate columns of every gate
    # matrix / bias are pre-scaled by 2 so the kernel can evaluate
    # tanh(g) = 2*sigmoid(2g) - 1 with a single full-width sigmoid.  The scale
    # MUST be applied consistently to W_ih, W_hh, the pre-summed biases AND the
    # folded decoder bias b2_dec.
    gate_scale = jnp.concatenate([jnp.ones((2 * H,), jnp.float32),
                                  jnp.full((H,), 2.0, jnp.float32),
                                  jnp.ones((H,), jnp.float32)])            # (4H,)

    b1 = (b1_ih + b1_hh).reshape(1, 4 * H)
    b2 = (b2_ih + b2_hh).reshape(1, 4 * H)
    # vocab2emb(bos one-hot) is column 0 of w_emb plus its bias; its
    # contribution through the bos half of lstm2's W_ih is loop-invariant, so
    # fold it into a decoder-phase bias and drop bos/w_emb/b_emb/w2_ih[:, :H]
    # from the kernel inputs entirely.  NOTE: this couples the wrapper to the
    # (i, f, g, o) gate order, the [bos | out1] concat order and bos index 0.
    bos_emb = w_emb[:, 0] + b_emb                            # (H,)
    b2_dec = (bos_emb @ w2_ih[:, :H].T).reshape(1, 4 * H) + b2

    # transpose so the kernel does x @ W, apply the g-gate scale, cast matmul
    # operands to bf16 (accumulation stays f32), and coalesce into few arrays.
    w1_ih_t = (w1_ih.T * gate_scale).astype(bf16)            # (D, 4H)
    w1_hh_t = (w1_hh.T * gate_scale).astype(bf16)            # (H, 4H)
    w2_ih_b = (w2_ih[:, H:].T * gate_scale).astype(bf16)     # (H, 4H) — out1 half
    w2_hh_t = (w2_hh.T * gate_scale).astype(bf16)            # (H, 4H)
    # rows 0:D, D:D+H, D+H:D+2H, D+2H:D+3H — all multiples of 16 (bf16 tiles)
    wpack = jnp.concatenate([w1_ih_t, w1_hh_t, w2_ih_b, w2_hh_t], axis=0)

    bpack = jnp.concatenate([b1 * gate_scale,
                             b2 * gate_scale,
                             b2_dec * gate_scale], axis=0)   # (3, 4H)

    w_out_t = w_out.T.astype(bf16)                           # (H, V)
    b_out_r = b_out.reshape(1, VOCAB_SIZE)

    vmem = pl.BlockSpec(memory_space=pltpu.MemorySpace.VMEM)
    cost = pl.CostEstimate(flops=790_000, transcendentals=12_000,
                           bytes_accessed=100_000)
    out = pl.pallas_call(
        s2vt_kernel,
        out_shape=jax.ShapeDtypeStruct((target_len, VOCAB_SIZE), jnp.float32),
        in_specs=[vmem] * 6,
        out_specs=vmem,
        scratch_shapes=[
            pltpu.VMEM((target_len, HIDDEN), jnp.float32),   # decoder h2 per step
        ],
        cost_estimate=cost,
    )(x, hc, wpack, bpack, w_out_t, b_out_r)

    # (target_len, V) -> (target_len, batch=1, VOCAB) like PyTorch `output2`.
    return out.reshape(target_len, BATCH, VOCAB_SIZE)


def s2vt_reference(input_feat, hidden1, hidden2, params, target_len):
    """Pure-JAX f32 reference mirroring the PyTorch forward (batch=1)."""
    (w1_ih, w1_hh, b1_ih, b1_hh, w2_ih, w2_hh, b2_ih, b2_hh,
     w_out, b_out, w_emb, b_emb) = params
    H = HIDDEN

    def cell(x, h, c, wih, whh, bih, bhh):
        g = x @ wih.T + h @ whh.T + bih + bhh
        i = jax.nn.sigmoid(g[:, :H])
        f = jax.nn.sigmoid(g[:, H:2 * H])
        gg = jnp.tanh(g[:, 2 * H:3 * H])
        o = jax.nn.sigmoid(g[:, 3 * H:])
        c_new = f * c + i * gg
        return o * jnp.tanh(c_new), c_new

    T = input_feat.shape[0]
    h1, c1 = hidden1[0][0], hidden1[1][0]
    h2, c2 = hidden2[0][0], hidden2[1][0]
    out1 = []
    for t in range(T):
        h1, c1 = cell(input_feat[t], h1, c1, w1_ih, w1_hh, b1_ih, b1_hh)
        out1.append(h1)
    for t in range(T):
        x2 = jnp.concatenate([jnp.zeros((BATCH, H), jnp.float32), out1[t]], axis=1)
        h2, c2 = cell(x2, h2, c2, w2_ih, w2_hh, b2_ih, b2_hh)
    dec1 = []
    zpad = jnp.zeros((BATCH, INPUT_SIZE), jnp.float32)
    for t in range(target_len):
        h1, c1 = cell(zpad, h1, c1, w1_ih, w1_hh, b1_ih, b1_hh)
        dec1.append(h1)
    bos = jnp.zeros((BATCH, VOCAB_SIZE), jnp.float32).at[0, 0].set(1.0)
    bos_emb = bos @ w_emb.T + b_emb
    outs = []
    for t in range(target_len):
        x2 = jnp.concatenate([bos_emb, dec1[t]], axis=1)
        h2, c2 = cell(x2, h2, c2, w2_ih, w2_hh, b2_ih, b2_hh)
        logits = h2 @ w_out.T + b_out
        outs.append(jax.nn.log_softmax(logits, axis=-1))
    return jnp.stack(outs, axis=0)


if __name__ == "__main__":
    key = jax.random.PRNGKey(0)
    keys = jax.random.split(key, 13)
    scale = 1.0 / float(jnp.sqrt(HIDDEN))

    def u(k, shape):
        return jax.random.uniform(k, shape, jnp.float32, -scale, scale)

    params = (
        u(keys[0], (4 * HIDDEN, INPUT_SIZE)),      # lstm1 W_ih
        u(keys[1], (4 * HIDDEN, HIDDEN)),          # lstm1 W_hh
        u(keys[2], (4 * HIDDEN,)),                 # lstm1 b_ih
        u(keys[3], (4 * HIDDEN,)),                 # lstm1 b_hh
        u(keys[4], (4 * HIDDEN, 2 * HIDDEN)),      # lstm2 W_ih
        u(keys[5], (4 * HIDDEN, HIDDEN)),          # lstm2 W_hh
        u(keys[6], (4 * HIDDEN,)),                 # lstm2 b_ih
        u(keys[7], (4 * HIDDEN,)),                 # lstm2 b_hh
        u(keys[8], (VOCAB_SIZE, HIDDEN)),          # hidden2out W
        u(keys[9], (VOCAB_SIZE,)),                 # hidden2out b
        u(keys[10], (HIDDEN, VOCAB_SIZE)),         # vocab2emb W
        u(keys[11], (HIDDEN,)),                    # vocab2emb b
    )
    input_feat = jax.random.normal(keys[12], (SEQ_LEN, BATCH, INPUT_SIZE), jnp.float32)
    hidden1 = (jnp.zeros((LAYER, BATCH, HIDDEN), jnp.float32),
               jnp.zeros((LAYER, BATCH, HIDDEN), jnp.float32))
    hidden2 = (jnp.zeros((LAYER, BATCH, HIDDEN), jnp.float32),
               jnp.zeros((LAYER, BATCH, HIDDEN), jnp.float32))

    out = s2vt_forward(input_feat, hidden1, hidden2, params, TARGET_LEN)
    out = jax.block_until_ready(out)

    assert out.shape == (TARGET_LEN, BATCH, VOCAB_SIZE)
    assert bool(jnp.all(jnp.isfinite(out)))
    # log-softmax rows must normalize to 1.
    row_sums = jnp.sum(jnp.exp(out), axis=-1)
    assert bool(jnp.allclose(row_sums, 1.0, atol=1e-3))
    # Compare against a pure-JAX f32 reference of the same math (bf16 matmuls
    # with f32 accumulation and the tanh-via-sigmoid rewrite stay well inside
    # this tolerance).
    ref = s2vt_reference(input_feat, hidden1, hidden2, params, TARGET_LEN)
    assert bool(jnp.allclose(out, ref, atol=2e-2, rtol=2e-2)), (
        f"max abs diff {float(jnp.max(jnp.abs(out - ref)))}")

    print("KERNEL_OK")
</pallas_src>

<mosaic_0001>
module attributes {stable_mosaic.version = 11 : i64} {
  func.func @s2vt_kernel(%arg0: memref<8x64xf32, #tpu.memory_space<vmem>>, %arg1: memref<4x32xf32, #tpu.memory_space<vmem>>, %arg2: memref<160x128xbf16, #tpu.memory_space<vmem>>, %arg3: memref<3x128xf32, #tpu.memory_space<vmem>>, %arg4: memref<32x512xbf16, #tpu.memory_space<vmem>>, %arg5: memref<1x512xf32, #tpu.memory_space<vmem>>, %arg6: memref<8x512xf32, #tpu.memory_space<vmem>>, %arg7: memref<8x32xf32, #tpu.memory_space<vmem>>) attributes {dimension_semantics = [], scalar_prefetch = 0 : i64, scratch_operands = 1 : i64, tpu.core_type = #tpu.core_type<tc>} {
    %c0 = arith.constant 0 : index
    %c0_0 = arith.constant 0 : index
    %0 = vector.load %arg2[%c0, %c0_0] : memref<160x128xbf16, #tpu.memory_space<vmem>>, vector<160x128xbf16>
    %1 = vector.extract_strided_slice %0 {offsets = [0, 0], sizes = [64, 128], strides = [1, 1]} : vector<160x128xbf16> to vector<64x128xbf16>
    %2 = vector.extract_strided_slice %0 {offsets = [64, 0], sizes = [32, 128], strides = [1, 1]} : vector<160x128xbf16> to vector<32x128xbf16>
    %3 = vector.extract_strided_slice %0 {offsets = [96, 0], sizes = [32, 128], strides = [1, 1]} : vector<160x128xbf16> to vector<32x128xbf16>
    %4 = vector.extract_strided_slice %0 {offsets = [128, 0], sizes = [32, 128], strides = [1, 1]} : vector<160x128xbf16> to vector<32x128xbf16>
    %c0_1 = arith.constant 0 : index
    %c0_2 = arith.constant 0 : index
    %5 = vector.load %arg3[%c0_1, %c0_2] : memref<3x128xf32, #tpu.memory_space<vmem>>, vector<3x128xf32>
    %6 = vector.extract_strided_slice %5 {offsets = [0, 0], sizes = [1, 128], strides = [1, 1]} : vector<3x128xf32> to vector<1x128xf32>
    %7 = vector.extract_strided_slice %5 {offsets = [1, 0], sizes = [1, 128], strides = [1, 1]} : vector<3x128xf32> to vector<1x128xf32>
    %8 = vector.extract_strided_slice %5 {offsets = [2, 0], sizes = [1, 128], strides = [1, 1]} : vector<3x128xf32> to vector<1x128xf32>
    %c0_3 = arith.constant 0 : index
    %c0_4 = arith.constant 0 : index
    %9 = vector.load %arg1[%c0_3, %c0_4] : memref<4x32xf32, #tpu.memory_space<vmem>>, vector<4x32xf32>
    %10 = vector.extract_strided_slice %9 {offsets = [0, 0], sizes = [1, 32], strides = [1, 1]} : vector<4x32xf32> to vector<1x32xf32>
    %11 = vector.extract_strided_slice %9 {offsets = [1, 0], sizes = [1, 32], strides = [1, 1]} : vector<4x32xf32> to vector<1x32xf32>
    %12 = vector.extract_strided_slice %9 {offsets = [2, 0], sizes = [1, 32], strides = [1, 1]} : vector<4x32xf32> to vector<1x32xf32>
    %13 = vector.extract_strided_slice %9 {offsets = [3, 0], sizes = [1, 32], strides = [1, 1]} : vector<4x32xf32> to vector<1x32xf32>
    %c0_5 = arith.constant 0 : index
    %c0_6 = arith.constant 0 : index
    %14 = vector.load %arg0[%c0_5, %c0_6] : memref<8x64xf32, #tpu.memory_space<vmem>>, vector<8x64xf32>
    %15 = arith.truncf %14 : vector<8x64xf32> to vector<8x64xbf16>
    %cst = arith.constant dense<0.000000e+00> : vector<8x128xf32>
    %16 = tpu.matmul %15, %1, %cst {dimension_numbers = #tpu.dot_dimension_numbers<[1], [0], [0], [1], [0, 0, 1, 1], [], []>} : vector<8x64xbf16>, vector<64x128xbf16>, vector<8x128xf32> -> vector<8x128xf32>
    %17 = vector.broadcast %6 : vector<1x128xf32> to vector<8x128xf32>
    %18 = arith.addf %16, %17 : vector<8x128xf32>
    %19 = vector.extract_strided_slice %18 {offsets = [0, 0], sizes = [1, 128], strides = [1, 1]} : vector<8x128xf32> to vector<1x128xf32>
    %20 = arith.truncf %10 : vector<1x32xf32> to vector<1x32xbf16>
    %cst_7 = arith.constant dense<0.000000e+00> : vector<1x128xf32>
    %21 = tpu.matmul %20, %2, %cst_7 {dimension_numbers = #tpu.dot_dimension_numbers<[1], [0], [0], [1], [0, 0, 1, 1], [], []>} : vector<1x32xbf16>, vector<32x128xbf16>, vector<1x128xf32> -> vector<1x128xf32>
    %22 = arith.addf %19, %21 : vector<1x128xf32>
    %23 = arith.negf %22 : vector<1x128xf32>
    %24 = math.exp %23 : vector<1x128xf32>
    %cst_8 = arith.constant 1.000000e+00 : f32
    %25 = vector.broadcast %cst_8 : f32 to vector<1x128xf32>
    %26 = arith.addf %25, %24 : vector<1x128xf32>
    %27 = arith.divf %25, %26 : vector<1x128xf32>
    %28 = vector.extract_strided_slice %27 {offsets = [0, 0], sizes = [1, 32], strides = [1, 1]} : vector<1x128xf32> to vector<1x32xf32>
    %29 = vector.extract_strided_slice %27 {offsets = [0, 32], sizes = [1, 32], strides = [1, 1]} : vector<1x128xf32> to vector<1x32xf32>
    %30 = vector.extract_strided_slice %27 {offsets = [0, 64], sizes = [1, 32], strides = [1, 1]} : vector<1x128xf32> to vector<1x32xf32>
    %cst_9 = arith.constant 2.000000e+00 : f32
    %31 = vector.broadcast %cst_9 : f32 to vector<1x32xf32>
    %32 = arith.mulf %31, %30 : vector<1x32xf32>
    %cst_10 = arith.constant 1.000000e+00 : f32
    %33 = vector.broadcast %cst_10 : f32 to vector<1x32xf32>
    %34 = arith.subf %32, %33 : vector<1x32xf32>
    %35 = vector.extract_strided_slice %27 {offsets = [0, 96], sizes = [1, 32], strides = [1, 1]} : vector<1x128xf32> to vector<1x32xf32>
    %36 = arith.mulf %29, %11 : vector<1x32xf32>
    %37 = arith.mulf %28, %34 : vector<1x32xf32>
    %38 = arith.addf %36, %37 : vector<1x32xf32>
    %39 = math.tanh %38 : vector<1x32xf32>
    %40 = arith.mulf %35, %39 : vector<1x32xf32>
    %41 = arith.truncf %40 : vector<1x32xf32> to vector<1x32xbf16>
    %cst_11 = arith.constant dense<0.000000e+00> : vector<1x128xf32>
    %42 = tpu.matmul %41, %3, %cst_11 {dimension_numbers = #tpu.dot_dimension_numbers<[1], [0], [0], [1], [0, 0, 1, 1], [], []>} : vector<1x32xbf16>, vector<32x128xbf16>, vector<1x128xf32> -> vector<1x128xf32>
    %43 = arith.addf %42, %7 : vector<1x128xf32>
    %44 = arith.truncf %12 : vector<1x32xf32> to vector<1x32xbf16>
    %cst_12 = arith.constant dense<0.000000e+00> : vector<1x128xf32>
    %45 = tpu.matmul %44, %4, %cst_12 {dimension_numbers = #tpu.dot_dimension_numbers<[1], [0], [0], [1], [0, 0, 1, 1], [], []>} : vector<1x32xbf16>, vector<32x128xbf16>, vector<1x128xf32> -> vector<1x128xf32>
    %46 = arith.addf %43, %45 : vector<1x128xf32>
    %47 = arith.negf %46 : vector<1x128xf32>
    %48 = math.exp %47 : vector<1x128xf32>
    %cst_13 = arith.constant 1.000000e+00 : f32
    %49 = vector.broadcast %cst_13 : f32 to vector<1x128xf32>
    %50 = arith.addf %49, %48 : vector<1x128xf32>
    %51 = arith.divf %49, %50 : vector<1x128xf32>
    %52 = vector.extract_strided_slice %51 {offsets = [0, 0], sizes = [1, 32], strides = [1, 1]} : vector<1x128xf32> to vector<1x32xf32>
    %53 = vector.extract_strided_slice %51 {offsets = [0, 32], sizes = [1, 32], strides = [1, 1]} : vector<1x128xf32> to vector<1x32xf32>
    %54 = vector.extract_strided_slice %51 {offsets = [0, 64], sizes = [1, 32], strides = [1, 1]} : vector<1x128xf32> to vector<1x32xf32>
    %cst_14 = arith.constant 2.000000e+00 : f32
    %55 = vector.broadcast %cst_14 : f32 to vector<1x32xf32>
    %56 = arith.mulf %55, %54 : vector<1x32xf32>
    %cst_15 = arith.constant 1.000000e+00 : f32
    %57 = vector.broadcast %cst_15 : f32 to vector<1x32xf32>
    %58 = arith.subf %56, %57 : vector<1x32xf32>
    %59 = vector.extract_strided_slice %51 {offsets = [0, 96], sizes = [1, 32], strides = [1, 1]} : vector<1x128xf32> to vector<1x32xf32>
    %60 = arith.mulf %53, %13 : vector<1x32xf32>
    %61 = arith.mulf %52, %58 : vector<1x32xf32>
    %62 = arith.addf %60, %61 : vector<1x32xf32>
    %63 = math.tanh %62 : vector<1x32xf32>
    %64 = arith.mulf %59, %63 : vector<1x32xf32>
    %65 = vector.extract_strided_slice %18 {offsets = [1, 0], sizes = [1, 128], strides = [1, 1]} : vector<8x128xf32> to vector<1x128xf32>
    %66 = arith.truncf %40 : vector<1x32xf32> to vector<1x32xbf16>
    %cst_16 = arith.constant dense<0.000000e+00> : vector<1x128xf32>
    %67 = tpu.matmul %66, %2, %cst_16 {dimension_numbers = #tpu.dot_dimension_numbers<[1], [0], [0], [1], [0, 0, 1, 1], [], []>} : vector<1x32xbf16>, vector<32x128xbf16>, vector<1x128xf32> -> vector<1x128xf32>
    %68 = arith.addf %65, %67 : vector<1x128xf32>
    %69 = arith.negf %68 : vector<1x128xf32>
    %70 = math.exp %69 : vector<1x128xf32>
    %cst_17 = arith.constant 1.000000e+00 : f32
    %71 = vector.broadcast %cst_17 : f32 to vector<1x128xf32>
    %72 = arith.addf %71, %70 : vector<1x128xf32>
    %73 = arith.divf %71, %72 : vector<1x128xf32>
    %74 = vector.extract_strided_slice %73 {offsets = [0, 0], sizes = [1, 32], strides = [1, 1]} : vector<1x128xf32> to vector<1x32xf32>
    %75 = vector.extract_strided_slice %73 {offsets = [0, 32], sizes = [1, 32], strides = [1, 1]} : vector<1x128xf32> to vector<1x32xf32>
    %76 = vector.extract_strided_slice %73 {offsets = [0, 64], sizes = [1, 32], strides = [1, 1]} : vector<1x128xf32> to vector<1x32xf32>
    %cst_18 = arith.constant 2.000000e+00 : f32
    %77 = vector.broadcast %cst_18 : f32 to vector<1x32xf32>
    %78 = arith.mulf %77, %76 : vector<1x32xf32>
    %cst_19 = arith.constant 1.000000e+00 : f32
    %79 = vector.broadcast %cst_19 : f32 to vector<1x32xf32>
    %80 = arith.subf %78, %79 : vector<1x32xf32>
    %81 = vector.extract_strided_slice %73 {offsets = [0, 96], sizes = [1, 32], strides = [1, 1]} : vector<1x128xf32> to vector<1x32xf32>
    %82 = arith.mulf %75, %38 : vector<1x32xf32>
    %83 = arith.mulf %74, %80 : vector<1x32xf32>
    %84 = arith.addf %82, %83 : vector<1x32xf32>
    %85 = math.tanh %84 : vector<1x32xf32>
    %86 = arith.mulf %81, %85 : vector<1x32xf32>
    %87 = arith.truncf %86 : vector<1x32xf32> to vector<1x32xbf16>
    %cst_20 = arith.constant dense<0.000000e+00> : vector<1x128xf32>
    %88 = tpu.matmul %87, %3, %cst_20 {dimension_numbers = #tpu.dot_dimension_numbers<[1], [0], [0], [1], [0, 0, 1, 1], [], []>} : vector<1x32xbf16>, vector<32x128xbf16>, vector<1x128xf32> -> vector<1x128xf32>
    %89 = arith.addf %88, %7 : vector<1x128xf32>
    %90 = arith.truncf %64 : vector<1x32xf32> to vector<1x32xbf16>
    %cst_21 = arith.constant dense<0.000000e+00> : vector<1x128xf32>
    %91 = tpu.matmul %90, %4, %cst_21 {dimension_numbers = #tpu.dot_dimension_numbers<[1], [0], [0], [1], [0, 0, 1, 1], [], []>} : vector<1x32xbf16>, vector<32x128xbf16>, vector<1x128xf32> -> vector<1x128xf32>
    %92 = arith.addf %89, %91 : vector<1x128xf32>
    %93 = arith.negf %92 : vector<1x128xf32>
    %94 = math.exp %93 : vector<1x128xf32>
    %cst_22 = arith.constant 1.000000e+00 : f32
    %95 = vector.broadcast %cst_22 : f32 to vector<1x128xf32>
    %96 = arith.addf %95, %94 : vector<1x128xf32>
    %97 = arith.divf %95, %96 : vector<1x128xf32>
    %98 = vector.extract_strided_slice %97 {offsets = [0, 0], sizes = [1, 32], strides = [1, 1]} : vector<1x128xf32> to vector<1x32xf32>
    %99 = vector.extract_strided_slice %97 {offsets = [0, 32], sizes = [1, 32], strides = [1, 1]} : vector<1x128xf32> to vector<1x32xf32>
    %100 = vector.extract_strided_slice %97 {offsets = [0, 64], sizes = [1, 32], strides = [1, 1]} : vector<1x128xf32> to vector<1x32xf32>
    %cst_23 = arith.constant 2.000000e+00 : f32
    %101 = vector.broadcast %cst_23 : f32 to vector<1x32xf32>
    %102 = arith.mulf %101, %100 : vector<1x32xf32>
    %cst_24 = arith.constant 1.000000e+00 : f32
    %103 = vector.broadcast %cst_24 : f32 to vector<1x32xf32>
    %104 = arith.subf %102, %103 : vector<1x32xf32>
    %105 = vector.extract_strided_slice %97 {offsets = [0, 96], sizes = [1, 32], strides = [1, 1]} : vector<1x128xf32> to vector<1x32xf32>
    %106 = arith.mulf %99, %62 : vector<1x32xf32>
    %107 = arith.mulf %98, %104 : vector<1x32xf32>
    %108 = arith.addf %106, %107 : vector<1x32xf32>
    %109 = math.tanh %108 : vector<1x32xf32>
    %110 = arith.mulf %105, %109 : vector<1x32xf32>
    %111 = vector.extract_strided_slice %18 {offsets = [2, 0], sizes = [1, 128], strides = [1, 1]} : vector<8x128xf32> to vector<1x128xf32>
    %112 = arith.truncf %86 : vector<1x32xf32> to vector<1x32xbf16>
    %cst_25 = arith.constant dense<0.000000e+00> : vector<1x128xf32>
    %113 = tpu.matmul %112, %2, %cst_25 {dimension_numbers = #tpu.dot_dimension_numbers<[1], [0], [0], [1], [0, 0, 1, 1], [], []>} : vector<1x32xbf16>, vector<32x128xbf16>, vector<1x128xf32> -> vector<1x128xf32>
    %114 = arith.addf %111, %113 : vector<1x128xf32>
    %115 = arith.negf %114 : vector<1x128xf32>
    %116 = math.exp %115 : vector<1x128xf32>
    %cst_26 = arith.constant 1.000000e+00 : f32
    %117 = vector.broadcast %cst_26 : f32 to vector<1x128xf32>
    %118 = arith.addf %117, %116 : vector<1x128xf32>
    %119 = arith.divf %117, %118 : vector<1x128xf32>
    %120 = vector.extract_strided_slice %119 {offsets = [0, 0], sizes = [1, 32], strides = [1, 1]} : vector<1x128xf32> to vector<1x32xf32>
    %121 = vector.extract_strided_slice %119 {offsets = [0, 32], sizes = [1, 32], strides = [1, 1]} : vector<1x128xf32> to vector<1x32xf32>
    %122 = vector.extract_strided_slice %119 {offsets = [0, 64], sizes = [1, 32], strides = [1, 1]} : vector<1x128xf32> to vector<1x32xf32>
    %cst_27 = arith.constant 2.000000e+00 : f32
    %123 = vector.broadcast %cst_27 : f32 to vector<1x32xf32>
    %124 = arith.mulf %123, %122 : vector<1x32xf32>
    %cst_28 = arith.constant 1.000000e+00 : f32
    %125 = vector.broadcast %cst_28 : f32 to vector<1x32xf32>
    %126 = arith.subf %124, %125 : vector<1x32xf32>
    %127 = vector.extract_strided_slice %119 {offsets = [0, 96], sizes = [1, 32], strides = [1, 1]} : vector<1x128xf32> to vector<1x32xf32>
    %128 = arith.mulf %121, %84 : vector<1x32xf32>
    %129 = arith.mulf %120, %126 : vector<1x32xf32>
    %130 = arith.addf %128, %129 : vector<1x32xf32>
    %131 = math.tanh %130 : vector<1x32xf32>
    %132 = arith.mulf %127, %131 : vector<1x32xf32>
    %133 = arith.truncf %132 : vector<1x32xf32> to vector<1x32xbf16>
    %cst_29 = arith.constant dense<0.000000e+00> : vector<1x128xf32>
    %134 = tpu.matmul %133, %3, %cst_29 {dimension_numbers = #tpu.dot_dimension_numbers<[1], [0], [0], [1], [0, 0, 1, 1], [], []>} : vector<1x32xbf16>, vector<32x128xbf16>, vector<1x128xf32> -> vector<1x128xf32>
    %135 = arith.addf %134, %7 : vector<1x128xf32>
    %136 = arith.truncf %110 : vector<1x32xf32> to vector<1x32xbf16>
    %cst_30 = arith.constant dense<0.000000e+00> : vector<1x128xf32>
    %137 = tpu.matmul %136, %4, %cst_30 {dimension_numbers = #tpu.dot_dimension_numbers<[1], [0], [0], [1], [0, 0, 1, 1], [], []>} : vector<1x32xbf16>, vector<32x128xbf16>, vector<1x128xf32> -> vector<1x128xf32>
    %138 = arith.addf %135, %137 : vector<1x128xf32>
    %139 = arith.negf %138 : vector<1x128xf32>
    %140 = math.exp %139 : vector<1x128xf32>
    %cst_31 = arith.constant 1.000000e+00 : f32
    %141 = vector.broadcast %cst_31 : f32 to vector<1x128xf32>
    %142 = arith.addf %141, %140 : vector<1x128xf32>
    %143 = arith.divf %141, %142 : vector<1x128xf32>
    %144 = vector.extract_strided_slice %143 {offsets = [0, 0], sizes = [1, 32], strides = [1, 1]} : vector<1x128xf32> to vector<1x32xf32>
    %145 = vector.extract_strided_slice %143 {offsets = [0, 32], sizes = [1, 32], strides = [1, 1]} : vector<1x128xf32> to vector<1x32xf32>
    %146 = vector.extract_strided_slice %143 {offsets = [0, 64], sizes = [1, 32], strides = [1, 1]} : vector<1x128xf32> to vector<1x32xf32>
    %cst_32 = arith.constant 2.000000e+00 : f32
    %147 = vector.broadcast %cst_32 : f32 to vector<1x32xf32>
    %148 = arith.mulf %147, %146 : vector<1x32xf32>
    %cst_33 = arith.constant 1.000000e+00 : f32
    %149 = vector.broadcast %cst_33 : f32 to vector<1x32xf32>
    %150 = arith.subf %148, %149 : vector<1x32xf32>
    %151 = vector.extract_strided_slice %143 {offsets = [0, 96], sizes = [1, 32], strides = [1, 1]} : vector<1x128xf32> to vector<1x32xf32>
    %152 = arith.mulf %145, %108 : vector<1x32xf32>
    %153 = arith.mulf %144, %150 : vector<1x32xf32>
    %154 = arith.addf %152, %153 : vector<1x32xf32>
    %155 = math.tanh %154 : vector<1x32xf32>
    %156 = arith.mulf %151, %155 : vector<1x32xf32>
    %157 = vector.extract_strided_slice %18 {offsets = [3, 0], sizes = [1, 128], strides = [1, 1]} : vector<8x128xf32> to vector<1x128xf32>
    %158 = arith.truncf %132 : vector<1x32xf32> to vector<1x32xbf16>
    %cst_34 = arith.constant dense<0.000000e+00> : vector<1x128xf32>
    %159 = tpu.matmul %158, %2, %cst_34 {dimension_numbers = #tpu.dot_dimension_numbers<[1], [0], [0], [1], [0, 0, 1, 1], [], []>} : vector<1x32xbf16>, vector<32x128xbf16>, vector<1x128xf32> -> vector<1x128xf32>
    %160 = arith.addf %157, %159 : vector<1x128xf32>
    %161 = arith.negf %160 : vector<1x128xf32>
    %162 = math.exp %161 : vector<1x128xf32>
    %cst_35 = arith.constant 1.000000e+00 : f32
    %163 = vector.broadcast %cst_35 : f32 to vector<1x128xf32>
    %164 = arith.addf %163, %162 : vector<1x128xf32>
    %165 = arith.divf %163, %164 : vector<1x128xf32>
    %166 = vector.extract_strided_slice %165 {offsets = [0, 0], sizes = [1, 32], strides = [1, 1]} : vector<1x128xf32> to vector<1x32xf32>
    %167 = vector.extract_strided_slice %165 {offsets = [0, 32], sizes = [1, 32], strides = [1, 1]} : vector<1x128xf32> to vector<1x32xf32>
    %168 = vector.extract_strided_slice %165 {offsets = [0, 64], sizes = [1, 32], strides = [1, 1]} : vector<1x128xf32> to vector<1x32xf32>
    %cst_36 = arith.constant 2.000000e+00 : f32
    %169 = vector.broadcast %cst_36 : f32 to vector<1x32xf32>
    %170 = arith.mulf %169, %168 : vector<1x32xf32>
    %cst_37 = arith.constant 1.000000e+00 : f32
    %171 = vector.broadcast %cst_37 : f32 to vector<1x32xf32>
    %172 = arith.subf %170, %171 : vector<1x32xf32>
    %173 = vector.extract_strided_slice %165 {offsets = [0, 96], sizes = [1, 32], strides = [1, 1]} : vector<1x128xf32> to vector<1x32xf32>
    %174 = arith.mulf %167, %130 : vector<1x32xf32>
    %175 = arith.mulf %166, %172 : vector<1x32xf32>
    %176 = arith.addf %174, %175 : vector<1x32xf32>
    %177 = math.tanh %176 : vector<1x32xf32>
    %178 = arith.mulf %173, %177 : vector<1x32xf32>
    %179 = arith.truncf %178 : vector<1x32xf32> to vector<1x32xbf16>
    %cst_38 = arith.constant dense<0.000000e+00> : vector<1x128xf32>
    %180 = tpu.matmul %179, %3, %cst_38 {dimension_numbers = #tpu.dot_dimension_numbers<[1], [0], [0], [1], [0, 0, 1, 1], [], []>} : vector<1x32xbf16>, vector<32x128xbf16>, vector<1x128xf32> -> vector<1x128xf32>
    %181 = arith.addf %180, %7 : vector<1x128xf32>
    %182 = arith.truncf %156 : vector<1x32xf32> to vector<1x32xbf16>
    %cst_39 = arith.constant dense<0.000000e+00> : vector<1x128xf32>
    %183 = tpu.matmul %182, %4, %cst_39 {dimension_numbers = #tpu.dot_dimension_numbers<[1], [0], [0], [1], [0, 0, 1, 1], [], []>} : vector<1x32xbf16>, vector<32x128xbf16>, vector<1x128xf32> -> vector<1x128xf32>
    %184 = arith.addf %181, %183 : vector<1x128xf32>
    %185 = arith.negf %184 : vector<1x128xf32>
    %186 = math.exp %185 : vector<1x128xf32>
    %cst_40 = arith.constant 1.000000e+00 : f32
    %187 = vector.broadcast %cst_40 : f32 to vector<1x128xf32>
    %188 = arith.addf %187, %186 : vector<1x128xf32>
    %189 = arith.divf %187, %188 : vector<1x128xf32>
    %190 = vector.extract_strided_slice %189 {offsets = [0, 0], sizes = [1, 32], strides = [1, 1]} : vector<1x128xf32> to vector<1x32xf32>
    %191 = vector.extract_strided_slice %189 {offsets = [0, 32], sizes = [1, 32], strides = [1, 1]} : vector<1x128xf32> to vector<1x32xf32>
    %192 = vector.extract_strided_slice %189 {offsets = [0, 64], sizes = [1, 32], strides = [1, 1]} : vector<1x128xf32> to vector<1x32xf32>
    %cst_41 = arith.constant 2.000000e+00 : f32
    %193 = vector.broadcast %cst_41 : f32 to vector<1x32xf32>
    %194 = arith.mulf %193, %192 : vector<1x32xf32>
    %cst_42 = arith.constant 1.000000e+00 : f32
    %195 = vector.broadcast %cst_42 : f32 to vector<1x32xf32>
    %196 = arith.subf %194, %195 : vector<1x32xf32>
    %197 = vector.extract_strided_slice %189 {offsets = [0, 96], sizes = [1, 32], strides = [1, 1]} : vector<1x128xf32> to vector<1x32xf32>
    %198 = arith.mulf %191, %154 : vector<1x32xf32>
    %199 = arith.mulf %190, %196 : vector<1x32xf32>
    %200 = arith.addf %198, %199 : vector<1x32xf32>
    %201 = math.tanh %200 : vector<1x32xf32>
    %202 = arith.mulf %197, %201 : vector<1x32xf32>
    %203 = vector.extract_strided_slice %18 {offsets = [4, 0], sizes = [1, 128], strides = [1, 1]} : vector<8x128xf32> to vector<1x128xf32>
    %204 = arith.truncf %178 : vector<1x32xf32> to vector<1x32xbf16>
    %cst_43 = arith.constant dense<0.000000e+00> : vector<1x128xf32>
    %205 = tpu.matmul %204, %2, %cst_43 {dimension_numbers = #tpu.dot_dimension_numbers<[1], [0], [0], [1], [0, 0, 1, 1], [], []>} : vector<1x32xbf16>, vector<32x128xbf16>, vector<1x128xf32> -> vector<1x128xf32>
    %206 = arith.addf %203, %205 : vector<1x128xf32>
    %207 = arith.negf %206 : vector<1x128xf32>
    %208 = math.exp %207 : vector<1x128xf32>
    %cst_44 = arith.constant 1.000000e+00 : f32
    %209 = vector.broadcast %cst_44 : f32 to vector<1x128xf32>
    %210 = arith.addf %209, %208 : vector<1x128xf32>
    %211 = arith.divf %209, %210 : vector<1x128xf32>
    %212 = vector.extract_strided_slice %211 {offsets = [0, 0], sizes = [1, 32], strides = [1, 1]} : vector<1x128xf32> to vector<1x32xf32>
    %213 = vector.extract_strided_slice %211 {offsets = [0, 32], sizes = [1, 32], strides = [1, 1]} : vector<1x128xf32> to vector<1x32xf32>
    %214 = vector.extract_strided_slice %211 {offsets = [0, 64], sizes = [1, 32], strides = [1, 1]} : vector<1x128xf32> to vector<1x32xf32>
    %cst_45 = arith.constant 2.000000e+00 : f32
    %215 = vector.broadcast %cst_45 : f32 to vector<1x32xf32>
    %216 = arith.mulf %215, %214 : vector<1x32xf32>
    %cst_46 = arith.constant 1.000000e+00 : f32
    %217 = vector.broadcast %cst_46 : f32 to vector<1x32xf32>
    %218 = arith.subf %216, %217 : vector<1x32xf32>
    %219 = vector.extract_strided_slice %211 {offsets = [0, 96], sizes = [1, 32], strides = [1, 1]} : vector<1x128xf32> to vector<1x32xf32>
    %220 = arith.mulf %213, %176 : vector<1x32xf32>
    %221 = arith.mulf %212, %218 : vector<1x32xf32>
    %222 = arith.addf %220, %221 : vector<1x32xf32>
    %223 = math.tanh %222 : vector<1x32xf32>
    %224 = arith.mulf %219, %223 : vector<1x32xf32>
    %225 = arith.truncf %224 : vector<1x32xf32> to vector<1x32xbf16>
    %cst_47 = arith.constant dense<0.000000e+00> : vector<1x128xf32>
    %226 = tpu.matmul %225, %3, %cst_47 {dimension_numbers = #tpu.dot_dimension_numbers<[1], [0], [0], [1], [0, 0, 1, 1], [], []>} : vector<1x32xbf16>, vector<32x128xbf16>, vector<1x128xf32> -> vector<1x128xf32>
    %227 = arith.addf %226, %7 : vector<1x128xf32>
    %228 = arith.truncf %202 : vector<1x32xf32> to vector<1x32xbf16>
    %cst_48 = arith.constant dense<0.000000e+00> : vector<1x128xf32>
    %229 = tpu.matmul %228, %4, %cst_48 {dimension_numbers = #tpu.dot_dimension_numbers<[1], [0], [0], [1], [0, 0, 1, 1], [], []>} : vector<1x32xbf16>, vector<32x128xbf16>, vector<1x128xf32> -> vector<1x128xf32>
    %230 = arith.addf %227, %229 : vector<1x128xf32>
    %231 = arith.negf %230 : vector<1x128xf32>
    %232 = math.exp %231 : vector<1x128xf32>
    %cst_49 = arith.constant 1.000000e+00 : f32
    %233 = vector.broadcast %cst_49 : f32 to vector<1x128xf32>
    %234 = arith.addf %233, %232 : vector<1x128xf32>
    %235 = arith.divf %233, %234 : vector<1x128xf32>
    %236 = vector.extract_strided_slice %235 {offsets = [0, 0], sizes = [1, 32], strides = [1, 1]} : vector<1x128xf32> to vector<1x32xf32>
    %237 = vector.extract_strided_slice %235 {offsets = [0, 32], sizes = [1, 32], strides = [1, 1]} : vector<1x128xf32> to vector<1x32xf32>
    %238 = vector.extract_strided_slice %235 {offsets = [0, 64], sizes = [1, 32], strides = [1, 1]} : vector<1x128xf32> to vector<1x32xf32>
    %cst_50 = arith.constant 2.000000e+00 : f32
    %239 = vector.broadcast %cst_50 : f32 to vector<1x32xf32>
    %240 = arith.mulf %239, %238 : vector<1x32xf32>
    %cst_51 = arith.constant 1.000000e+00 : f32
    %241 = vector.broadcast %cst_51 : f32 to vector<1x32xf32>
    %242 = arith.subf %240, %241 : vector<1x32xf32>
    %243 = vector.extract_strided_slice %235 {offsets = [0, 96], sizes = [1, 32], strides = [1, 1]} : vector<1x128xf32> to vector<1x32xf32>
    %244 = arith.mulf %237, %200 : vector<1x32xf32>
    %245 = arith.mulf %236, %242 : vector<1x32xf32>
    %246 = arith.addf %244, %245 : vector<1x32xf32>
    %247 = math.tanh %246 : vector<1x32xf32>
    %248 = arith.mulf %243, %247 : vector<1x32xf32>
    %249 = vector.extract_strided_slice %18 {offsets = [5, 0], sizes = [1, 128], strides = [1, 1]} : vector<8x128xf32> to vector<1x128xf32>
    %250 = arith.truncf %224 : vector<1x32xf32> to vector<1x32xbf16>
    %cst_52 = arith.constant dense<0.000000e+00> : vector<1x128xf32>
    %251 = tpu.matmul %250, %2, %cst_52 {dimension_numbers = #tpu.dot_dimension_numbers<[1], [0], [0], [1], [0, 0, 1, 1], [], []>} : vector<1x32xbf16>, vector<32x128xbf16>, vector<1x128xf32> -> vector<1x128xf32>
    %252 = arith.addf %249, %251 : vector<1x128xf32>
    %253 = arith.negf %252 : vector<1x128xf32>
    %254 = math.exp %253 : vector<1x128xf32>
    %cst_53 = arith.constant 1.000000e+00 : f32
    %255 = vector.broadcast %cst_53 : f32 to vector<1x128xf32>
    %256 = arith.addf %255, %254 : vector<1x128xf32>
    %257 = arith.divf %255, %256 : vector<1x128xf32>
    %258 = vector.extract_strided_slice %257 {offsets = [0, 0], sizes = [1, 32], strides = [1, 1]} : vector<1x128xf32> to vector<1x32xf32>
    %259 = vector.extract_strided_slice %257 {offsets = [0, 32], sizes = [1, 32], strides = [1, 1]} : vector<1x128xf32> to vector<1x32xf32>
    %260 = vector.extract_strided_slice %257 {offsets = [0, 64], sizes = [1, 32], strides = [1, 1]} : vector<1x128xf32> to vector<1x32xf32>
    %cst_54 = arith.constant 2.000000e+00 : f32
    %261 = vector.broadcast %cst_54 : f32 to vector<1x32xf32>
    %262 = arith.mulf %261, %260 : vector<1x32xf32>
    %cst_55 = arith.constant 1.000000e+00 : f32
    %263 = vector.broadcast %cst_55 : f32 to vector<1x32xf32>
    %264 = arith.subf %262, %263 : vector<1x32xf32>
    %265 = vector.extract_strided_slice %257 {offsets = [0, 96], sizes = [1, 32], strides = [1, 1]} : vector<1x128xf32> to vector<1x32xf32>
    %266 = arith.mulf %259, %222 : vector<1x32xf32>
    %267 = arith.mulf %258, %264 : vector<1x32xf32>
    %268 = arith.addf %266, %267 : vector<1x32xf32>
    %269 = math.tanh %268 : vector<1x32xf32>
    %270 = arith.mulf %265, %269 : vector<1x32xf32>
    %271 = arith.truncf %270 : vector<1x32xf32> to vector<1x32xbf16>
    %cst_56 = arith.constant dense<0.000000e+00> : vector<1x128xf32>
    %272 = tpu.matmul %271, %3, %cst_56 {dimension_numbers = #tpu.dot_dimension_numbers<[1], [0], [0], [1], [0, 0, 1, 1], [], []>} : vector<1x32xbf16>, vector<32x128xbf16>, vector<1x128xf32> -> vector<1x128xf32>
    %273 = arith.addf %272, %7 : vector<1x128xf32>
    %274 = arith.truncf %248 : vector<1x32xf32> to vector<1x32xbf16>
    %cst_57 = arith.constant dense<0.000000e+00> : vector<1x128xf32>
    %275 = tpu.matmul %274, %4, %cst_57 {dimension_numbers = #tpu.dot_dimension_numbers<[1], [0], [0], [1], [0, 0, 1, 1], [], []>} : vector<1x32xbf16>, vector<32x128xbf16>, vector<1x128xf32> -> vector<1x128xf32>
    %276 = arith.addf %273, %275 : vector<1x128xf32>
    %277 = arith.negf %276 : vector<1x128xf32>
    %278 = math.exp %277 : vector<1x128xf32>
    %cst_58 = arith.constant 1.000000e+00 : f32
    %279 = vector.broadcast %cst_58 : f32 to vector<1x128xf32>
    %280 = arith.addf %279, %278 : vector<1x128xf32>
    %281 = arith.divf %279, %280 : vector<1x128xf32>
    %282 = vector.extract_strided_slice %281 {offsets = [0, 0], sizes = [1, 32], strides = [1, 1]} : vector<1x128xf32> to vector<1x32xf32>
    %283 = vector.extract_strided_slice %281 {offsets = [0, 32], sizes = [1, 32], strides = [1, 1]} : vector<1x128xf32> to vector<1x32xf32>
    %284 = vector.extract_strided_slice %281 {offsets = [0, 64], sizes = [1, 32], strides = [1, 1]} : vector<1x128xf32> to vector<1x32xf32>
    %cst_59 = arith.constant 2.000000e+00 : f32
    %285 = vector.broadcast %cst_59 : f32 to vector<1x32xf32>
    %286 = arith.mulf %285, %284 : vector<1x32xf32>
    %cst_60 = arith.constant 1.000000e+00 : f32
    %287 = vector.broadcast %cst_60 : f32 to vector<1x32xf32>
    %288 = arith.subf %286, %287 : vector<1x32xf32>
    %289 = vector.extract_strided_slice %281 {offsets = [0, 96], sizes = [1, 32], strides = [1, 1]} : vector<1x128xf32> to vector<1x32xf32>
    %290 = arith.mulf %283, %246 : vector<1x32xf32>
    %291 = arith.mulf %282, %288 : vector<1x32xf32>
    %292 = arith.addf %290, %291 : vector<1x32xf32>
    %293 = math.tanh %292 : vector<1x32xf32>
    %294 = arith.mulf %289, %293 : vector<1x32xf32>
    %295 = vector.extract_strided_slice %18 {offsets = [6, 0], sizes = [1, 128], strides = [1, 1]} : vector<8x128xf32> to vector<1x128xf32>
    %296 = arith.truncf %270 : vector<1x32xf32> to vector<1x32xbf16>
    %cst_61 = arith.constant dense<0.000000e+00> : vector<1x128xf32>
    %297 = tpu.matmul %296, %2, %cst_61 {dimension_numbers = #tpu.dot_dimension_numbers<[1], [0], [0], [1], [0, 0, 1, 1], [], []>} : vector<1x32xbf16>, vector<32x128xbf16>, vector<1x128xf32> -> vector<1x128xf32>
    %298 = arith.addf %295, %297 : vector<1x128xf32>
    %299 = arith.negf %298 : vector<1x128xf32>
    %300 = math.exp %299 : vector<1x128xf32>
    %cst_62 = arith.constant 1.000000e+00 : f32
    %301 = vector.broadcast %cst_62 : f32 to vector<1x128xf32>
    %302 = arith.addf %301, %300 : vector<1x128xf32>
    %303 = arith.divf %301, %302 : vector<1x128xf32>
    %304 = vector.extract_strided_slice %303 {offsets = [0, 0], sizes = [1, 32], strides = [1, 1]} : vector<1x128xf32> to vector<1x32xf32>
    %305 = vector.extract_strided_slice %303 {offsets = [0, 32], sizes = [1, 32], strides = [1, 1]} : vector<1x128xf32> to vector<1x32xf32>
    %306 = vector.extract_strided_slice %303 {offsets = [0, 64], sizes = [1, 32], strides = [1, 1]} : vector<1x128xf32> to vector<1x32xf32>
    %cst_63 = arith.constant 2.000000e+00 : f32
    %307 = vector.broadcast %cst_63 : f32 to vector<1x32xf32>
    %308 = arith.mulf %307, %306 : vector<1x32xf32>
    %cst_64 = arith.constant 1.000000e+00 : f32
    %309 = vector.broadcast %cst_64 : f32 to vector<1x32xf32>
    %310 = arith.subf %308, %309 : vector<1x32xf32>
    %311 = vector.extract_strided_slice %303 {offsets = [0, 96], sizes = [1, 32], strides = [1, 1]} : vector<1x128xf32> to vector<1x32xf32>
    %312 = arith.mulf %305, %268 : vector<1x32xf32>
    %313 = arith.mulf %304, %310 : vector<1x32xf32>
    %314 = arith.addf %312, %313 : vector<1x32xf32>
    %315 = math.tanh %314 : vector<1x32xf32>
    %316 = arith.mulf %311, %315 : vector<1x32xf32>
    %317 = arith.truncf %316 : vector<1x32xf32> to vector<1x32xbf16>
    %cst_65 = arith.constant dense<0.000000e+00> : vector<1x128xf32>
    %318 = tpu.matmul %317, %3, %cst_65 {dimension_numbers = #tpu.dot_dimension_numbers<[1], [0], [0], [1], [0, 0, 1, 1], [], []>} : vector<1x32xbf16>, vector<32x128xbf16>, vector<1x128xf32> -> vector<1x128xf32>
    %319 = arith.addf %318, %7 : vector<1x128xf32>
    %320 = arith.truncf %294 : vector<1x32xf32> to vector<1x32xbf16>
    %cst_66 = arith.constant dense<0.000000e+00> : vector<1x128xf32>
    %321 = tpu.matmul %320, %4, %cst_66 {dimension_numbers = #tpu.dot_dimension_numbers<[1], [0], [0], [1], [0, 0, 1, 1], [], []>} : vector<1x32xbf16>, vector<32x128xbf16>, vector<1x128xf32> -> vector<1x128xf32>
    %322 = arith.addf %319, %321 : vector<1x128xf32>
    %323 = arith.negf %322 : vector<1x128xf32>
    %324 = math.exp %323 : vector<1x128xf32>
    %cst_67 = arith.constant 1.000000e+00 : f32
    %325 = vector.broadcast %cst_67 : f32 to vector<1x128xf32>
    %326 = arith.addf %325, %324 : vector<1x128xf32>
    %327 = arith.divf %325, %326 : vector<1x128xf32>
    %328 = vector.extract_strided_slice %327 {offsets = [0, 0], sizes = [1, 32], strides = [1, 1]} : vector<1x128xf32> to vector<1x32xf32>
    %329 = vector.extract_strided_slice %327 {offsets = [0, 32], sizes = [1, 32], strides = [1, 1]} : vector<1x128xf32> to vector<1x32xf32>
    %330 = vector.extract_strided_slice %327 {offsets = [0, 64], sizes = [1, 32], strides = [1, 1]} : vector<1x128xf32> to vector<1x32xf32>
    %cst_68 = arith.constant 2.000000e+00 : f32
    %331 = vector.broadcast %cst_68 : f32 to vector<1x32xf32>
    %332 = arith.mulf %331, %330 : vector<1x32xf32>
    %cst_69 = arith.constant 1.000000e+00 : f32
    %333 = vector.broadcast %cst_69 : f32 to vector<1x32xf32>
    %334 = arith.subf %332, %333 : vector<1x32xf32>
    %335 = vector.extract_strided_slice %327 {offsets = [0, 96], sizes = [1, 32], strides = [1, 1]} : vector<1x128xf32> to vector<1x32xf32>
    %336 = arith.mulf %329, %292 : vector<1x32xf32>
    %337 = arith.mulf %328, %334 : vector<1x32xf32>
    %338 = arith.addf %336, %337 : vector<1x32xf32>
    %339 = math.tanh %338 : vector<1x32xf32>
    %340 = arith.mulf %335, %339 : vector<1x32xf32>
    %341 = vector.extract_strided_slice %18 {offsets = [7, 0], sizes = [1, 128], strides = [1, 1]} : vector<8x128xf32> to vector<1x128xf32>
    %342 = arith.truncf %316 : vector<1x32xf32> to vector<1x32xbf16>
    %cst_70 = arith.constant dense<0.000000e+00> : vector<1x128xf32>
    %343 = tpu.matmul %342, %2, %cst_70 {dimension_numbers = #tpu.dot_dimension_numbers<[1], [0], [0], [1], [0, 0, 1, 1], [], []>} : vector<1x32xbf16>, vector<32x128xbf16>, vector<1x128xf32> -> vector<1x128xf32>
    %344 = arith.addf %341, %343 : vector<1x128xf32>
    %345 = arith.negf %344 : vector<1x128xf32>
    %346 = math.exp %345 : vector<1x128xf32>
    %cst_71 = arith.constant 1.000000e+00 : f32
    %347 = vector.broadcast %cst_71 : f32 to vector<1x128xf32>
    %348 = arith.addf %347, %346 : vector<1x128xf32>
    %349 = arith.divf %347, %348 : vector<1x128xf32>
    %350 = vector.extract_strided_slice %349 {offsets = [0, 0], sizes = [1, 32], strides = [1, 1]} : vector<1x128xf32> to vector<1x32xf32>
    %351 = vector.extract_strided_slice %349 {offsets = [0, 32], sizes = [1, 32], strides = [1, 1]} : vector<1x128xf32> to vector<1x32xf32>
    %352 = vector.extract_strided_slice %349 {offsets = [0, 64], sizes = [1, 32], strides = [1, 1]} : vector<1x128xf32> to vector<1x32xf32>
    %cst_72 = arith.constant 2.000000e+00 : f32
    %353 = vector.broadcast %cst_72 : f32 to vector<1x32xf32>
    %354 = arith.mulf %353, %352 : vector<1x32xf32>
    %cst_73 = arith.constant 1.000000e+00 : f32
    %355 = vector.broadcast %cst_73 : f32 to vector<1x32xf32>
    %356 = arith.subf %354, %355 : vector<1x32xf32>
    %357 = vector.extract_strided_slice %349 {offsets = [0, 96], sizes = [1, 32], strides = [1, 1]} : vector<1x128xf32> to vector<1x32xf32>
    %358 = arith.mulf %351, %314 : vector<1x32xf32>
    %359 = arith.mulf %350, %356 : vector<1x32xf32>
    %360 = arith.addf %358, %359 : vector<1x32xf32>
    %361 = math.tanh %360 : vector<1x32xf32>
    %362 = arith.mulf %357, %361 : vector<1x32xf32>
    %363 = arith.truncf %362 : vector<1x32xf32> to vector<1x32xbf16>
    %cst_74 = arith.constant dense<0.000000e+00> : vector<1x128xf32>
    %364 = tpu.matmul %363, %3, %cst_74 {dimension_numbers = #tpu.dot_dimension_numbers<[1], [0], [0], [1], [0, 0, 1, 1], [], []>} : vector<1x32xbf16>, vector<32x128xbf16>, vector<1x128xf32> -> vector<1x128xf32>
    %365 = arith.addf %364, %7 : vector<1x128xf32>
    %366 = arith.truncf %340 : vector<1x32xf32> to vector<1x32xbf16>
    %cst_75 = arith.constant dense<0.000000e+00> : vector<1x128xf32>
    %367 = tpu.matmul %366, %4, %cst_75 {dimension_numbers = #tpu.dot_dimension_numbers<[1], [0], [0], [1], [0, 0, 1, 1], [], []>} : vector<1x32xbf16>, vector<32x128xbf16>, vector<1x128xf32> -> vector<1x128xf32>
    %368 = arith.addf %365, %367 : vector<1x128xf32>
    %369 = arith.negf %368 : vector<1x128xf32>
    %370 = math.exp %369 : vector<1x128xf32>
    %cst_76 = arith.constant 1.000000e+00 : f32
    %371 = vector.broadcast %cst_76 : f32 to vector<1x128xf32>
    %372 = arith.addf %371, %370 : vector<1x128xf32>
    %373 = arith.divf %371, %372 : vector<1x128xf32>
    %374 = vector.extract_strided_slice %373 {offsets = [0, 0], sizes = [1, 32], strides = [1, 1]} : vector<1x128xf32> to vector<1x32xf32>
    %375 = vector.extract_strided_slice %373 {offsets = [0, 32], sizes = [1, 32], strides = [1, 1]} : vector<1x128xf32> to vector<1x32xf32>
    %376 = vector.extract_strided_slice %373 {offsets = [0, 64], sizes = [1, 32], strides = [1, 1]} : vector<1x128xf32> to vector<1x32xf32>
    %cst_77 = arith.constant 2.000000e+00 : f32
    %377 = vector.broadcast %cst_77 : f32 to vector<1x32xf32>
    %378 = arith.mulf %377, %376 : vector<1x32xf32>
    %cst_78 = arith.constant 1.000000e+00 : f32
    %379 = vector.broadcast %cst_78 : f32 to vector<1x32xf32>
    %380 = arith.subf %378, %379 : vector<1x32xf32>
    %381 = vector.extract_strided_slice %373 {offsets = [0, 96], sizes = [1, 32], strides = [1, 1]} : vector<1x128xf32> to vector<1x32xf32>
    %382 = arith.mulf %375, %338 : vector<1x32xf32>
    %383 = arith.mulf %374, %380 : vector<1x32xf32>
    %384 = arith.addf %382, %383 : vector<1x32xf32>
    %385 = math.tanh %384 : vector<1x32xf32>
    %386 = arith.mulf %381, %385 : vector<1x32xf32>
    %387 = arith.truncf %362 : vector<1x32xf32> to vector<1x32xbf16>
    %cst_79 = arith.constant dense<0.000000e+00> : vector<1x128xf32>
    %388 = tpu.matmul %387, %2, %cst_79 {dimension_numbers = #tpu.dot_dimension_numbers<[1], [0], [0], [1], [0, 0, 1, 1], [], []>} : vector<1x32xbf16>, vector<32x128xbf16>, vector<1x128xf32> -> vector<1x128xf32>
    %389 = arith.addf %6, %388 : vector<1x128xf32>
    %390 = arith.negf %389 : vector<1x128xf32>
    %391 = math.exp %390 : vector<1x128xf32>
    %cst_80 = arith.constant 1.000000e+00 : f32
    %392 = vector.broadcast %cst_80 : f32 to vector<1x128xf32>
    %393 = arith.addf %392, %391 : vector<1x128xf32>
    %394 = arith.divf %392, %393 : vector<1x128xf32>
    %395 = vector.extract_strided_slice %394 {offsets = [0, 0], sizes = [1, 32], strides = [1, 1]} : vector<1x128xf32> to vector<1x32xf32>
    %396 = vector.extract_strided_slice %394 {offsets = [0, 32], sizes = [1, 32], strides = [1, 1]} : vector<1x128xf32> to vector<1x32xf32>
    %397 = vector.extract_strided_slice %394 {offsets = [0, 64], sizes = [1, 32], strides = [1, 1]} : vector<1x128xf32> to vector<1x32xf32>
    %cst_81 = arith.constant 2.000000e+00 : f32
    %398 = vector.broadcast %cst_81 : f32 to vector<1x32xf32>
    %399 = arith.mulf %398, %397 : vector<1x32xf32>
    %cst_82 = arith.constant 1.000000e+00 : f32
    %400 = vector.broadcast %cst_82 : f32 to vector<1x32xf32>
    %401 = arith.subf %399, %400 : vector<1x32xf32>
    %402 = vector.extract_strided_slice %394 {offsets = [0, 96], sizes = [1, 32], strides = [1, 1]} : vector<1x128xf32> to vector<1x32xf32>
    %403 = arith.mulf %396, %360 : vector<1x32xf32>
    %404 = arith.mulf %395, %401 : vector<1x32xf32>
    %405 = arith.addf %403, %404 : vector<1x32xf32>
    %406 = math.tanh %405 : vector<1x32xf32>
    %407 = arith.mulf %402, %406 : vector<1x32xf32>
    %408 = arith.truncf %407 : vector<1x32xf32> to vector<1x32xbf16>
    %cst_83 = arith.constant dense<0.000000e+00> : vector<1x128xf32>
    %409 = tpu.matmul %408, %3, %cst_83 {dimension_numbers = #tpu.dot_dimension_numbers<[1], [0], [0], [1], [0, 0, 1, 1], [], []>} : vector<1x32xbf16>, vector<32x128xbf16>, vector<1x128xf32> -> vector<1x128xf32>
    %410 = arith.addf %409, %8 : vector<1x128xf32>
    %411 = arith.truncf %407 : vector<1x32xf32> to vector<1x32xbf16>
    %cst_84 = arith.constant dense<0.000000e+00> : vector<1x128xf32>
    %412 = tpu.matmul %411, %2, %cst_84 {dimension_numbers = #tpu.dot_dimension_numbers<[1], [0], [0], [1], [0, 0, 1, 1], [], []>} : vector<1x32xbf16>, vector<32x128xbf16>, vector<1x128xf32> -> vector<1x128xf32>
    %413 = arith.addf %6, %412 : vector<1x128xf32>
    %414 = arith.negf %413 : vector<1x128xf32>
    %415 = math.exp %414 : vector<1x128xf32>
    %cst_85 = arith.constant 1.000000e+00 : f32
    %416 = vector.broadcast %cst_85 : f32 to vector<1x128xf32>
    %417 = arith.addf %416, %415 : vector<1x128xf32>
    %418 = arith.divf %416, %417 : vector<1x128xf32>
    %419 = vector.extract_strided_slice %418 {offsets = [0, 0], sizes = [1, 32], strides = [1, 1]} : vector<1x128xf32> to vector<1x32xf32>
    %420 = vector.extract_strided_slice %418 {offsets = [0, 32], sizes = [1, 32], strides = [1, 1]} : vector<1x128xf32> to vector<1x32xf32>
    %421 = vector.extract_strided_slice %418 {offsets = [0, 64], sizes = [1, 32], strides = [1, 1]} : vector<1x128xf32> to vector<1x32xf32>
    %cst_86 = arith.constant 2.000000e+00 : f32
    %422 = vector.broadcast %cst_86 : f32 to vector<1x32xf32>
    %423 = arith.mulf %422, %421 : vector<1x32xf32>
    %cst_87 = arith.constant 1.000000e+00 : f32
    %424 = vector.broadcast %cst_87 : f32 to vector<1x32xf32>
    %425 = arith.subf %423, %424 : vector<1x32xf32>
    %426 = vector.extract_strided_slice %418 {offsets = [0, 96], sizes = [1, 32], strides = [1, 1]} : vector<1x128xf32> to vector<1x32xf32>
    %427 = arith.mulf %420, %405 : vector<1x32xf32>
    %428 = arith.mulf %419, %425 : vector<1x32xf32>
    %429 = arith.addf %427, %428 : vector<1x32xf32>
    %430 = math.tanh %429 : vector<1x32xf32>
    %431 = arith.mulf %426, %430 : vector<1x32xf32>
    %432 = arith.truncf %431 : vector<1x32xf32> to vector<1x32xbf16>
    %cst_88 = arith.constant dense<0.000000e+00> : vector<1x128xf32>
    %433 = tpu.matmul %432, %3, %cst_88 {dimension_numbers = #tpu.dot_dimension_numbers<[1], [0], [0], [1], [0, 0, 1, 1], [], []>} : vector<1x32xbf16>, vector<32x128xbf16>, vector<1x128xf32> -> vector<1x128xf32>
    %434 = arith.addf %433, %8 : vector<1x128xf32>
    %435 = arith.truncf %431 : vector<1x32xf32> to vector<1x32xbf16>
    %cst_89 = arith.constant dense<0.000000e+00> : vector<1x128xf32>
    %436 = tpu.matmul %435, %2, %cst_89 {dimension_numbers = #tpu.dot_dimension_numbers<[1], [0], [0], [1], [0, 0, 1, 1], [], []>} : vector<1x32xbf16>, vector<32x128xbf16>, vector<1x128xf32> -> vector<1x128xf32>
    %437 = arith.addf %6, %436 : vector<1x128xf32>
    %438 = arith.negf %437 : vector<1x128xf32>
    %439 = math.exp %438 : vector<1x128xf32>
    %cst_90 = arith.constant 1.000000e+00 : f32
    %440 = vector.broadcast %cst_90 : f32 to vector<1x128xf32>
    %441 = arith.addf %440, %439 : vector<1x128xf32>
    %442 = arith.divf %440, %441 : vector<1x128xf32>
    %443 = vector.extract_strided_slice %442 {offsets = [0, 0], sizes = [1, 32], strides = [1, 1]} : vector<1x128xf32> to vector<1x32xf32>
    %444 = vector.extract_strided_slice %442 {offsets = [0, 32], sizes = [1, 32], strides = [1, 1]} : vector<1x128xf32> to vector<1x32xf32>
    %445 = vector.extract_strided_slice %442 {offsets = [0, 64], sizes = [1, 32], strides = [1, 1]} : vector<1x128xf32> to vector<1x32xf32>
    %cst_91 = arith.constant 2.000000e+00 : f32
    %446 = vector.broadcast %cst_91 : f32 to vector<1x32xf32>
    %447 = arith.mulf %446, %445 : vector<1x32xf32>
    %cst_92 = arith.constant 1.000000e+00 : f32
    %448 = vector.broadcast %cst_92 : f32 to vector<1x32xf32>
    %449 = arith.subf %447, %448 : vector<1x32xf32>
    %450 = vector.extract_strided_slice %442 {offsets = [0, 96], sizes = [1, 32], strides = [1, 1]} : vector<1x128xf32> to vector<1x32xf32>
    %451 = arith.mulf %444, %429 : vector<1x32xf32>
    %452 = arith.mulf %443, %449 : vector<1x32xf32>
    %453 = arith.addf %451, %452 : vector<1x32xf32>
    %454 = math.tanh %453 : vector<1x32xf32>
    %455 = arith.mulf %450, %454 : vector<1x32xf32>
    %456 = arith.truncf %455 : vector<1x32xf32> to vector<1x32xbf16>
    %cst_93 = arith.constant dense<0.000000e+00> : vector<1x128xf32>
    %457 = tpu.matmul %456, %3, %cst_93 {dimension_numbers = #tpu.dot_dimension_numbers<[1], [0], [0], [1], [0, 0, 1, 1], [], []>} : vector<1x32xbf16>, vector<32x128xbf16>, vector<1x128xf32> -> vector<1x128xf32>
    %458 = arith.addf %457, %8 : vector<1x128xf32>
    %459 = arith.truncf %455 : vector<1x32xf32> to vector<1x32xbf16>
    %cst_94 = arith.constant dense<0.000000e+00> : vector<1x128xf32>
    %460 = tpu.matmul %459, %2, %cst_94 {dimension_numbers = #tpu.dot_dimension_numbers<[1], [0], [0], [1], [0, 0, 1, 1], [], []>} : vector<1x32xbf16>, vector<32x128xbf16>, vector<1x128xf32> -> vector<1x128xf32>
    %461 = arith.addf %6, %460 : vector<1x128xf32>
    %462 = arith.negf %461 : vector<1x128xf32>
    %463 = math.exp %462 : vector<1x128xf32>
    %cst_95 = arith.constant 1.000000e+00 : f32
    %464 = vector.broadcast %cst_95 : f32 to vector<1x128xf32>
    %465 = arith.addf %464, %463 : vector<1x128xf32>
    %466 = arith.divf %464, %465 : vector<1x128xf32>
    %467 = vector.extract_strided_slice %466 {offsets = [0, 0], sizes = [1, 32], strides = [1, 1]} : vector<1x128xf32> to vector<1x32xf32>
    %468 = vector.extract_strided_slice %466 {offsets = [0, 32], sizes = [1, 32], strides = [1, 1]} : vector<1x128xf32> to vector<1x32xf32>
    %469 = vector.extract_strided_slice %466 {offsets = [0, 64], sizes = [1, 32], strides = [1, 1]} : vector<1x128xf32> to vector<1x32xf32>
    %cst_96 = arith.constant 2.000000e+00 : f32
    %470 = vector.broadcast %cst_96 : f32 to vector<1x32xf32>
    %471 = arith.mulf %470, %469 : vector<1x32xf32>
    %cst_97 = arith.constant 1.000000e+00 : f32
    %472 = vector.broadcast %cst_97 : f32 to vector<1x32xf32>
    %473 = arith.subf %471, %472 : vector<1x32xf32>
    %474 = vector.extract_strided_slice %466 {offsets = [0, 96], sizes = [1, 32], strides = [1, 1]} : vector<1x128xf32> to vector<1x32xf32>
    %475 = arith.mulf %468, %453 : vector<1x32xf32>
    %476 = arith.mulf %467, %473 : vector<1x32xf32>
    %477 = arith.addf %475, %476 : vector<1x32xf32>
    %478 = math.tanh %477 : vector<1x32xf32>
    %479 = arith.mulf %474, %478 : vector<1x32xf32>
    %480 = arith.truncf %479 : vector<1x32xf32> to vector<1x32xbf16>
    %cst_98 = arith.constant dense<0.000000e+00> : vector<1x128xf32>
    %481 = tpu.matmul %480, %3, %cst_98 {dimension_numbers = #tpu.dot_dimension_numbers<[1], [0], [0], [1], [0, 0, 1, 1], [], []>} : vector<1x32xbf16>, vector<32x128xbf16>, vector<1x128xf32> -> vector<1x128xf32>
    %482 = arith.addf %481, %8 : vector<1x128xf32>
    %483 = arith.truncf %479 : vector<1x32xf32> to vector<1x32xbf16>
    %cst_99 = arith.constant dense<0.000000e+00> : vector<1x128xf32>
    %484 = tpu.matmul %483, %2, %cst_99 {dimension_numbers = #tpu.dot_dimension_numbers<[1], [0], [0], [1], [0, 0, 1, 1], [], []>} : vector<1x32xbf16>, vector<32x128xbf16>, vector<1x128xf32> -> vector<1x128xf32>
    %485 = arith.addf %6, %484 : vector<1x128xf32>
    %486 = arith.negf %485 : vector<1x128xf32>
    %487 = math.exp %486 : vector<1x128xf32>
    %cst_100 = arith.constant 1.000000e+00 : f32
    %488 = vector.broadcast %cst_100 : f32 to vector<1x128xf32>
    %489 = arith.addf %488, %487 : vector<1x128xf32>
    %490 = arith.divf %488, %489 : vector<1x128xf32>
    %491 = vector.extract_strided_slice %490 {offsets = [0, 0], sizes = [1, 32], strides = [1, 1]} : vector<1x128xf32> to vector<1x32xf32>
    %492 = vector.extract_strided_slice %490 {offsets = [0, 32], sizes = [1, 32], strides = [1, 1]} : vector<1x128xf32> to vector<1x32xf32>
    %493 = vector.extract_strided_slice %490 {offsets = [0, 64], sizes = [1, 32], strides = [1, 1]} : vector<1x128xf32> to vector<1x32xf32>
    %cst_101 = arith.constant 2.000000e+00 : f32
    %494 = vector.broadcast %cst_101 : f32 to vector<1x32xf32>
    %495 = arith.mulf %494, %493 : vector<1x32xf32>
    %cst_102 = arith.constant 1.000000e+00 : f32
    %496 = vector.broadcast %cst_102 : f32 to vector<1x32xf32>
    %497 = arith.subf %495, %496 : vector<1x32xf32>
    %498 = vector.extract_strided_slice %490 {offsets = [0, 96], sizes = [1, 32], strides = [1, 1]} : vector<1x128xf32> to vector<1x32xf32>
    %499 = arith.mulf %492, %477 : vector<1x32xf32>
    %500 = arith.mulf %491, %497 : vector<1x32xf32>
    %501 = arith.addf %499, %500 : vector<1x32xf32>
    %502 = math.tanh %501 : vector<1x32xf32>
    %503 = arith.mulf %498, %502 : vector<1x32xf32>
    %504 = arith.truncf %503 : vector<1x32xf32> to vector<1x32xbf16>
    %cst_103 = arith.constant dense<0.000000e+00> : vector<1x128xf32>
    %505 = tpu.matmul %504, %3, %cst_103 {dimension_numbers = #tpu.dot_dimension_numbers<[1], [0], [0], [1], [0, 0, 1, 1], [], []>} : vector<1x32xbf16>, vector<32x128xbf16>, vector<1x128xf32> -> vector<1x128xf32>
    %506 = arith.addf %505, %8 : vector<1x128xf32>
    %507 = arith.truncf %503 : vector<1x32xf32> to vector<1x32xbf16>
    %cst_104 = arith.constant dense<0.000000e+00> : vector<1x128xf32>
    %508 = tpu.matmul %507, %2, %cst_104 {dimension_numbers = #tpu.dot_dimension_numbers<[1], [0], [0], [1], [0, 0, 1, 1], [], []>} : vector<1x32xbf16>, vector<32x128xbf16>, vector<1x128xf32> -> vector<1x128xf32>
    %509 = arith.addf %6, %508 : vector<1x128xf32>
    %510 = arith.negf %509 : vector<1x128xf32>
    %511 = math.exp %510 : vector<1x128xf32>
    %cst_105 = arith.constant 1.000000e+00 : f32
    %512 = vector.broadcast %cst_105 : f32 to vector<1x128xf32>
    %513 = arith.addf %512, %511 : vector<1x128xf32>
    %514 = arith.divf %512, %513 : vector<1x128xf32>
    %515 = vector.extract_strided_slice %514 {offsets = [0, 0], sizes = [1, 32], strides = [1, 1]} : vector<1x128xf32> to vector<1x32xf32>
    %516 = vector.extract_strided_slice %514 {offsets = [0, 32], sizes = [1, 32], strides = [1, 1]} : vector<1x128xf32> to vector<1x32xf32>
    %517 = vector.extract_strided_slice %514 {offsets = [0, 64], sizes = [1, 32], strides = [1, 1]} : vector<1x128xf32> to vector<1x32xf32>
    %cst_106 = arith.constant 2.000000e+00 : f32
    %518 = vector.broadcast %cst_106 : f32 to vector<1x32xf32>
    %519 = arith.mulf %518, %517 : vector<1x32xf32>
    %cst_107 = arith.constant 1.000000e+00 : f32
    %520 = vector.broadcast %cst_107 : f32 to vector<1x32xf32>
    %521 = arith.subf %519, %520 : vector<1x32xf32>
    %522 = vector.extract_strided_slice %514 {offsets = [0, 96], sizes = [1, 32], strides = [1, 1]} : vector<1x128xf32> to vector<1x32xf32>
    %523 = arith.mulf %516, %501 : vector<1x32xf32>
    %524 = arith.mulf %515, %521 : vector<1x32xf32>
    %525 = arith.addf %523, %524 : vector<1x32xf32>
    %526 = math.tanh %525 : vector<1x32xf32>
    %527 = arith.mulf %522, %526 : vector<1x32xf32>
    %528 = arith.truncf %527 : vector<1x32xf32> to vector<1x32xbf16>
    %cst_108 = arith.constant dense<0.000000e+00> : vector<1x128xf32>
    %529 = tpu.matmul %528, %3, %cst_108 {dimension_numbers = #tpu.dot_dimension_numbers<[1], [0], [0], [1], [0, 0, 1, 1], [], []>} : vector<1x32xbf16>, vector<32x128xbf16>, vector<1x128xf32> -> vector<1x128xf32>
    %530 = arith.addf %529, %8 : vector<1x128xf32>
    %531 = arith.truncf %527 : vector<1x32xf32> to vector<1x32xbf16>
    %cst_109 = arith.constant dense<0.000000e+00> : vector<1x128xf32>
    %532 = tpu.matmul %531, %2, %cst_109 {dimension_numbers = #tpu.dot_dimension_numbers<[1], [0], [0], [1], [0, 0, 1, 1], [], []>} : vector<1x32xbf16>, vector<32x128xbf16>, vector<1x128xf32> -> vector<1x128xf32>
    %533 = arith.addf %6, %532 : vector<1x128xf32>
    %534 = arith.negf %533 : vector<1x128xf32>
    %535 = math.exp %534 : vector<1x128xf32>
    %cst_110 = arith.constant 1.000000e+00 : f32
    %536 = vector.broadcast %cst_110 : f32 to vector<1x128xf32>
    %537 = arith.addf %536, %535 : vector<1x128xf32>
    %538 = arith.divf %536, %537 : vector<1x128xf32>
    %539 = vector.extract_strided_slice %538 {offsets = [0, 0], sizes = [1, 32], strides = [1, 1]} : vector<1x128xf32> to vector<1x32xf32>
    %540 = vector.extract_strided_slice %538 {offsets = [0, 32], sizes = [1, 32], strides = [1, 1]} : vector<1x128xf32> to vector<1x32xf32>
    %541 = vector.extract_strided_slice %538 {offsets = [0, 64], sizes = [1, 32], strides = [1, 1]} : vector<1x128xf32> to vector<1x32xf32>
    %cst_111 = arith.constant 2.000000e+00 : f32
    %542 = vector.broadcast %cst_111 : f32 to vector<1x32xf32>
    %543 = arith.mulf %542, %541 : vector<1x32xf32>
    %cst_112 = arith.constant 1.000000e+00 : f32
    %544 = vector.broadcast %cst_112 : f32 to vector<1x32xf32>
    %545 = arith.subf %543, %544 : vector<1x32xf32>
    %546 = vector.extract_strided_slice %538 {offsets = [0, 96], sizes = [1, 32], strides = [1, 1]} : vector<1x128xf32> to vector<1x32xf32>
    %547 = arith.mulf %540, %525 : vector<1x32xf32>
    %548 = arith.mulf %539, %545 : vector<1x32xf32>
    %549 = arith.addf %547, %548 : vector<1x32xf32>
    %550 = math.tanh %549 : vector<1x32xf32>
    %551 = arith.mulf %546, %550 : vector<1x32xf32>
    %552 = arith.truncf %551 : vector<1x32xf32> to vector<1x32xbf16>
    %cst_113 = arith.constant dense<0.000000e+00> : vector<1x128xf32>
    %553 = tpu.matmul %552, %3, %cst_113 {dimension_numbers = #tpu.dot_dimension_numbers<[1], [0], [0], [1], [0, 0, 1, 1], [], []>} : vector<1x32xbf16>, vector<32x128xbf16>, vector<1x128xf32> -> vector<1x128xf32>
    %554 = arith.addf %553, %8 : vector<1x128xf32>
    %555 = arith.truncf %551 : vector<1x32xf32> to vector<1x32xbf16>
    %cst_114 = arith.constant dense<0.000000e+00> : vector<1x128xf32>
    %556 = tpu.matmul %555, %2, %cst_114 {dimension_numbers = #tpu.dot_dimension_numbers<[1], [0], [0], [1], [0, 0, 1, 1], [], []>} : vector<1x32xbf16>, vector<32x128xbf16>, vector<1x128xf32> -> vector<1x128xf32>
    %557 = arith.addf %6, %556 : vector<1x128xf32>
    %558 = arith.negf %557 : vector<1x128xf32>
    %559 = math.exp %558 : vector<1x128xf32>
    %cst_115 = arith.constant 1.000000e+00 : f32
    %560 = vector.broadcast %cst_115 : f32 to vector<1x128xf32>
    %561 = arith.addf %560, %559 : vector<1x128xf32>
    %562 = arith.divf %560, %561 : vector<1x128xf32>
    %563 = vector.extract_strided_slice %562 {offsets = [0, 0], sizes = [1, 32], strides = [1, 1]} : vector<1x128xf32> to vector<1x32xf32>
    %564 = vector.extract_strided_slice %562 {offsets = [0, 32], sizes = [1, 32], strides = [1, 1]} : vector<1x128xf32> to vector<1x32xf32>
    %565 = vector.extract_strided_slice %562 {offsets = [0, 64], sizes = [1, 32], strides = [1, 1]} : vector<1x128xf32> to vector<1x32xf32>
    %cst_116 = arith.constant 2.000000e+00 : f32
    %566 = vector.broadcast %cst_116 : f32 to vector<1x32xf32>
    %567 = arith.mulf %566, %565 : vector<1x32xf32>
    %cst_117 = arith.constant 1.000000e+00 : f32
    %568 = vector.broadcast %cst_117 : f32 to vector<1x32xf32>
    %569 = arith.subf %567, %568 : vector<1x32xf32>
    %570 = vector.extract_strided_slice %562 {offsets = [0, 96], sizes = [1, 32], strides = [1, 1]} : vector<1x128xf32> to vector<1x32xf32>
    %571 = arith.mulf %564, %549 : vector<1x32xf32>
    %572 = arith.mulf %563, %569 : vector<1x32xf32>
    %573 = arith.addf %571, %572 : vector<1x32xf32>
    %574 = math.tanh %573 : vector<1x32xf32>
    %575 = arith.mulf %570, %574 : vector<1x32xf32>
    %576 = arith.truncf %575 : vector<1x32xf32> to vector<1x32xbf16>
    %cst_118 = arith.constant dense<0.000000e+00> : vector<1x128xf32>
    %577 = tpu.matmul %576, %3, %cst_118 {dimension_numbers = #tpu.dot_dimension_numbers<[1], [0], [0], [1], [0, 0, 1, 1], [], []>} : vector<1x32xbf16>, vector<32x128xbf16>, vector<1x128xf32> -> vector<1x128xf32>
    %578 = arith.addf %577, %8 : vector<1x128xf32>
    %579 = arith.truncf %386 : vector<1x32xf32> to vector<1x32xbf16>
    %cst_119 = arith.constant dense<0.000000e+00> : vector<1x128xf32>
    %580 = tpu.matmul %579, %4, %cst_119 {dimension_numbers = #tpu.dot_dimension_numbers<[1], [0], [0], [1], [0, 0, 1, 1], [], []>} : vector<1x32xbf16>, vector<32x128xbf16>, vector<1x128xf32> -> vector<1x128xf32>
    %581 = arith.addf %410, %580 : vector<1x128xf32>
    %582 = arith.negf %581 : vector<1x128xf32>
    %583 = math.exp %582 : vector<1x128xf32>
    %cst_120 = arith.constant 1.000000e+00 : f32
    %584 = vector.broadcast %cst_120 : f32 to vector<1x128xf32>
    %585 = arith.addf %584, %583 : vector<1x128xf32>
    %586 = arith.divf %584, %585 : vector<1x128xf32>
    %587 = vector.extract_strided_slice %586 {offsets = [0, 0], sizes = [1, 32], strides = [1, 1]} : vector<1x128xf32> to vector<1x32xf32>
    %588 = vector.extract_strided_slice %586 {offsets = [0, 32], sizes = [1, 32], strides = [1, 1]} : vector<1x128xf32> to vector<1x32xf32>
    %589 = vector.extract_strided_slice %586 {offsets = [0, 64], sizes = [1, 32], strides = [1, 1]} : vector<1x128xf32> to vector<1x32xf32>
    %cst_121 = arith.constant 2.000000e+00 : f32
    %590 = vector.broadcast %cst_121 : f32 to vector<1x32xf32>
    %591 = arith.mulf %590, %589 : vector<1x32xf32>
    %cst_122 = arith.constant 1.000000e+00 : f32
    %592 = vector.broadcast %cst_122 : f32 to vector<1x32xf32>
    %593 = arith.subf %591, %592 : vector<1x32xf32>
    %594 = vector.extract_strided_slice %586 {offsets = [0, 96], sizes = [1, 32], strides = [1, 1]} : vector<1x128xf32> to vector<1x32xf32>
    %595 = arith.mulf %588, %384 : vector<1x32xf32>
    %596 = arith.mulf %587, %593 : vector<1x32xf32>
    %597 = arith.addf %595, %596 : vector<1x32xf32>
    %598 = math.tanh %597 : vector<1x32xf32>
    %599 = arith.mulf %594, %598 : vector<1x32xf32>
    %c0_123 = arith.constant 0 : index
    %c0_124 = arith.constant 0 : index
    %600 = vector.load %arg7[%c0_123, %c0_124] : memref<8x32xf32, #tpu.memory_space<vmem>>, vector<1x32xf32>
    tpu.vector_store %arg7[%c0_123, %c0_124], %599 {strides = array<i32>} : memref<8x32xf32, #tpu.memory_space<vmem>>, vector<1x32xf32>,
    %601 = arith.truncf %599 : vector<1x32xf32> to vector<1x32xbf16>
    %cst_125 = arith.constant dense<0.000000e+00> : vector<1x128xf32>
    %602 = tpu.matmul %601, %4, %cst_125 {dimension_numbers = #tpu.dot_dimension_numbers<[1], [0], [0], [1], [0, 0, 1, 1], [], []>} : vector<1x32xbf16>, vector<32x128xbf16>, vector<1x128xf32> -> vector<1x128xf32>
    %603 = arith.addf %434, %602 : vector<1x128xf32>
    %604 = arith.negf %603 : vector<1x128xf32>
    %605 = math.exp %604 : vector<1x128xf32>
    %cst_126 = arith.constant 1.000000e+00 : f32
    %606 = vector.broadcast %cst_126 : f32 to vector<1x128xf32>
    %607 = arith.addf %606, %605 : vector<1x128xf32>
    %608 = arith.divf %606, %607 : vector<1x128xf32>
    %609 = vector.extract_strided_slice %608 {offsets = [0, 0], sizes = [1, 32], strides = [1, 1]} : vector<1x128xf32> to vector<1x32xf32>
    %610 = vector.extract_strided_slice %608 {offsets = [0, 32], sizes = [1, 32], strides = [1, 1]} : vector<1x128xf32> to vector<1x32xf32>
    %611 = vector.extract_strided_slice %608 {offsets = [0, 64], sizes = [1, 32], strides = [1, 1]} : vector<1x128xf32> to vector<1x32xf32>
    %cst_127 = arith.constant 2.000000e+00 : f32
    %612 = vector.broadcast %cst_127 : f32 to vector<1x32xf32>
    %613 = arith.mulf %612, %611 : vector<1x32xf32>
    %cst_128 = arith.constant 1.000000e+00 : f32
    %614 = vector.broadcast %cst_128 : f32 to vector<1x32xf32>
    %615 = arith.subf %613, %614 : vector<1x32xf32>
    %616 = vector.extract_strided_slice %608 {offsets = [0, 96], sizes = [1, 32], strides = [1, 1]} : vector<1x128xf32> to vector<1x32xf32>
    %617 = arith.mulf %610, %597 : vector<1x32xf32>
    %618 = arith.mulf %609, %615 : vector<1x32xf32>
    %619 = arith.addf %617, %618 : vector<1x32xf32>
    %620 = math.tanh %619 : vector<1x32xf32>
    %621 = arith.mulf %616, %620 : vector<1x32xf32>
    %c1 = arith.constant 1 : index
    %c0_129 = arith.constant 0 : index
    %622 = vector.load %arg7[%c1, %c0_129] : memref<8x32xf32, #tpu.memory_space<vmem>>, vector<1x32xf32>
    tpu.vector_store %arg7[%c1, %c0_129], %621 {strides = array<i32>} : memref<8x32xf32, #tpu.memory_space<vmem>>, vector<1x32xf32>,
    %623 = arith.truncf %621 : vector<1x32xf32> to vector<1x32xbf16>
    %cst_130 = arith.constant dense<0.000000e+00> : vector<1x128xf32>
    %624 = tpu.matmul %623, %4, %cst_130 {dimension_numbers = #tpu.dot_dimension_numbers<[1], [0], [0], [1], [0, 0, 1, 1], [], []>} : vector<1x32xbf16>, vector<32x128xbf16>, vector<1x128xf32> -> vector<1x128xf32>
    %625 = arith.addf %458, %624 : vector<1x128xf32>
    %626 = arith.negf %625 : vector<1x128xf32>
    %627 = math.exp %626 : vector<1x128xf32>
    %cst_131 = arith.constant 1.000000e+00 : f32
    %628 = vector.broadcast %cst_131 : f32 to vector<1x128xf32>
    %629 = arith.addf %628, %627 : vector<1x128xf32>
    %630 = arith.divf %628, %629 : vector<1x128xf32>
    %631 = vector.extract_strided_slice %630 {offsets = [0, 0], sizes = [1, 32], strides = [1, 1]} : vector<1x128xf32> to vector<1x32xf32>
    %632 = vector.extract_strided_slice %630 {offsets = [0, 32], sizes = [1, 32], strides = [1, 1]} : vector<1x128xf32> to vector<1x32xf32>
    %633 = vector.extract_strided_slice %630 {offsets = [0, 64], sizes = [1, 32], strides = [1, 1]} : vector<1x128xf32> to vector<1x32xf32>
    %cst_132 = arith.constant 2.000000e+00 : f32
    %634 = vector.broadcast %cst_132 : f32 to vector<1x32xf32>
    %635 = arith.mulf %634, %633 : vector<1x32xf32>
    %cst_133 = arith.constant 1.000000e+00 : f32
    %636 = vector.broadcast %cst_133 : f32 to vector<1x32xf32>
    %637 = arith.subf %635, %636 : vector<1x32xf32>
    %638 = vector.extract_strided_slice %630 {offsets = [0, 96], sizes = [1, 32], strides = [1, 1]} : vector<1x128xf32> to vector<1x32xf32>
    %639 = arith.mulf %632, %619 : vector<1x32xf32>
    %640 = arith.mulf %631, %637 : vector<1x32xf32>
    %641 = arith.addf %639, %640 : vector<1x32xf32>
    %642 = math.tanh %641 : vector<1x32xf32>
    %643 = arith.mulf %638, %642 : vector<1x32xf32>
    %c2 = arith.constant 2 : index
    %c0_134 = arith.constant 0 : index
    %644 = vector.load %arg7[%c2, %c0_134] : memref<8x32xf32, #tpu.memory_space<vmem>>, vector<1x32xf32>
    tpu.vector_store %arg7[%c2, %c0_134], %643 {strides = array<i32>} : memref<8x32xf32, #tpu.memory_space<vmem>>, vector<1x32xf32>,
    %645 = arith.truncf %643 : vector<1x32xf32> to vector<1x32xbf16>
    %cst_135 = arith.constant dense<0.000000e+00> : vector<1x128xf32>
    %646 = tpu.matmul %645, %4, %cst_135 {dimension_numbers = #tpu.dot_dimension_numbers<[1], [0], [0], [1], [0, 0, 1, 1], [], []>} : vector<1x32xbf16>, vector<32x128xbf16>, vector<1x128xf32> -> vector<1x128xf32>
    %647 = arith.addf %482, %646 : vector<1x128xf32>
    %648 = arith.negf %647 : vector<1x128xf32>
    %649 = math.exp %648 : vector<1x128xf32>
    %cst_136 = arith.constant 1.000000e+00 : f32
    %650 = vector.broadcast %cst_136 : f32 to vector<1x128xf32>
    %651 = arith.addf %650, %649 : vector<1x128xf32>
    %652 = arith.divf %650, %651 : vector<1x128xf32>
    %653 = vector.extract_strided_slice %652 {offsets = [0, 0], sizes = [1, 32], strides = [1, 1]} : vector<1x128xf32> to vector<1x32xf32>
    %654 = vector.extract_strided_slice %652 {offsets = [0, 32], sizes = [1, 32], strides = [1, 1]} : vector<1x128xf32> to vector<1x32xf32>
    %655 = vector.extract_strided_slice %652 {offsets = [0, 64], sizes = [1, 32], strides = [1, 1]} : vector<1x128xf32> to vector<1x32xf32>
    %cst_137 = arith.constant 2.000000e+00 : f32
    %656 = vector.broadcast %cst_137 : f32 to vector<1x32xf32>
    %657 = arith.mulf %656, %655 : vector<1x32xf32>
    %cst_138 = arith.constant 1.000000e+00 : f32
    %658 = vector.broadcast %cst_138 : f32 to vector<1x32xf32>
    %659 = arith.subf %657, %658 : vector<1x32xf32>
    %660 = vector.extract_strided_slice %652 {offsets = [0, 96], sizes = [1, 32], strides = [1, 1]} : vector<1x128xf32> to vector<1x32xf32>
    %661 = arith.mulf %654, %641 : vector<1x32xf32>
    %662 = arith.mulf %653, %659 : vector<1x32xf32>
    %663 = arith.addf %661, %662 : vector<1x32xf32>
    %664 = math.tanh %663 : vector<1x32xf32>
    %665 = arith.mulf %660, %664 : vector<1x32xf32>
    %c3 = arith.constant 3 : index
    %c0_139 = arith.constant 0 : index
    %666 = vector.load %arg7[%c3, %c0_139] : memref<8x32xf32, #tpu.memory_space<vmem>>, vector<1x32xf32>
    tpu.vector_store %arg7[%c3, %c0_139], %665 {strides = array<i32>} : memref<8x32xf32, #tpu.memory_space<vmem>>, vector<1x32xf32>,
    %667 = arith.truncf %665 : vector<1x32xf32> to vector<1x32xbf16>
    %cst_140 = arith.constant dense<0.000000e+00> : vector<1x128xf32>
    %668 = tpu.matmul %667, %4, %cst_140 {dimension_numbers = #tpu.dot_dimension_numbers<[1], [0], [0], [1], [0, 0, 1, 1], [], []>} : vector<1x32xbf16>, vector<32x128xbf16>, vector<1x128xf32> -> vector<1x128xf32>
    %669 = arith.addf %506, %668 : vector<1x128xf32>
    %670 = arith.negf %669 : vector<1x128xf32>
    %671 = math.exp %670 : vector<1x128xf32>
    %cst_141 = arith.constant 1.000000e+00 : f32
    %672 = vector.broadcast %cst_141 : f32 to vector<1x128xf32>
    %673 = arith.addf %672, %671 : vector<1x128xf32>
    %674 = arith.divf %672, %673 : vector<1x128xf32>
    %675 = vector.extract_strided_slice %674 {offsets = [0, 0], sizes = [1, 32], strides = [1, 1]} : vector<1x128xf32> to vector<1x32xf32>
    %676 = vector.extract_strided_slice %674 {offsets = [0, 32], sizes = [1, 32], strides = [1, 1]} : vector<1x128xf32> to vector<1x32xf32>
    %677 = vector.extract_strided_slice %674 {offsets = [0, 64], sizes = [1, 32], strides = [1, 1]} : vector<1x128xf32> to vector<1x32xf32>
    %cst_142 = arith.constant 2.000000e+00 : f32
    %678 = vector.broadcast %cst_142 : f32 to vector<1x32xf32>
    %679 = arith.mulf %678, %677 : vector<1x32xf32>
    %cst_143 = arith.constant 1.000000e+00 : f32
    %680 = vector.broadcast %cst_143 : f32 to vector<1x32xf32>
    %681 = arith.subf %679, %680 : vector<1x32xf32>
    %682 = vector.extract_strided_slice %674 {offsets = [0, 96], sizes = [1, 32], strides = [1, 1]} : vector<1x128xf32> to vector<1x32xf32>
    %683 = arith.mulf %676, %663 : vector<1x32xf32>
    %684 = arith.mulf %675, %681 : vector<1x32xf32>
    %685 = arith.addf %683, %684 : vector<1x32xf32>
    %686 = math.tanh %685 : vector<1x32xf32>
    %687 = arith.mulf %682, %686 : vector<1x32xf32>
    %c4 = arith.constant 4 : index
    %c0_144 = arith.constant 0 : index
    %688 = vector.load %arg7[%c4, %c0_144] : memref<8x32xf32, #tpu.memory_space<vmem>>, vector<1x32xf32>
    tpu.vector_store %arg7[%c4, %c0_144], %687 {strides = array<i32>} : memref<8x32xf32, #tpu.memory_space<vmem>>, vector<1x32xf32>,
    %689 = arith.truncf %687 : vector<1x32xf32> to vector<1x32xbf16>
    %cst_145 = arith.constant dense<0.000000e+00> : vector<1x128xf32>
    %690 = tpu.matmul %689, %4, %cst_145 {dimension_numbers = #tpu.dot_dimension_numbers<[1], [0], [0], [1], [0, 0, 1, 1], [], []>} : vector<1x32xbf16>, vector<32x128xbf16>, vector<1x128xf32> -> vector<1x128xf32>
    %691 = arith.addf %530, %690 : vector<1x128xf32>
    %692 = arith.negf %691 : vector<1x128xf32>
    %693 = math.exp %692 : vector<1x128xf32>
    %cst_146 = arith.constant 1.000000e+00 : f32
    %694 = vector.broadcast %cst_146 : f32 to vector<1x128xf32>
    %695 = arith.addf %694, %693 : vector<1x128xf32>
    %696 = arith.divf %694, %695 : vector<1x128xf32>
    %697 = vector.extract_strided_slice %696 {offsets = [0, 0], sizes = [1, 32], strides = [1, 1]} : vector<1x128xf32> to vector<1x32xf32>
    %698 = vector.extract_strided_slice %696 {offsets = [0, 32], sizes = [1, 32], strides = [1, 1]} : vector<1x128xf32> to vector<1x32xf32>
    %699 = vector.extract_strided_slice %696 {offsets = [0, 64], sizes = [1, 32], strides = [1, 1]} : vector<1x128xf32> to vector<1x32xf32>
    %cst_147 = arith.constant 2.000000e+00 : f32
    %700 = vector.broadcast %cst_147 : f32 to vector<1x32xf32>
    %701 = arith.mulf %700, %699 : vector<1x32xf32>
    %cst_148 = arith.constant 1.000000e+00 : f32
    %702 = vector.broadcast %cst_148 : f32 to vector<1x32xf32>
    %703 = arith.subf %701, %702 : vector<1x32xf32>
    %704 = vector.extract_strided_slice %696 {offsets = [0, 96], sizes = [1, 32], strides = [1, 1]} : vector<1x128xf32> to vector<1x32xf32>
    %705 = arith.mulf %698, %685 : vector<1x32xf32>
    %706 = arith.mulf %697, %703 : vector<1x32xf32>
    %707 = arith.addf %705, %706 : vector<1x32xf32>
    %708 = math.tanh %707 : vector<1x32xf32>
    %709 = arith.mulf %704, %708 : vector<1x32xf32>
    %c5 = arith.constant 5 : index
    %c0_149 = arith.constant 0 : index
    %710 = vector.load %arg7[%c5, %c0_149] : memref<8x32xf32, #tpu.memory_space<vmem>>, vector<1x32xf32>
    tpu.vector_store %arg7[%c5, %c0_149], %709 {strides = array<i32>} : memref<8x32xf32, #tpu.memory_space<vmem>>, vector<1x32xf32>,
    %711 = arith.truncf %709 : vector<1x32xf32> to vector<1x32xbf16>
    %cst_150 = arith.constant dense<0.000000e+00> : vector<1x128xf32>
    %712 = tpu.matmul %711, %4, %cst_150 {dimension_numbers = #tpu.dot_dimension_numbers<[1], [0], [0], [1], [0, 0, 1, 1], [], []>} : vector<1x32xbf16>, vector<32x128xbf16>, vector<1x128xf32> -> vector<1x128xf32>
    %713 = arith.addf %554, %712 : vector<1x128xf32>
    %714 = arith.negf %713 : vector<1x128xf32>
    %715 = math.exp %714 : vector<1x128xf32>
    %cst_151 = arith.constant 1.000000e+00 : f32
    %716 = vector.broadcast %cst_151 : f32 to vector<1x128xf32>
    %717 = arith.addf %716, %715 : vector<1x128xf32>
    %718 = arith.divf %716, %717 : vector<1x128xf32>
    %719 = vector.extract_strided_slice %718 {offsets = [0, 0], sizes = [1, 32], strides = [1, 1]} : vector<1x128xf32> to vector<1x32xf32>
    %720 = vector.extract_strided_slice %718 {offsets = [0, 32], sizes = [1, 32], strides = [1, 1]} : vector<1x128xf32> to vector<1x32xf32>
    %721 = vector.extract_strided_slice %718 {offsets = [0, 64], sizes = [1, 32], strides = [1, 1]} : vector<1x128xf32> to vector<1x32xf32>
    %cst_152 = arith.constant 2.000000e+00 : f32
    %722 = vector.broadcast %cst_152 : f32 to vector<1x32xf32>
    %723 = arith.mulf %722, %721 : vector<1x32xf32>
    %cst_153 = arith.constant 1.000000e+00 : f32
    %724 = vector.broadcast %cst_153 : f32 to vector<1x32xf32>
    %725 = arith.subf %723, %724 : vector<1x32xf32>
    %726 = vector.extract_strided_slice %718 {offsets = [0, 96], sizes = [1, 32], strides = [1, 1]} : vector<1x128xf32> to vector<1x32xf32>
    %727 = arith.mulf %720, %707 : vector<1x32xf32>
    %728 = arith.mulf %719, %725 : vector<1x32xf32>
    %729 = arith.addf %727, %728 : vector<1x32xf32>
    %730 = math.tanh %729 : vector<1x32xf32>
    %731 = arith.mulf %726, %730 : vector<1x32xf32>
    %c6 = arith.constant 6 : index
    %c0_154 = arith.constant 0 : index
    %732 = vector.load %arg7[%c6, %c0_154] : memref<8x32xf32, #tpu.memory_space<vmem>>, vector<1x32xf32>
    tpu.vector_store %arg7[%c6, %c0_154], %731 {strides = array<i32>} : memref<8x32xf32, #tpu.memory_space<vmem>>, vector<1x32xf32>,
    %733 = arith.truncf %731 : vector<1x32xf32> to vector<1x32xbf16>
    %cst_155 = arith.constant dense<0.000000e+00> : vector<1x128xf32>
    %734 = tpu.matmul %733, %4, %cst_155 {dimension_numbers = #tpu.dot_dimension_numbers<[1], [0], [0], [1], [0, 0, 1, 1], [], []>} : vector<1x32xbf16>, vector<32x128xbf16>, vector<1x128xf32> -> vector<1x128xf32>
    %735 = arith.addf %578, %734 : vector<1x128xf32>
    %736 = arith.negf %735 : vector<1x128xf32>
    %737 = math.exp %736 : vector<1x128xf32>
    %cst_156 = arith.constant 1.000000e+00 : f32
    %738 = vector.broadcast %cst_156 : f32 to vector<1x128xf32>
    %739 = arith.addf %738, %737 : vector<1x128xf32>
    %740 = arith.divf %738, %739 : vector<1x128xf32>
    %741 = vector.extract_strided_slice %740 {offsets = [0, 0], sizes = [1, 32], strides = [1, 1]} : vector<1x128xf32> to vector<1x32xf32>
    %742 = vector.extract_strided_slice %740 {offsets = [0, 32], sizes = [1, 32], strides = [1, 1]} : vector<1x128xf32> to vector<1x32xf32>
    %743 = vector.extract_strided_slice %740 {offsets = [0, 64], sizes = [1, 32], strides = [1, 1]} : vector<1x128xf32> to vector<1x32xf32>
    %cst_157 = arith.constant 2.000000e+00 : f32
    %744 = vector.broadcast %cst_157 : f32 to vector<1x32xf32>
    %745 = arith.mulf %744, %743 : vector<1x32xf32>
    %cst_158 = arith.constant 1.000000e+00 : f32
    %746 = vector.broadcast %cst_158 : f32 to vector<1x32xf32>
    %747 = arith.subf %745, %746 : vector<1x32xf32>
    %748 = vector.extract_strided_slice %740 {offsets = [0, 96], sizes = [1, 32], strides = [1, 1]} : vector<1x128xf32> to vector<1x32xf32>
    %749 = arith.mulf %742, %729 : vector<1x32xf32>
    %750 = arith.mulf %741, %747 : vector<1x32xf32>
    %751 = arith.addf %749, %750 : vector<1x32xf32>
    %752 = math.tanh %751 : vector<1x32xf32>
    %753 = arith.mulf %748, %752 : vector<1x32xf32>
    %c7 = arith.constant 7 : index
    %c0_159 = arith.constant 0 : index
    %754 = vector.load %arg7[%c7, %c0_159] : memref<8x32xf32, #tpu.memory_space<vmem>>, vector<1x32xf32>
    tpu.vector_store %arg7[%c7, %c0_159], %753 {strides = array<i32>} : memref<8x32xf32, #tpu.memory_space<vmem>>, vector<1x32xf32>,
    %c0_160 = arith.constant 0 : index
    %c0_161 = arith.constant 0 : index
    %755 = vector.load %arg7[%c0_160, %c0_161] : memref<8x32xf32, #tpu.memory_space<vmem>>, vector<8x32xf32>
    %756 = arith.truncf %755 : vector<8x32xf32> to vector<8x32xbf16>
    %c0_162 = arith.constant 0 : index
    %c0_163 = arith.constant 0 : index
    %757 = vector.load %arg4[%c0_162, %c0_163] : memref<32x512xbf16, #tpu.memory_space<vmem>>, vector<32x512xbf16>
    %cst_164 = arith.constant dense<0.000000e+00> : vector<8x512xf32>
    %758 = tpu.matmul %756, %757, %cst_164 {dimension_numbers = #tpu.dot_dimension_numbers<[1], [0], [0], [1], [0, 0, 1, 1], [], []>} : vector<8x32xbf16>, vector<32x512xbf16>, vector<8x512xf32> -> vector<8x512xf32>
    %c0_165 = arith.constant 0 : index
    %c0_166 = arith.constant 0 : index
    %759 = vector.load %arg5[%c0_165, %c0_166] : memref<1x512xf32, #tpu.memory_space<vmem>>, vector<1x512xf32>
    %760 = vector.broadcast %759 : vector<1x512xf32> to vector<8x512xf32>
    %761 = arith.addf %758, %760 : vector<8x512xf32>
    %cst_167 = arith.constant dense<0xFF800000> : vector<8xf32>
    %762 = vector.multi_reduction <maximumf>, %761, %cst_167 [1] : vector<8x512xf32> to vector<8xf32>
    %763 = vector.shape_cast %762 : vector<8xf32> to vector<8x1xf32>
    %764 = vector.broadcast %763 : vector<8x1xf32> to vector<8x512xf32>
    %765 = arith.subf %761, %764 : vector<8x512xf32>
    %766 = math.exp %765 : vector<8x512xf32>
    %cst_168 = arith.constant dense<0.000000e+00> : vector<8xf32>
    %767 = vector.multi_reduction <add>, %766, %cst_168 [1] : vector<8x512xf32> to vector<8xf32>
    %768 = vector.shape_cast %767 : vector<8xf32> to vector<8x1xf32>
    %769 = math.log %768 : vector<8x1xf32>
    %770 = vector.broadcast %769 : vector<8x1xf32> to vector<8x512xf32>
    %771 = arith.subf %765, %770 : vector<8x512xf32>
    %c0_169 = arith.constant 0 : index
    %c0_170 = arith.constant 0 : index
    %772 = vector.load %arg6[%c0_169, %c0_170] : memref<8x512xf32, #tpu.memory_space<vmem>>, vector<8x512xf32>
    tpu.vector_store %arg6[%c0_169, %c0_170], %771 {strides = array<i32>} : memref<8x512xf32, #tpu.memory_space<vmem>>, vector<8x512xf32>,
    return
  }
}

</mosaic_0001>

<bundles_post_ra>
// kernel: tpu_custom_call.1
= control target key start
LH: loop header
LB: loop body
LE: loop exit
PB: predicated region body
PF: predicated region fallthrough
CT: control target
= control target key end

     0   :  { %11 = vsyncpa [#allocation4], 0  ;;  %s5423_s0 = inlined_call_operand.hbm [shape: f32[8,64], index: 0, kind: input, shape index: {}]   ;;  %s5424_s1 = inlined_call_operand.hbm [shape: f32[4,32], index: 1, kind: input, shape index: {}]   ;;  %s5425_s2 = inlined_call_operand.hbm [shape: bf16[160,128], index: 2, kind: input, shape index: {}]   ;;  %s5426_s3 = inlined_call_operand.vmem [shape: f32[3,128], index: 3, kind: input, shape index: {}]   ;;  %s5427_s4 = inlined_call_operand.hbm [shape: bf16[32,512], index: 4, kind: input, shape index: {}]   ;;  %s5428_s5 = inlined_call_operand.vmem [shape: f32[1,512], index: 5, kind: input, shape index: {}]   ;;  %s5429_s6 = inlined_call_operand.hbm [shape: f32[8,512], index: 6, kind: output, shape index: {}]  }
   0x1   :  { %12 = vsyncpa [#allocation7], 0 }
   0x2   :  { %13 = vsyncpa [#allocation10], 0 }
   0x3   :  { %14 = vsyncpa [#allocation5], 0  ;;  %s4629_s21 = smov [#allocation6]   ;;  %s4630_s23 = smov [#allocation3]  }
   0x4   :  { %s31_s22 = sshll.u32 %s4629_s21, 4  ;;  %s21_s24 = sshll.u32 %s4630_s23, 4  ;;  %s32_s22 = int_to_ptr.vmem [resolvable:$true] %s31_s22  ;;  %s22_s24 = int_to_ptr.vmem [resolvable:$true] %s21_s24 }
   0x5   :  { %s4511_s27 = scalar_lea.hbm %s5424_s1, 64 }
   0x6   :  { %p4512_p0 = scmp.ne.s32.totalorder %s5424_s1, %s4511_s27  ;;  %p4515_p1 = scmp.lt.u32.totalorder %s4511_s27, %s5424_s1 }
   0x8   :  { %p4517_p2 = pnand %p4515_p1, %p4512_p0 }
   0xa   :  { %4520 = shalt.err (!%p4517_p2)
}
   0xb   :  { %s4521_s8 = scalar_lea.vmem %s32_s22, 64  ;;  %p4526_p4 = scmp.lt.s32.totalorder %s32_s22, %s32_s22 }
   0xc   :  { %p4522_p3 = scmp.ne.s32.totalorder %s32_s22, %s4521_s8  ;;  %p4527_p5 = scmp.lt.s32.totalorder %s4521_s8, %s4521_s8 }
   0xe   :  { %p4528_p6 = por %p4527_p5, %p4526_p4 }
  0x10   :  { %p4529_p7 = pnand %p4528_p6, %p4522_p3 }
  0x12   :  { %4532 = shalt.err (!%p4529_p7)
}
  0x13   :  { %34 = dma.hbm_to_vmem [thread:$0]  %s5424_s1, 64, %s32_s22, [#allocation7]  }
  0x14   :  { %s4533_s13 = scalar_lea.hbm %s5423_s0, 128 }
  0x15   :  { %p4534_p8 = scmp.ne.s32.totalorder %s5423_s0, %s4533_s13  ;;  %p4537_p9 = scmp.lt.u32.totalorder %s4533_s13, %s5423_s0 }
  0x17   :  { %p4539_p10 = pnand %p4537_p9, %p4534_p8 }
  0x19   :  { %4542 = shalt.err (!%p4539_p10)
}
  0x1a   :  { %s4543_s18 = scalar_lea.vmem %s22_s24, 128  ;;  %p4548_p12 = scmp.lt.s32.totalorder %s22_s24, %s22_s24 }
  0x1b   :  { %p4544_p11 = scmp.ne.s32.totalorder %s22_s24, %s4543_s18  ;;  %p4549_p13 = scmp.lt.s32.totalorder %s4543_s18, %s4543_s18 }
  0x1d   :  { %p4550_p0 = por %p4549_p13, %p4548_p12 }
  0x1f   :  { %p4551_p1 = pnand %p4550_p0, %p4544_p11 }
  0x21   :  { %4554 = shalt.err (!%p4551_p1)
}
  0x22   :  { %24 = dma.hbm_to_vmem [thread:$0]  %s5423_s0, 128, %s22_s24, [#allocation4]  }
  0x23   :  { %s4631_s20 = smov [#allocation8]   ;;  %s4555_s25 = scalar_lea.hbm %s5425_s2, 1280 }
  0x24   :  { %s40_s21 = sshll.u32 %s4631_s20, 4  ;;  %p4556_p2 = scmp.ne.s32.totalorder %s5425_s2, %s4555_s25  ;;  %s41_s21 = int_to_ptr.vmem [resolvable:$true] %s40_s21 }
  0x25   :  { %p4559_p3 = scmp.lt.u32.totalorder %s4555_s25, %s5425_s2 }
  0x27   :  { %p4561_p4 = pnand %p4559_p3, %p4556_p2 }
  0x29   :  { %4564 = shalt.err (!%p4561_p4)
}
  0x2a   :  { %s4565_s30 = scalar_lea.vmem %s41_s21, 1280  ;;  %p4570_p6 = scmp.lt.s32.totalorder %s41_s21, %s41_s21 }
  0x2b   :  { %p4566_p5 = scmp.ne.s32.totalorder %s41_s21, %s4565_s30  ;;  %p4571_p7 = scmp.lt.s32.totalorder %s4565_s30, %s4565_s30 }
  0x2d   :  { %p4572_p8 = por %p4571_p7, %p4570_p6 }
  0x2f   :  { %p4573_p9 = pnand %p4572_p8, %p4566_p5 }
  0x31   :  { %4576 = shalt.err (!%p4573_p9)
}
  0x32   :  { %s4632_s0 = smov 64   ;;  %s4633_s24 = smov 4  }
  0x33   :  { %46 = dma.hbm_to_vmem [thread:$0]  %s5425_s2, 1280, %s41_s21, [#allocation7], %s4632_s0, %s4632_s0, %s4633_s24  }
  0x34   :  { %s4634_s9 = smov [#allocation9]   ;;  %s4577_s13 = scalar_lea.hbm %s5427_s4, 1024 }
  0x35   :  { %s54_s10 = sshll.u32 %s4634_s9, 4  ;;  %p4578_p10 = scmp.ne.s32.totalorder %s5427_s4, %s4577_s13  ;;  %s55_s10 = int_to_ptr.vmem [resolvable:$true] %s54_s10 }
  0x36   :  { %p4581_p11 = scmp.lt.u32.totalorder %s4577_s13, %s5427_s4 }
  0x38   :  { %p4583_p12 = pnand %p4581_p11, %p4578_p10 }
  0x3a   :  { %4586 = shalt.err (!%p4583_p12)
}
  0x3b   :  { %s4587_s18 = scalar_lea.vmem %s55_s10, 1024  ;;  %p4592_p0 = scmp.lt.s32.totalorder %s55_s10, %s55_s10 }
  0x3c   :  { %p4588_p13 = scmp.ne.s32.totalorder %s55_s10, %s4587_s18  ;;  %p4593_p1 = scmp.lt.s32.totalorder %s4587_s18, %s4587_s18 }
  0x3e   :  { %p4594_p2 = por %p4593_p1, %p4592_p0 }
  0x40   :  { %p4595_p3 = pnand %p4594_p2, %p4588_p13 }
  0x42   :  { %4598 = shalt.err (!%p4595_p3)
}
  0x43   :  { %s4635_s2 = smov 256   ;;  %s4636_s1 = smov 16  }
  0x44   :  { %60 = dma.hbm_to_vmem [thread:$0]  %s5427_s4, 1024, %s55_s10, [#allocation10], %s4635_s2, %s4635_s2, %s4636_s1  }
  0x45   :  { %4621 = dma.done.wait [#allocation4], 128  }
  0x46   :  { %4622 = vsyncadd [#allocation4], 4294967168 }
  0x47   :  { %4623 = dma.done.wait [#allocation7], 1344  }
  0x48   :  { %4624 = vsyncadd [#allocation7], 4294965952 }
  0x49   :  { %4625 = dma.done.wait [#allocation10], 1024  }
  0x4a   :  { %4626 = vsyncadd [#allocation10], 4294966272  ;;  %v4637_v0 = vmov 0.0   ;;  %vm4638_vm0 = vmmov 0   ;;  %v4278_v1 = vld [vmem:[#allocation8] sm:$0xff]   ;;  %v4279_v2 = vld [vmem:[#allocation8 + $0x8] sm:$0xff]   ;;  %v100_v11 = vlaneseq }
  0x4b   :  { %3789 = vmatprep.subr.bf16.mxu0 %v4637_v0  ;;  %3797 = vmatprep.mubr.msk.bf16.mxu0 %vm4638_vm0, %v4637_v0  ;;  %v4734_v3 = vld [vmem:[#allocation8 + $0x20] sm:$0xff]   ;;  %v4280_v4 = vld [vmem:[#allocation8 + $0x10] sm:$0xff]   ;;  %v4737_v5 = vld [vmem:[#allocation8 + $0x28] sm:$0xff]   ;;  %vm128_vm1 = vcmask 523264   ;;  %vm185_vm2 = vcmask 261120   ;;  %s4639_s22 = smov 32  }
  0x4c   :  { %3849 = vmatprep.subr.bf16.mxu1 %v4637_v0  ;;  %3853 = vmatprep.mubr.msk.bf16.mxu1 %vm4638_vm0, %v4637_v0  ;;  %v4281_v6 = vld [vmem:[#allocation8 + $0x18] sm:$0xff]   ;;  %v4761_v12 = vshrl.u32 %v100_v11, 7  ;;  %v4767_v14 = vld [vmem:[%s5426_s3] sm:$0x7]  ;;  %v4782_v39 = vld [vmem:[#allocation8 + $0x30] sm:$0xff]   ;;  %vm2753_vm3 = vcmask 253952  }
  0x4d   :  { %3790 = vmatpush3.bf16.msra.mxu0 %v4278_v1  ;;  %3850 = vmatpush3.bf16.msra.mxu1 %v4734_v3  ;;  %v98_v7 = vld [vmem:[#allocation3] sm:$0xff]  ;;  %v4748_v9 = vld [vmem:[#allocation6] sm:$0xf]  ;;  %v4792_v45 = vld [vmem:[#allocation8 + $0x40] sm:$0xff]  }
  0x4e   :  { %3791 = vmatprep.subr.bf16.mxu0 %v4637_v0  ;;  %3851 = vmatprep.subr.bf16.mxu1 %v4637_v0  ;;  %v99_v8 = vpack.c.bf16 %v98_v7, %v98_v7  ;;  %v4753_v10 = vpack.c.bf16 %v4748_v9, %v4748_v9  ;;  %v102_v13 = vsub.s32 0, %v4761_v12  ;;  %v239_v32 = vrot.slane %v4748_v9, 1  ;;  %v4785_v40 = vld [vmem:[#allocation8 + $0x38] sm:$0xff]   ;;  %v4796_v47 = vld [vmem:[#allocation8 + $0x48] sm:$0xff]  }
  0x50   :  { %v103_v18 = vrot.slane %v4767_v14, %v102_v13  ;;  %v323_v48 = vrot.slane %v4753_v10, 1 }
  0x51   :  { %3792 = vmatpush3.bf16.msra.mxu0 %v4279_v2  ;;  %3852 = vmatpush3.bf16.msra.mxu1 %v4737_v5 }
  0x52   :  { %3793 = vmatprep.subr.bf16.mxu0 %v4637_v0  ;;  %3857 = vmatprep.subr.bf16.mxu1 %v4637_v0 }
  0x55   :  { %3794 = vmatpush3.bf16.msra.mxu0 %v4280_v4 }
  0x56   :  { %3795 = vmatprep.subr.bf16.mxu0 %v4637_v0 }
  0x59   :  { %3796 = vmatpush3.bf16.msra.mxu0 %v4281_v6  ;;  %v4822_v6 = vrot.slane %v4767_v14, 1 }
  0x5a   :  { %3801 = vmatprep.subr.bf16.mxu0 %v4637_v0 }
  0x5c   :  { %3798 = vmatmul.mubr.msk.bf16.vlgmr.msra.gmra.mrb[0].mxu0 %vm128_vm1, %v99_v8 }
  0x5d   :  { %3802 = vmatpush3.bf16.msra.mxu0 %v4734_v3  ;;  %3805 = vmatprep.mubr.msk.bf16.mxu0 %vm4638_vm0, %v4637_v0 }
  0x5e   :  { %3803 = vmatprep.subr.bf16.mxu0 %v4637_v0 }
  0x61   :  { %3804 = vmatpush3.bf16.msra.mxu0 %v4737_v5 }
  0x62   :  { %3809 = vmatprep.subr.bf16.mxu0 %v4637_v0 }
  0x64   :  { %3806 = vmatmul.mubr.msk.bf16.vlgmr.msra.gmra.mrb[4].mxu0 %vm185_vm2, %v4753_v10 }
  0x65   :  { %3813 = vmatprep.mubr.msk.bf16.mxu0 %vm4638_vm0, %v4637_v0  ;;  %3810 = vmatpush3.bf16.msra.mxu0 %v4782_v39 }
  0x66   :  { %3811 = vmatprep.subr.bf16.mxu0 %v4637_v0 }
  0x69   :  { %3812 = vmatpush3.bf16.msra.mxu0 %v4785_v40 }
  0x6a   :  { %3817 = vmatprep.subr.bf16.mxu0 %v4637_v0 }
 0x12f   :  { %v166_v15 = vpop.f32.mrb[0].mxu0 }
 0x130   :  { %v3799_v16 = vpop.f32.mrb[1].mxu0  ;;  %v4772_v20 = vadd.f32 %v166_v15, %v103_v18 }
 0x131   :  { %v169_v17 = vpop.f32.mrb[2].mxu0 }
 0x132   :  { %v3800_v19 = vpop.f32.mrb[3].mxu0 }
 0x137   :  { %v223_v21 = vpop.f32.mrb[4].mxu0 }
 0x138   :  { %v229_v22 = vadd.f32 %v223_v21, %v4772_v20  ;;  %v3807_v23 = vpop.f32.mrb[5].mxu0 }
 0x139   :  { %v226_v24 = vpop.f32.mrb[6].mxu0  ;;  %v388_v23 = vrot.slane %v4748_v9, 3 }
 0x13a   :  { %v3515_v25 = vmul.f32 -1.442695, %v229_v22  ;;  %v3808_v26 = vpop.f32.mrb[7].mxu0 }
 0x13c   :  { %4300 = vpow2.f32 %v3515_v25 }
 0x146   :  { %v4301_v27 = vpop.eup %4300 }
 0x147   :  { %v233_v28 = vadd.f32 1.0, %v4301_v27 }
 0x149   :  { %4302 = vrcp.f32 %v233_v28 }
 0x153   :  { %v4303_v29 = vpop.eup %4302 }
 0x154   :  { %v236_v30 = vmul.f32 2.0, %v4303_v29 }
 0x156   :  { %v3516_v31 = vadd.f32 -1.0, %v236_v30 }
 0x158   :  { %245 = vrot.lane.b32.xlu0 %v3516_v31, %s4632_s0 }
 0x15c   :  { %240 = vrot.lane.b32.xlu0 %v239_v32, %s4639_s22 }
 0x1ca   :  { %v246_v33 = vpop.permute.xlu0 %245 }
 0x1cb   :  { %v248_v34 = vmul.f32 %v4303_v29, %v246_v33 }
 0x1cd   :  { %250 = vrot.lane.b32.xlu1 %v248_v34, %s4639_s22 }
 0x1ce   :  { %v241_v35 = vpop.permute.xlu0 %240 }
 0x1cf   :  { %v243_v36 = vmul.f32 %v4303_v29, %v241_v35 }
 0x23f   :  { %v251_v37 = vpop.permute.xlu1 %250 }
 0x240   :  { %v4779_v38 = vadd.f32 %v251_v37, %v243_v36 }
 0x242   :  { %4304 = vtanh.f32 %v4779_v38  ;;  %v462_v15 = vrot.slane %v4779_v38, 7 }
 0x24c   :  { %v4305_v41 = vpop.eup %4304 }
 0x24d   :  { %256 = vrot.lane.b32.xlu1 %v4305_v41, %s4632_s0 }
 0x2bf   :  { %v257_v42 = vpop.permute.xlu1 %256 }
 0x2c0   :  { %v259_v43 = vmul.f32 %v4303_v29, %v257_v42 }
 0x2c2   :  { %v260_v44 = vpack.c.bf16 %v259_v43, %v259_v43 }
 0x2c4   :  { %262 = vrot.lane.b32.xlu0 %v260_v44, %s4639_s22 }
 0x336   :  { %v263_v46 = vpop.permute.xlu0 %262 }
 0x337   :  { %3814 = vmatmul.mubr.msk.bf16.vlgmr.msra.gmra.mrb[8].mxu0 %vm185_vm2, %v263_v46 }
 0x338   :  { %3818 = vmatpush3.bf16.msra.mxu0 %v4792_v45  ;;  %3821 = vmatprep.mubr.msk.bf16.mxu0 %vm4638_vm0, %v4637_v0 }
 0x339   :  { %3819 = vmatprep.subr.bf16.mxu0 %v4637_v0 }
 0x33c   :  { %3820 = vmatpush3.bf16.msra.mxu0 %v4796_v47 }
 0x33d   :  { %3825 = vmatprep.subr.bf16.mxu0 %v4637_v0 }
 0x343   :  { %3822 = vmatmul.mubr.msk.bf16.vlgmr.msra.gmra.mrb[8].mxu0 %vm185_vm2, %v323_v48 }
 0x344   :  { %3826 = vmatpush3.bf16.msra.mxu0 %v4734_v3  ;;  %3829 = vmatprep.mubr.msk.bf16.mxu0 %vm4638_vm0, %v4637_v0 }
 0x345   :  { %3827 = vmatprep.subr.bf16.mxu0 %v4637_v0 }
 0x348   :  { %3828 = vmatpush3.bf16.msra.mxu0 %v4737_v5 }
 0x349   :  { %3833 = vmatprep.subr.bf16.mxu0 %v4637_v0 }
 0x34b   :  { %3830 = vmatmul.mubr.msk.bf16.vlgmr.msra.gmra.mrb[12].mxu0 %vm185_vm2, %v263_v46 }
 0x34c   :  { %3834 = vmatpush3.bf16.msra.mxu0 %v4782_v39  ;;  %3837 = vmatprep.mubr.msk.bf16.mxu0 %vm4638_vm0, %v4637_v0 }
 0x34d   :  { %3835 = vmatprep.subr.bf16.mxu0 %v4637_v0 }
 0x350   :  { %3836 = vmatpush3.bf16.msra.mxu0 %v4785_v40 }
 0x351   :  { %3841 = vmatprep.subr.bf16.mxu0 %v4637_v0 }
 0x416   :  { %v373_v49 = vpop.f32.mrb[8].mxu0 }
 0x417   :  { %v3823_v50 = vpop.f32.mrb[9].mxu0  ;;  %v4185_v7 = vadd.f32 %v373_v49, %v4822_v6 }
 0x418   :  { %v376_v51 = vpop.f32.mrb[10].mxu0 }
 0x419   :  { %v3824_v52 = vpop.f32.mrb[11].mxu0  ;;  %v3523_v8 = vmul.f32 -1.442695, %v4185_v7 }
 0x41e   :  { %v443_v53 = vpop.f32.mrb[12].mxu0 }
 0x41f   :  { %v450_v54 = vrot.slane %v443_v53, 7  ;;  %v3831_v55 = vpop.f32.mrb[13].mxu0 }
 0x420   :  { %v446_v56 = vpop.f32.mrb[14].mxu0 }
 0x421   :  { %v452_v57 = vadd.f32 %v450_v54, %v4772_v20  ;;  %v3832_v58 = vpop.f32.mrb[15].mxu0 }
 0x423   :  { %v3526_v59 = vmul.f32 -1.442695, %v452_v57 }
 0x425   :  { %4306 = vpow2.f32 %v3526_v59 }
 0x42f   :  { %v4307_v60 = vpop.eup %4306 }
 0x430   :  { %v456_v61 = vadd.f32 1.0, %v4307_v60 }
 0x432   :  { %4308 = vrcp.f32 %v456_v61 }
 0x433   :  { %4310 = vpow2.f32 %v3523_v8 }
 0x43c   :  { %v4309_v62 = vpop.eup %4308 }
 0x43d   :  { %v459_v63 = vmul.f32 2.0, %v4309_v62  ;;  %v4311_v10 = vpop.eup %4310  ;;  %v464_v16 = vmul.f32 %v4309_v62, %v462_v15 }
 0x43e   :  { %v383_v11 = vadd.f32 1.0, %v4311_v10 }
 0x43f   :  { %v3527_v1 = vadd.f32 -1.0, %v459_v63 }
 0x440   :  { %4312 = vrcp.f32 %v383_v11 }
 0x441   :  { %466 = vrot.lane.b32.xlu1 %v3527_v1, %s4632_s0 }
 0x44a   :  { %v4313_v19 = vpop.eup %4312 }
 0x44b   :  { %v386_v21 = vmul.f32 2.0, %v4313_v19 }
 0x44d   :  { %v3524_v14 = vadd.f32 -1.0, %v386_v21 }
 0x4b3   :  { %v467_v2 = vpop.permute.xlu1 %466 }
 0x4b4   :  { %v469_v4 = vmul.f32 %v4309_v62, %v467_v2 }
 0x4b6   :  { %471 = vrot.lane.b32.xlu0 %v469_v4, %s4639_s22 }
 0x528   :  { %v472_v17 = vpop.permute.xlu0 %471 }
 0x529   :  { %v474_v18 = vadd.f32 %v472_v17, %v464_v16 }
 0x52b   :  { %4314 = vtanh.f32 %v474_v18  ;;  %v656_v53 = vrot.slane %v474_v18, 7 }
 0x535   :  { %v4315_v22 = vpop.eup %4314 }
 0x536   :  { %477 = vrot.lane.b32.xlu1 %v4315_v22, %s4632_s0 }
 0x53a   :  { %394 = vrot.lane.b32.xlu1 %v3524_v14, %s4632_s0 }
 0x53e   :  { %389 = vrot.lane.b32.xlu1 %v388_v23, %s4639_s22 }
 0x5a8   :  { %v478_v24 = vpop.permute.xlu1 %477 }
 0x5a9   :  { %v480_v25 = vmul.f32 %v4309_v62, %v478_v24 }
 0x5ab   :  { %v481_v26 = vpack.c.bf16 %v480_v25, %v480_v25 }
 0x5ac   :  { %v395_v42 = vpop.permute.xlu1 %394 }
 0x5ad   :  { %v483_v27 = vshrl.u32 %v481_v26, 16  ;;  %v397_v43 = vmul.f32 %v4313_v19, %v395_v42 }
 0x5af   :  { %485 = vrot.lane.b32.xlu0 %v483_v27, %s4639_s22 }
 0x5b0   :  { %v390_v44 = vpop.permute.xlu1 %389 }
 0x5b1   :  { %v392_v49 = vmul.f32 %v4313_v19, %v390_v44 }
 0x621   :  { %v486_v28 = vpop.permute.xlu0 %485 }
 0x622   :  { %3838 = vmatmul.mubr.msk.bf16.vlgmr.msra.gmra.mrb[16].mxu0 %vm185_vm2, %v486_v28  ;;  %3854 = vmatmul.mubr.msk.bf16.vlgmr.msra.gmra.mrb[0].mxu1 %vm185_vm2, %v486_v28 }
 0x623   :  { %3842 = vmatpush3.bf16.msra.mxu0 %v4792_v45  ;;  %3845 = vmatprep.mubr.msk.bf16.mxu0 %vm4638_vm0, %v4637_v0 }
 0x624   :  { %3843 = vmatprep.subr.bf16.mxu0 %v4637_v0  ;;  %3858 = vmatpush3.bf16.msra.mxu1 %v4782_v39 }
 0x625   :  { %3859 = vmatprep.subr.bf16.mxu1 %v4637_v0  ;;  %3861 = vmatprep.mubr.msk.bf16.mxu1 %vm4638_vm0, %v4637_v0 }
 0x627   :  { %3844 = vmatpush3.bf16.msra.mxu0 %v4796_v47 }
 0x628   :  { %3873 = vmatprep.subr.bf16.mxu0 %v4637_v0  ;;  %3860 = vmatpush3.bf16.msra.mxu1 %v4785_v40 }
 0x629   :  { %3865 = vmatprep.subr.bf16.mxu1 %v4637_v0 }
 0x6f5   :  { %v637_v9 = vpop.f32.mrb[0].mxu1 }
 0x6f6   :  { %v644_v29 = vrot.slane %v637_v9, 6  ;;  %v3855_v30 = vpop.f32.mrb[1].mxu1 }
 0x6f7   :  { %v640_v31 = vpop.f32.mrb[2].mxu1 }
 0x6f8   :  { %v646_v32 = vadd.f32 %v644_v29, %v4772_v20  ;;  %v3856_v33 = vpop.f32.mrb[3].mxu1 }
 0x6fa   :  { %v3533_v34 = vmul.f32 -1.442695, %v646_v32 }
 0x6fc   :  { %4316 = vpow2.f32 %v3533_v34 }
 0x706   :  { %v4317_v35 = vpop.eup %4316 }
 0x707   :  { %v650_v36 = vadd.f32 1.0, %v4317_v35 }
 0x709   :  { %4318 = vrcp.f32 %v650_v36 }
 0x713   :  { %v4319_v37 = vpop.eup %4318 }
 0x714   :  { %v653_v38 = vmul.f32 2.0, %v4319_v37  ;;  %v658_v54 = vmul.f32 %v4319_v37, %v656_v53 }
 0x716   :  { %v3534_v41 = vadd.f32 -1.0, %v653_v38 }
 0x718   :  { %660 = vrot.lane.b32.xlu0 %v3534_v41, %s4632_s0 }
 0x71c   :  { %399 = vrot.lane.b32.xlu0 %v397_v43, %s4639_s22 }
 0x78a   :  { %v661_v46 = vpop.permute.xlu0 %660 }
 0x78b   :  { %v663_v48 = vmul.f32 %v4319_v37, %v661_v46 }
 0x78d   :  { %665 = vrot.lane.b32.xlu1 %v663_v48, %s4639_s22 }
 0x78e   :  { %v400_v50 = vpop.permute.xlu0 %399 }
 0x78f   :  { %v4849_v51 = vadd.f32 %v400_v50, %v392_v49 }
 0x791   :  { %4320 = vtanh.f32 %v4849_v51 }
 0x79b   :  { %v4321_v52 = vpop.eup %4320 }
 0x79c   :  { %405 = vrot.lane.b32.xlu0 %v4321_v52, %s4632_s0 }
 0x7ff   :  { %v666_v55 = vpop.permute.xlu1 %665 }
 0x800   :  { %v4853_v56 = vadd.f32 %v666_v55, %v658_v54 }
 0x802   :  { %4322 = vtanh.f32 %v4853_v56  ;;  %v849_v43 = vrot.slane %v4853_v56, 7 }
 0x80c   :  { %v4323_v57 = vpop.eup %4322 }
 0x80d   :  { %671 = vrot.lane.b32.xlu1 %v4323_v57, %s4632_s0 }
 0x80e   :  { %v406_v58 = vpop.permute.xlu0 %405 }
 0x80f   :  { %v408_v59 = vmul.f32 %v4313_v19, %v406_v58 }
 0x811   :  { %v530_v60 = vpack.c.bf16 %v408_v59, %v408_v59 }
 0x813   :  { %532 = vrot.lane.b32.xlu0 %v530_v60, %s4639_s22 }
 0x87f   :  { %v672_v61 = vpop.permute.xlu1 %671 }
 0x880   :  { %v674_v62 = vmul.f32 %v4319_v37, %v672_v61 }
 0x882   :  { %v675_v63 = vpack.c.bf16 %v674_v62, %v674_v62 }
 0x884   :  { %v677_v1 = vrot.slane %v675_v63, 1 }
 0x885   :  { %v533_v2 = vpop.permute.xlu0 %532 }
 0x886   :  { %3846 = vmatmul.mubr.msk.bf16.vlgmr.msra.gmra.mrb[16].mxu0 %vm185_vm2, %v533_v2  ;;  %678 = vrot.lane.b32.xlu1 %v677_v1, %s4639_s22 }
 0x887   :  { %3874 = vmatpush3.bf16.msra.mxu0 %v4734_v3  ;;  %3877 = vmatprep.mubr.msk.bf16.mxu0 %vm4638_vm0, %v4637_v0 }
 0x888   :  { %3875 = vmatprep.subr.bf16.mxu0 %v4637_v0 }
 0x88b   :  { %3876 = vmatpush3.bf16.msra.mxu0 %v4737_v5 }
 0x88c   :  { %3881 = vmatprep.subr.bf16.mxu0 %v4637_v0 }
 0x8f8   :  { %v679_v4 = vpop.permute.xlu1 %678 }
 0x8f9   :  { %3862 = vmatmul.mubr.msk.bf16.vlgmr.msra.gmra.mrb[4].mxu1 %vm185_vm2, %v679_v4  ;;  %3878 = vmatmul.mubr.msk.bf16.vlgmr.msra.gmra.mrb[20].mxu0 %vm185_vm2, %v679_v4 }
 0x8fa   :  { %3866 = vmatpush3.bf16.msra.mxu1 %v4792_v45  ;;  %3869 = vmatprep.mubr.msk.bf16.mxu1 %vm4638_vm0, %v4637_v0 }
 0x8fb   :  { %3867 = vmatprep.subr.bf16.mxu1 %v4637_v0  ;;  %3882 = vmatpush3.bf16.msra.mxu0 %v4782_v39 }
 0x8fc   :  { %3883 = vmatprep.subr.bf16.mxu0 %v4637_v0  ;;  %3885 = vmatprep.mubr.msk.bf16.mxu0 %vm4638_vm0, %v4637_v0 }
 0x8fe   :  { %3868 = vmatpush3.bf16.msra.mxu1 %v4796_v47 }
 0x8ff   :  { %3897 = vmatprep.subr.bf16.mxu1 %v4637_v0  ;;  %3884 = vmatpush3.bf16.msra.mxu0 %v4785_v40 }
 0x900   :  { %3889 = vmatprep.subr.bf16.mxu0 %v4637_v0 }
 0x959   :  { %v571_v7 = vpop.f32.mrb[16].mxu0 }
 0x95a   :  { %v4186_v8 = vadd.f32 %v571_v7, %v4822_v6  ;;  %v3847_v10 = vpop.f32.mrb[17].mxu0 }
 0x95b   :  { %v574_v11 = vpop.f32.mrb[18].mxu0 }
 0x95c   :  { %v3530_v15 = vmul.f32 -1.442695, %v4186_v8  ;;  %v3848_v16 = vpop.f32.mrb[19].mxu0 }
 0x95e   :  { %4324 = vpow2.f32 %v3530_v15 }
 0x968   :  { %v4325_v17 = vpop.eup %4324 }
 0x969   :  { %v581_v18 = vadd.f32 1.0, %v4325_v17 }
 0x96b   :  { %4326 = vrcp.f32 %v581_v18 }
 0x975   :  { %v4327_v19 = vpop.eup %4326 }
 0x976   :  { %v584_v21 = vmul.f32 2.0, %v4327_v19  ;;  %v586_v35 = vmul.f32 %v4327_v19, %v4849_v51 }
 0x978   :  { %v3531_v22 = vadd.f32 -1.0, %v584_v21 }
 0x97a   :  { %588 = vrot.lane.b32.xlu0 %v3531_v22, %s4632_s0 }
 0x9cc   :  { %v830_v14 = vpop.f32.mrb[20].mxu0 }
 0x9cd   :  { %v837_v23 = vrot.slane %v830_v14, 5  ;;  %v3879_v24 = vpop.f32.mrb[21].mxu0 }
 0x9ce   :  { %v833_v25 = vpop.f32.mrb[22].mxu0 }
 0x9cf   :  { %v839_v26 = vadd.f32 %v837_v23, %v4772_v20  ;;  %v3880_v27 = vpop.f32.mrb[23].mxu0 }
 0x9d1   :  { %v3540_v28 = vmul.f32 -1.442695, %v839_v26 }
 0x9d3   :  { %4328 = vpow2.f32 %v3540_v28 }
 0x9dd   :  { %v4329_v9 = vpop.eup %4328 }
 0x9de   :  { %v843_v29 = vadd.f32 1.0, %v4329_v9 }
 0x9e0   :  { %4330 = vrcp.f32 %v843_v29 }
 0x9ea   :  { %v4331_v30 = vpop.eup %4330 }
 0x9eb   :  { %v846_v31 = vmul.f32 2.0, %v4331_v30  ;;  %v851_v44 = vmul.f32 %v4331_v30, %v849_v43 }
 0x9ec   :  { %v589_v32 = vpop.permute.xlu0 %588 }
 0x9ed   :  { %v591_v33 = vmul.f32 %v4327_v19, %v589_v32  ;;  %v3541_v34 = vadd.f32 -1.0, %v846_v31 }
 0x9ef   :  { %593 = vrot.lane.b32.xlu0 %v591_v33, %s4639_s22  ;;  %853 = vrot.lane.b32.xlu1 %v3541_v34, %s4632_s0 }
 0xa61   :  { %v594_v36 = vpop.permute.xlu0 %593  ;;  %v854_v37 = vpop.permute.xlu1 %853 }
 0xa62   :  { %v4886_v38 = vadd.f32 %v594_v36, %v586_v35  ;;  %v856_v41 = vmul.f32 %v4331_v30, %v854_v37 }
 0xa64   :  { %4332 = vtanh.f32 %v4886_v38  ;;  %858 = vrot.lane.b32.xlu1 %v856_v41, %s4639_s22 }
 0xa6e   :  { %v4333_v42 = vpop.eup %4332 }
 0xa6f   :  { %599 = vrot.lane.b32.xlu0 %v4333_v42, %s4632_s0 }
 0xad6   :  { %v859_v46 = vpop.permute.xlu1 %858 }
 0xad7   :  { %v4892_v48 = vadd.f32 %v859_v46, %v851_v44 }
 0xad9   :  { %4334 = vtanh.f32 %v4892_v48  ;;  %v1044_v34 = vrot.slane %v4892_v48, 7 }
 0xae1   :  { %v600_v49 = vpop.permute.xlu0 %599 }
 0xae2   :  { %v602_v50 = vmul.f32 %v4327_v19, %v600_v49 }
 0xae3   :  { %v4335_v51 = vpop.eup %4334 }
 0xae4   :  { %v723_v52 = vpack.c.bf16 %v602_v50, %v602_v50  ;;  %864 = vrot.lane.b32.xlu1 %v4335_v51, %s4632_s0 }
 0xae6   :  { %725 = vrot.lane.b32.xlu0 %v723_v52, %s4639_s22 }
 0xb56   :  { %v865_v53 = vpop.permute.xlu1 %864 }
 0xb57   :  { %v867_v54 = vmul.f32 %v4331_v30, %v865_v53 }
 0xb58   :  { %v726_v55 = vpop.permute.xlu0 %725 }
 0xb59   :  { %v868_v57 = vpack.c.bf16 %v867_v54, %v867_v54  ;;  %3870 = vmatmul.mubr.msk.bf16.vlgmr.msra.gmra.mrb[4].mxu1 %vm185_vm2, %v726_v55 }
 0xb5a   :  { %3898 = vmatpush3.bf16.msra.mxu1 %v4734_v3  ;;  %3901 = vmatprep.mubr.msk.bf16.mxu1 %vm4638_vm0, %v4637_v0 }
 0xb5b   :  { %v870_v56 = vshrl.u32 %v868_v57, 16  ;;  %3899 = vmatprep.subr.bf16.mxu1 %v4637_v0 }
 0xb5d   :  { %v872_v58 = vrot.slane %v870_v56, 1 }
 0xb5e   :  { %3900 = vmatpush3.bf16.msra.mxu1 %v4737_v5 }
 0xb5f   :  { %873 = vrot.lane.b32.xlu1 %v872_v58, %s4639_s22  ;;  %3905 = vmatprep.subr.bf16.mxu1 %v4637_v0 }
 0xbd1   :  { %v874_v59 = vpop.permute.xlu1 %873 }
 0xbd2   :  { %3886 = vmatmul.mubr.msk.bf16.vlgmr.msra.gmra.mrb[24].mxu0 %vm185_vm2, %v874_v59  ;;  %3902 = vmatmul.mubr.msk.bf16.vlgmr.msra.gmra.mrb[8].mxu1 %vm185_vm2, %v874_v59 }
 0xbd3   :  { %3890 = vmatpush3.bf16.msra.mxu0 %v4792_v45  ;;  %3893 = vmatprep.mubr.msk.bf16.mxu0 %vm4638_vm0, %v4637_v0 }
 0xbd4   :  { %3891 = vmatprep.subr.bf16.mxu0 %v4637_v0  ;;  %3906 = vmatpush3.bf16.msra.mxu1 %v4782_v39 }
 0xbd5   :  { %3907 = vmatprep.subr.bf16.mxu1 %v4637_v0  ;;  %3909 = vmatprep.mubr.msk.bf16.mxu1 %vm4638_vm0, %v4637_v0 }
 0xbd7   :  { %3892 = vmatpush3.bf16.msra.mxu0 %v4796_v47 }
 0xbd8   :  { %3921 = vmatprep.subr.bf16.mxu0 %v4637_v0  ;;  %3908 = vmatpush3.bf16.msra.mxu1 %v4785_v40 }
 0xbd9   :  { %3913 = vmatprep.subr.bf16.mxu1 %v4637_v0 }
 0xc2c   :  { %v764_v60 = vpop.f32.mrb[4].mxu1 }
 0xc2d   :  { %v4187_v61 = vadd.f32 %v764_v60, %v4822_v6  ;;  %v3871_v62 = vpop.f32.mrb[5].mxu1 }
 0xc2e   :  { %v767_v63 = vpop.f32.mrb[6].mxu1 }
 0xc2f   :  { %v3537_v1 = vmul.f32 -1.442695, %v4187_v61  ;;  %v3872_v2 = vpop.f32.mrb[7].mxu1 }
 0xc31   :  { %4336 = vpow2.f32 %v3537_v1 }
 0xc3b   :  { %v4337_v4 = vpop.eup %4336 }
 0xc3c   :  { %v774_v7 = vadd.f32 1.0, %v4337_v4 }
 0xc3e   :  { %4338 = vrcp.f32 %v774_v7 }
 0xc48   :  { %v4339_v8 = vpop.eup %4338 }
 0xc49   :  { %v777_v10 = vmul.f32 2.0, %v4339_v8  ;;  %v779_v9 = vmul.f32 %v4339_v8, %v4886_v38 }
 0xc4b   :  { %v3538_v11 = vadd.f32 -1.0, %v777_v10 }
 0xc4d   :  { %781 = vrot.lane.b32.xlu0 %v3538_v11, %s4632_s0 }
 0xca5   :  { %v1025_v15 = vpop.f32.mrb[8].mxu1 }
 0xca6   :  { %v1032_v16 = vrot.slane %v1025_v15, 4  ;;  %v3903_v17 = vpop.f32.mrb[9].mxu1 }
 0xca7   :  { %v1028_v18 = vpop.f32.mrb[10].mxu1 }
 0xca8   :  { %v1034_v19 = vadd.f32 %v1032_v16, %v4772_v20  ;;  %v3904_v21 = vpop.f32.mrb[11].mxu1 }
 0xcaa   :  { %v3547_v22 = vmul.f32 -1.442695, %v1034_v19 }
 0xcac   :  { %4340 = vpow2.f32 %v3547_v22 }
 0xcb6   :  { %v4341_v14 = vpop.eup %4340 }
 0xcb7   :  { %v1038_v23 = vadd.f32 1.0, %v4341_v14 }
 0xcb9   :  { %4342 = vrcp.f32 %v1038_v23 }
 0xcbf   :  { %v782_v24 = vpop.permute.xlu0 %781 }
 0xcc0   :  { %v784_v25 = vmul.f32 %v4339_v8, %v782_v24 }
 0xcc2   :  { %786 = vrot.lane.b32.xlu0 %v784_v25, %s4639_s22 }
 0xcc3   :  { %v4343_v26 = vpop.eup %4342 }
 0xcc4   :  { %v1041_v27 = vmul.f32 2.0, %v4343_v26  ;;  %v1046_v35 = vmul.f32 %v4343_v26, %v1044_v34 }
 0xcc6   :  { %v3548_v28 = vadd.f32 -1.0, %v1041_v27 }
 0xcc8   :  { %1048 = vrot.lane.b32.xlu1 %v3548_v28, %s4632_s0 }
 0xd34   :  { %v787_v29 = vpop.permute.xlu0 %786 }
 0xd35   :  { %v4925_v30 = vadd.f32 %v787_v29, %v779_v9 }
 0xd37   :  { %4344 = vtanh.f32 %v4925_v30 }
 0xd3a   :  { %v1049_v31 = vpop.permute.xlu1 %1048 }
 0xd3b   :  { %v1051_v32 = vmul.f32 %v4343_v26, %v1049_v31 }
 0xd3d   :  { %1053 = vrot.lane.b32.xlu1 %v1051_v32, %s4639_s22 }
 0xd41   :  { %v4345_v33 = vpop.eup %4344 }
 0xd42   :  { %792 = vrot.lane.b32.xlu0 %v4345_v33, %s4632_s0 }
 0xdaf   :  { %v1054_v36 = vpop.permute.xlu1 %1053 }
 0xdb0   :  { %v4931_v37 = vadd.f32 %v1054_v36, %v1046_v35 }
 0xdb2   :  { %4346 = vtanh.f32 %v4931_v37  ;;  %v1237_v27 = vrot.slane %v4931_v37, 7 }
 0xdb4   :  { %v793_v38 = vpop.permute.xlu0 %792 }
 0xdb5   :  { %v795_v41 = vmul.f32 %v4339_v8, %v793_v38 }
 0xdb7   :  { %v918_v42 = vpack.c.bf16 %v795_v41, %v795_v41 }
 0xdb9   :  { %920 = vrot.lane.b32.xlu0 %v918_v42, %s4639_s22 }
 0xdbc   :  { %v4347_v43 = vpop.eup %4346 }
 0xdbd   :  { %1059 = vrot.lane.b32.xlu1 %v4347_v43, %s4632_s0 }
 0xe2b   :  { %v921_v44 = vpop.permute.xlu0 %920 }
 0xe2c   :  { %3894 = vmatmul.mubr.msk.bf16.vlgmr.msra.gmra.mrb[24].mxu0 %vm185_vm2, %v921_v44 }
 0xe2d   :  { %3922 = vmatpush3.bf16.msra.mxu0 %v4734_v3  ;;  %3925 = vmatprep.mubr.msk.bf16.mxu0 %vm4638_vm0, %v4637_v0 }
 0xe2e   :  { %3923 = vmatprep.subr.bf16.mxu0 %v4637_v0 }
 0xe2f   :  { %v1060_v46 = vpop.permute.xlu1 %1059 }
 0xe30   :  { %v1062_v48 = vmul.f32 %v4343_v26, %v1060_v46 }
 0xe31   :  { %3924 = vmatpush3.bf16.msra.mxu0 %v4737_v5 }
 0xe32   :  { %v1063_v49 = vpack.c.bf16 %v1062_v48, %v1062_v48  ;;  %3929 = vmatprep.subr.bf16.mxu0 %v4637_v0 }
 0xe34   :  { %v1065_v50 = vrot.slane %v1063_v49, 2 }
 0xe36   :  { %1066 = vrot.lane.b32.xlu1 %v1065_v50, %s4639_s22 }
 0xea8   :  { %v1067_v51 = vpop.permute.xlu1 %1066 }
 0xea9   :  { %3910 = vmatmul.mubr.msk.bf16.vlgmr.msra.gmra.mrb[12].mxu1 %vm185_vm2, %v1067_v51  ;;  %3926 = vmatmul.mubr.msk.bf16.vlgmr.msra.gmra.mrb[28].mxu0 %vm185_vm2, %v1067_v51 }
 0xeaa   :  { %3914 = vmatpush3.bf16.msra.mxu1 %v4792_v45  ;;  %3917 = vmatprep.mubr.msk.bf16.mxu1 %vm4638_vm0, %v4637_v0 }
 0xeab   :  { %3915 = vmatprep.subr.bf16.mxu1 %v4637_v0  ;;  %3930 = vmatpush3.bf16.msra.mxu0 %v4782_v39 }
 0xeac   :  { %3931 = vmatprep.subr.bf16.mxu0 %v4637_v0  ;;  %3933 = vmatprep.mubr.msk.bf16.mxu0 %vm4638_vm0, %v4637_v0 }
 0xeae   :  { %3916 = vmatpush3.bf16.msra.mxu1 %v4796_v47 }
 0xeaf   :  { %3945 = vmatprep.subr.bf16.mxu1 %v4637_v0  ;;  %3932 = vmatpush3.bf16.msra.mxu0 %v4785_v40 }
 0xeb0   :  { %3937 = vmatprep.subr.bf16.mxu0 %v4637_v0 }
 0xeff   :  { %v959_v52 = vpop.f32.mrb[24].mxu0 }
 0xf00   :  { %v4188_v53 = vadd.f32 %v959_v52, %v4822_v6  ;;  %v3895_v54 = vpop.f32.mrb[25].mxu0 }
 0xf01   :  { %v962_v55 = vpop.f32.mrb[26].mxu0 }
 0xf02   :  { %v3544_v57 = vmul.f32 -1.442695, %v4188_v53  ;;  %v3896_v56 = vpop.f32.mrb[27].mxu0 }
 0xf04   :  { %4348 = vpow2.f32 %v3544_v57 }
 0xf0e   :  { %v4349_v58 = vpop.eup %4348 }
 0xf0f   :  { %v969_v59 = vadd.f32 1.0, %v4349_v58 }
 0xf11   :  { %4350 = vrcp.f32 %v969_v59 }
 0xf1b   :  { %v4351_v60 = vpop.eup %4350 }
 0xf1c   :  { %v972_v61 = vmul.f32 2.0, %v4351_v60  ;;  %v974_v22 = vmul.f32 %v4351_v60, %v4925_v30 }
 0xf1e   :  { %v3545_v62 = vadd.f32 -1.0, %v972_v61 }
 0xf20   :  { %976 = vrot.lane.b32.xlu0 %v3545_v62, %s4632_s0 }
 0xf7c   :  { %v1218_v63 = vpop.f32.mrb[28].mxu0 }
 0xf7d   :  { %v1225_v1 = vrot.slane %v1218_v63, 3  ;;  %v3927_v2 = vpop.f32.mrb[29].mxu0 }
 0xf7e   :  { %v1221_v4 = vpop.f32.mrb[30].mxu0 }
 0xf7f   :  { %v1227_v7 = vadd.f32 %v1225_v1, %v4772_v20  ;;  %v3928_v8 = vpop.f32.mrb[31].mxu0 }
 0xf81   :  { %v3554_v10 = vmul.f32 -1.442695, %v1227_v7 }
 0xf83   :  { %4352 = vpow2.f32 %v3554_v10 }
 0xf8d   :  { %v4353_v11 = vpop.eup %4352 }
 0xf8e   :  { %v1231_v15 = vadd.f32 1.0, %v4353_v11 }
 0xf90   :  { %4354 = vrcp.f32 %v1231_v15 }
 0xf92   :  { %v977_v16 = vpop.permute.xlu0 %976 }
 0xf93   :  { %v979_v17 = vmul.f32 %v4351_v60, %v977_v16 }
 0xf95   :  { %981 = vrot.lane.b32.xlu0 %v979_v17, %s4639_s22 }
 0xf9a   :  { %v4355_v18 = vpop.eup %4354 }
 0xf9b   :  { %v1234_v19 = vmul.f32 2.0, %v4355_v18  ;;  %v1239_v28 = vmul.f32 %v4355_v18, %v1237_v27  ;;  %v5015_v27 = vld [vmem:[#allocation8 + $0x20] sm:$0xff]  }
 0xf9d   :  { %v3555_v21 = vadd.f32 -1.0, %v1234_v19 }
 0xf9f   :  { %1241 = vrot.lane.b32.xlu1 %v3555_v21, %s4632_s0 }
0x1007   :  { %v982_v14 = vpop.permute.xlu0 %981 }
0x1008   :  { %v4964_v23 = vadd.f32 %v982_v14, %v974_v22 }
0x100a   :  { %4356 = vtanh.f32 %v4964_v23 }
0x1011   :  { %v1242_v24 = vpop.permute.xlu1 %1241 }
0x1012   :  { %v1244_v25 = vmul.f32 %v4355_v18, %v1242_v24 }
0x1014   :  { %v4357_v26 = vpop.eup %4356  ;;  %1246 = vrot.lane.b32.xlu1 %v1244_v25, %s4639_s22 }
0x1015   :  { %987 = vrot.lane.b32.xlu0 %v4357_v26, %s4632_s0 }
0x1086   :  { %v1247_v9 = vpop.permute.xlu1 %1246 }
0x1087   :  { %v4970_v29 = vadd.f32 %v1247_v9, %v1239_v28  ;;  %v988_v31 = vpop.permute.xlu0 %987  ;;  %v5021_v28 = vld [vmem:[#allocation8 + $0x28] sm:$0xff]  }
0x1088   :  { %v990_v30 = vmul.f32 %v4351_v60, %v988_v31 }
0x1089   :  { %4358 = vtanh.f32 %v4970_v29  ;;  %v1432_v21 = vrot.slane %v4970_v29, 7 }
0x108a   :  { %v1111_v32 = vpack.c.bf16 %v990_v30, %v990_v30 }
0x108c   :  { %1113 = vrot.lane.b32.xlu0 %v1111_v32, %s4639_s22 }
0x1093   :  { %v4359_v33 = vpop.eup %4358 }
0x1094   :  { %1252 = vrot.lane.b32.xlu1 %v4359_v33, %s4632_s0 }
0x10fe   :  { %v1114_v34 = vpop.permute.xlu0 %1113 }
0x10ff   :  { %3918 = vmatmul.mubr.msk.bf16.vlgmr.msra.gmra.mrb[12].mxu1 %vm185_vm2, %v1114_v34 }
0x1100   :  { %3946 = vmatpush3.bf16.msra.mxu1 %v4734_v3  ;;  %3949 = vmatprep.mubr.msk.bf16.mxu1 %vm4638_vm0, %v4637_v0 }
0x1101   :  { %3947 = vmatprep.subr.bf16.mxu1 %v4637_v0 }
0x1104   :  { %3948 = vmatpush3.bf16.msra.mxu1 %v4737_v5 }
0x1105   :  { %3953 = vmatprep.subr.bf16.mxu1 %v4637_v0 }
0x1106   :  { %v1253_v35 = vpop.permute.xlu1 %1252 }
0x1107   :  { %v1255_v36 = vmul.f32 %v4355_v18, %v1253_v35 }
0x1109   :  { %v1256_v37 = vpack.c.bf16 %v1255_v36, %v1255_v36 }
0x110b   :  { %v1258_v38 = vshrl.u32 %v1256_v37, 16 }
0x110d   :  { %v1260_v41 = vrot.slane %v1258_v38, 2 }
0x110f   :  { %1261 = vrot.lane.b32.xlu1 %v1260_v41, %s4639_s22 }
0x1181   :  { %v1262_v42 = vpop.permute.xlu1 %1261 }
0x1182   :  { %3934 = vmatmul.mubr.msk.bf16.vlgmr.msra.gmra.mrb[32].mxu0 %vm185_vm2, %v1262_v42  ;;  %3950 = vmatmul.mubr.msk.bf16.vlgmr.msra.gmra.mrb[16].mxu1 %vm185_vm2, %v1262_v42 }
0x1183   :  { %3938 = vmatpush3.bf16.msra.mxu0 %v4792_v45  ;;  %3941 = vmatprep.mubr.msk.bf16.mxu0 %vm4638_vm0, %v4637_v0 }
0x1184   :  { %3939 = vmatprep.subr.bf16.mxu0 %v4637_v0  ;;  %3954 = vmatpush3.bf16.msra.mxu1 %v4782_v39 }
0x1185   :  { %3955 = vmatprep.subr.bf16.mxu1 %v4637_v0  ;;  %3957 = vmatprep.mubr.msk.bf16.mxu1 %vm4638_vm0, %v4637_v0 }
0x1187   :  { %3940 = vmatpush3.bf16.msra.mxu0 %v4796_v47 }
0x1188   :  { %3969 = vmatprep.subr.bf16.mxu0 %v4637_v0  ;;  %3956 = vmatpush3.bf16.msra.mxu1 %v4785_v40 }
0x1189   :  { %3961 = vmatprep.subr.bf16.mxu1 %v4637_v0 }
0x11d2   :  { %v1152_v3 = vpop.f32.mrb[12].mxu1 }
0x11d3   :  { %v4189_v5 = vadd.f32 %v1152_v3, %v4822_v6  ;;  %v3919_v43 = vpop.f32.mrb[13].mxu1 }
0x11d4   :  { %v1155_v44 = vpop.f32.mrb[14].mxu1 }
0x11d5   :  { %v3551_v46 = vmul.f32 -1.442695, %v4189_v5  ;;  %v3920_v48 = vpop.f32.mrb[15].mxu1 }
0x11d7   :  { %4360 = vpow2.f32 %v3551_v46 }
0x11e1   :  { %v4361_v49 = vpop.eup %4360 }
0x11e2   :  { %v1162_v50 = vadd.f32 1.0, %v4361_v49 }
0x11e4   :  { %4362 = vrcp.f32 %v1162_v50 }
0x11ee   :  { %v4363_v51 = vpop.eup %4362 }
0x11ef   :  { %v1165_v52 = vmul.f32 2.0, %v4363_v51  ;;  %v1167_v8 = vmul.f32 %v4363_v51, %v4964_v23 }
0x11f1   :  { %v3552_v53 = vadd.f32 -1.0, %v1165_v52 }
0x11f3   :  { %1169 = vrot.lane.b32.xlu0 %v3552_v53, %s4632_s0 }
0x1255   :  { %v1413_v54 = vpop.f32.mrb[16].mxu1 }
0x1256   :  { %v1420_v55 = vrot.slane %v1413_v54, 2  ;;  %v3951_v57 = vpop.f32.mrb[17].mxu1 }
0x1257   :  { %v1416_v56 = vpop.f32.mrb[18].mxu1 }
0x1258   :  { %v1422_v58 = vadd.f32 %v1420_v55, %v4772_v20  ;;  %v3952_v59 = vpop.f32.mrb[19].mxu1 }
0x125a   :  { %v3561_v60 = vmul.f32 -1.442695, %v1422_v58 }
0x125c   :  { %4364 = vpow2.f32 %v3561_v60 }
0x1265   :  { %v1170_v61 = vpop.permute.xlu0 %1169 }
0x1266   :  { %v4365_v62 = vpop.eup %4364  ;;  %v1172_v63 = vmul.f32 %v4363_v51, %v1170_v61 }
0x1267   :  { %v1426_v1 = vadd.f32 1.0, %v4365_v62 }
0x1268   :  { %1174 = vrot.lane.b32.xlu0 %v1172_v63, %s4639_s22 }
0x1269   :  { %4366 = vrcp.f32 %v1426_v1 }
0x1273   :  { %v4367_v2 = vpop.eup %4366 }
0x1274   :  { %v1429_v4 = vmul.f32 2.0, %v4367_v2  ;;  %v1434_v14 = vmul.f32 %v4367_v2, %v1432_v21  ;;  %v5067_v21 = vld [vmem:[#allocation8 + $0x40] sm:$0xff]  }
0x1276   :  { %v3562_v7 = vadd.f32 -1.0, %v1429_v4 }
0x1278   :  { %1436 = vrot.lane.b32.xlu1 %v3562_v7, %s4632_s0 }
0x12da   :  { %v1175_v10 = vpop.permute.xlu0 %1174 }
0x12db   :  { %v5003_v11 = vadd.f32 %v1175_v10, %v1167_v8 }
0x12dd   :  { %4368 = vtanh.f32 %v5003_v11 }
0x12e7   :  { %v4369_v15 = vpop.eup %4368 }
0x12e8   :  { %1180 = vrot.lane.b32.xlu0 %v4369_v15, %s4632_s0 }
0x12ea   :  { %v1437_v16 = vpop.permute.xlu1 %1436 }
0x12eb   :  { %v1439_v17 = vmul.f32 %v4367_v2, %v1437_v16 }
0x12ed   :  { %1441 = vrot.lane.b32.xlu1 %v1439_v17, %s4639_s22 }
0x135a   :  { %v1181_v18 = vpop.permute.xlu0 %1180 }
0x135b   :  { %v1183_v19 = vmul.f32 %v4363_v51, %v1181_v18 }
0x135d   :  { %v1306_v22 = vpack.c.bf16 %v1183_v19, %v1183_v19 }
0x135f   :  { %1308 = vrot.lane.b32.xlu0 %v1306_v22, %s4639_s22  ;;  %v1442_v23 = vpop.permute.xlu1 %1441  ;;  %v5073_v22 = vld [vmem:[#allocation8 + $0x30] sm:$0xff]  }
0x1360   :  { %v5010_v24 = vadd.f32 %v1442_v23, %v1434_v14  ;;  %v5079_v14 = vld [vmem:[#allocation8 + $0x48] sm:$0xff]   ;;  %v5083_v23 = vld [vmem:[#allocation8 + $0x38] sm:$0xff]  }
0x1362   :  { %4370 = vtanh.f32 %v5010_v24  ;;  %v1625_v1 = vrot.slane %v5010_v24, 7 }
0x136c   :  { %v4371_v25 = vpop.eup %4370 }
0x136d   :  { %1447 = vrot.lane.b32.xlu1 %v4371_v25, %s4632_s0 }
0x13d1   :  { %v1309_v26 = vpop.permute.xlu0 %1308 }
0x13d2   :  { %3942 = vmatmul.mubr.msk.bf16.vlgmr.msra.gmra.mrb[32].mxu0 %vm185_vm2, %v1309_v26 }
0x13d3   :  { %3970 = vmatpush3.bf16.msra.mxu0 %v5015_v27  ;;  %3973 = vmatprep.mubr.msk.bf16.mxu0 %vm4638_vm0, %v4637_v0 }
0x13d4   :  { %3971 = vmatprep.subr.bf16.mxu0 %v4637_v0 }
0x13d7   :  { %3972 = vmatpush3.bf16.msra.mxu0 %v5021_v28 }
0x13d8   :  { %3977 = vmatprep.subr.bf16.mxu0 %v4637_v0 }
0x13df   :  { %v1448_v9 = vpop.permute.xlu1 %1447 }
0x13e0   :  { %v1450_v29 = vmul.f32 %v4367_v2, %v1448_v9 }
0x13e2   :  { %v1451_v31 = vpack.c.bf16 %v1450_v29, %v1450_v29 }
0x13e4   :  { %v1453_v30 = vrot.slane %v1451_v31, 3 }
0x13e6   :  { %1454 = vrot.lane.b32.xlu1 %v1453_v30, %s4639_s22 }
0x1458   :  { %v1455_v32 = vpop.permute.xlu1 %1454 }
0x1459   :  { %3958 = vmatmul.mubr.msk.bf16.vlgmr.msra.gmra.mrb[20].mxu1 %vm185_vm2, %v1455_v32  ;;  %3974 = vmatmul.mubr.msk.bf16.vlgmr.msra.gmra.mrb[36].mxu0 %vm185_vm2, %v1455_v32 }
0x145a   :  { %3962 = vmatpush3.bf16.msra.mxu1 %v4792_v45  ;;  %3965 = vmatprep.mubr.msk.bf16.mxu1 %vm4638_vm0, %v4637_v0 }
0x145b   :  { %3963 = vmatprep.subr.bf16.mxu1 %v4637_v0  ;;  %3978 = vmatpush3.bf16.msra.mxu0 %v4782_v39 }
0x145c   :  { %3979 = vmatprep.subr.bf16.mxu0 %v4637_v0  ;;  %3981 = vmatprep.mubr.msk.bf16.mxu0 %vm4638_vm0, %v4637_v0 }
0x145e   :  { %3964 = vmatpush3.bf16.msra.mxu1 %v4796_v47 }
0x145f   :  { %3993 = vmatprep.subr.bf16.mxu1 %v4637_v0  ;;  %3980 = vmatpush3.bf16.msra.mxu0 %v4785_v40 }
0x1460   :  { %3985 = vmatprep.subr.bf16.mxu0 %v4637_v0 }
0x14a5   :  { %v1347_v45 = vpop.f32.mrb[32].mxu0 }
0x14a6   :  { %v4190_v33 = vadd.f32 %v1347_v45, %v4822_v6  ;;  %v3943_v34 = vpop.f32.mrb[33].mxu0 }
0x14a7   :  { %v1350_v35 = vpop.f32.mrb[34].mxu0 }
0x14a8   :  { %v3558_v36 = vmul.f32 -1.442695, %v4190_v33  ;;  %v3944_v39 = vpop.f32.mrb[35].mxu0 }
0x14aa   :  { %4372 = vpow2.f32 %v3558_v36  ;;  %v5092_v36 = vld [vmem:[%s5426_s3] sm:$0x7] }
0x14b4   :  { %v4373_v37 = vpop.eup %4372 }
0x14b5   :  { %v1357_v38 = vadd.f32 1.0, %v4373_v37 }
0x14b7   :  { %4374 = vrcp.f32 %v1357_v38 }
0x14c1   :  { %v4375_v41 = vpop.eup %4374 }
0x14c2   :  { %v1360_v42 = vmul.f32 2.0, %v4375_v41  ;;  %v1362_v57 = vmul.f32 %v4375_v41, %v5003_v11 }
0x14c4   :  { %v3559_v47 = vadd.f32 -1.0, %v1360_v42 }
0x14c6   :  { %1364 = vrot.lane.b32.xlu0 %v3559_v47, %s4632_s0 }
0x152c   :  { %v1606_v3 = vpop.f32.mrb[36].mxu0 }
0x152d   :  { %v1613_v40 = vrot.slane %v1606_v3, 1  ;;  %v3975_v5 = vpop.f32.mrb[37].mxu0 }
0x152e   :  { %v1609_v43 = vpop.f32.mrb[38].mxu0 }
0x152f   :  { %v1615_v44 = vadd.f32 %v1613_v40, %v4772_v20  ;;  %v3976_v46 = vpop.f32.mrb[39].mxu0 }
0x1531   :  { %v3568_v48 = vmul.f32 -1.442695, %v1615_v44 }
0x1533   :  { %4376 = vpow2.f32 %v3568_v48 }
0x1538   :  { %v1365_v49 = vpop.permute.xlu0 %1364 }
0x1539   :  { %v1367_v50 = vmul.f32 %v4375_v41, %v1365_v49 }
0x153b   :  { %1369 = vrot.lane.b32.xlu0 %v1367_v50, %s4639_s22 }
0x153d   :  { %v4377_v51 = vpop.eup %4376 }
0x153e   :  { %v1619_v52 = vadd.f32 1.0, %v4377_v51 }
0x1540   :  { %4378 = vrcp.f32 %v1619_v52 }
0x154a   :  { %v4379_v53 = vpop.eup %4378 }
0x154b   :  { %v1622_v54 = vmul.f32 2.0, %v4379_v53  ;;  %v1627_v2 = vmul.f32 %v4379_v53, %v1625_v1 }
0x154d   :  { %v3569_v55 = vadd.f32 -1.0, %v1622_v54 }
0x154f   :  { %1629 = vrot.lane.b32.xlu1 %v3569_v55, %s4632_s0 }
0x15ad   :  { %v1370_v56 = vpop.permute.xlu0 %1369 }
0x15ae   :  { %v5046_v58 = vadd.f32 %v1370_v56, %v1362_v57 }
0x15b0   :  { %4380 = vtanh.f32 %v5046_v58 }
0x15ba   :  { %v4381_v20 = vpop.eup %4380 }
0x15bb   :  { %1375 = vrot.lane.b32.xlu0 %v4381_v20, %s4632_s0 }
0x15c1   :  { %v1630_v59 = vpop.permute.xlu1 %1629 }
0x15c2   :  { %v1632_v60 = vmul.f32 %v4379_v53, %v1630_v59 }
0x15c4   :  { %1634 = vrot.lane.b32.xlu1 %v1632_v60, %s4639_s22 }
0x162d   :  { %v1376_v61 = vpop.permute.xlu0 %1375 }
0x162e   :  { %v1378_v62 = vmul.f32 %v4375_v41, %v1376_v61 }
0x1630   :  { %v1499_v63 = vpack.c.bf16 %v1378_v62, %v1378_v62 }
0x1632   :  { %1501 = vrot.lane.b32.xlu0 %v1499_v63, %s4639_s22 }
0x1636   :  { %v1635_v4 = vpop.permute.xlu1 %1634 }
0x1637   :  { %v5053_v7 = vadd.f32 %v1635_v4, %v1627_v2 }
0x1639   :  { %4382 = vtanh.f32 %v5053_v7  ;;  %v1817_v56 = vrot.slane %v5053_v7, 7 }
0x1643   :  { %v4383_v8 = vpop.eup %4382 }
0x1644   :  { %1640 = vrot.lane.b32.xlu1 %v4383_v8, %s4632_s0 }
0x16a4   :  { %v1502_v10 = vpop.permute.xlu0 %1501 }
0x16a5   :  { %3966 = vmatmul.mubr.msk.bf16.vlgmr.msra.gmra.mrb[20].mxu1 %vm185_vm2, %v1502_v10 }
0x16a6   :  { %3994 = vmatpush3.bf16.msra.mxu1 %v5015_v27  ;;  %3997 = vmatprep.mubr.msk.bf16.mxu1 %vm4638_vm0, %v4637_v0 }
0x16a7   :  { %3995 = vmatprep.subr.bf16.mxu1 %v4637_v0 }
0x16aa   :  { %3996 = vmatpush3.bf16.msra.mxu1 %v5021_v28 }
0x16ab   :  { %4001 = vmatprep.subr.bf16.mxu1 %v4637_v0 }
0x16b6   :  { %v1641_v11 = vpop.permute.xlu1 %1640 }
0x16b7   :  { %v1643_v15 = vmul.f32 %v4379_v53, %v1641_v11 }
0x16b9   :  { %v1644_v16 = vpack.c.bf16 %v1643_v15, %v1643_v15 }
0x16bb   :  { %v1646_v17 = vshrl.u32 %v1644_v16, 16 }
0x16bd   :  { %v1648_v18 = vrot.slane %v1646_v17, 3 }
0x16bf   :  { %1649 = vrot.lane.b32.xlu1 %v1648_v18, %s4639_s22 }
0x1731   :  { %v1650_v19 = vpop.permute.xlu1 %1649 }
0x1732   :  { %3982 = vmatmul.mubr.msk.bf16.vlgmr.msra.gmra.mrb[40].mxu0 %vm185_vm2, %v1650_v19  ;;  %3998 = vmatmul.mubr.msk.bf16.vlgmr.msra.gmra.mrb[24].mxu1 %vm185_vm2, %v1650_v19 }
0x1733   :  { %3986 = vmatpush3.bf16.msra.mxu0 %v5067_v21  ;;  %3989 = vmatprep.mubr.msk.bf16.mxu0 %vm4638_vm0, %v4637_v0 }
0x1734   :  { %3987 = vmatprep.subr.bf16.mxu0 %v4637_v0  ;;  %4002 = vmatpush3.bf16.msra.mxu1 %v5073_v22 }
0x1735   :  { %4003 = vmatprep.subr.bf16.mxu1 %v4637_v0  ;;  %4005 = vmatprep.mubr.msk.bf16.mxu1 %vm4638_vm0, %v4637_v0 }
0x1737   :  { %3988 = vmatpush3.bf16.msra.mxu0 %v5079_v14 }
0x1738   :  { %4009 = vmatprep.subr.bf16.mxu0 %v4637_v0  ;;  %4004 = vmatpush3.bf16.msra.mxu1 %v5083_v23 }
0x1739   :  { %4017 = vmatprep.subr.bf16.mxu1 %v4637_v0 }
0x1778   :  { %v1540_v24 = vpop.f32.mrb[20].mxu1 }
0x1779   :  { %v4191_v25 = vadd.f32 %v1540_v24, %v4822_v6  ;;  %v3967_v26 = vpop.f32.mrb[21].mxu1 }
0x177a   :  { %v1543_v9 = vpop.f32.mrb[22].mxu1 }
0x177b   :  { %v3565_v29 = vmul.f32 -1.442695, %v4191_v25  ;;  %v3968_v31 = vpop.f32.mrb[23].mxu1 }
0x177d   :  { %4384 = vpow2.f32 %v3565_v29 }
0x1787   :  { %v4385_v30 = vpop.eup %4384 }
0x1788   :  { %v1550_v32 = vadd.f32 1.0, %v4385_v30 }
0x178a   :  { %4386 = vrcp.f32 %v1550_v32 }
0x1794   :  { %v4387_v45 = vpop.eup %4386 }
0x1795   :  { %v1553_v33 = vmul.f32 2.0, %v4387_v45  ;;  %v1555_v48 = vmul.f32 %v4387_v45, %v5046_v58 }
0x1797   :  { %v3566_v34 = vadd.f32 -1.0, %v1553_v33 }
0x1799   :  { %1557 = vrot.lane.b32.xlu0 %v3566_v34, %s4632_s0 }
0x1805   :  { %v1801_v35 = vpop.f32.mrb[24].mxu1 }
0x1806   :  { %v1807_v39 = vadd.f32 %v5092_v36, %v1801_v35  ;;  %v3999_v37 = vpop.f32.mrb[25].mxu1 }
0x1807   :  { %v1804_v38 = vpop.f32.mrb[26].mxu1 }
0x1808   :  { %v3575_v41 = vmul.f32 -1.442695, %v1807_v39  ;;  %v4000_v42 = vpop.f32.mrb[27].mxu1 }
0x180a   :  { %4388 = vpow2.f32 %v3575_v41 }
0x180b   :  { %v1558_v47 = vpop.permute.xlu0 %1557 }
0x180c   :  { %v1560_v3 = vmul.f32 %v4387_v45, %v1558_v47 }
0x180e   :  { %1562 = vrot.lane.b32.xlu0 %v1560_v3, %s4639_s22 }
0x1814   :  { %v4389_v40 = vpop.eup %4388 }
0x1815   :  { %v1811_v5 = vadd.f32 1.0, %v4389_v40 }
0x1817   :  { %4390 = vrcp.f32 %v1811_v5 }
0x1821   :  { %v4391_v43 = vpop.eup %4390 }
0x1822   :  { %v1814_v44 = vmul.f32 2.0, %v4391_v43  ;;  %v1819_v58 = vmul.f32 %v4391_v43, %v1817_v56 }
0x1824   :  { %v3576_v46 = vadd.f32 -1.0, %v1814_v44 }
0x1826   :  { %1821 = vrot.lane.b32.xlu1 %v3576_v46, %s4632_s0 }
0x1880   :  { %v1563_v49 = vpop.permute.xlu0 %1562 }
0x1881   :  { %v5098_v50 = vadd.f32 %v1563_v49, %v1555_v48 }
0x1883   :  { %4392 = vtanh.f32 %v5098_v50 }
0x188d   :  { %v4393_v51 = vpop.eup %4392 }
0x188e   :  { %1568 = vrot.lane.b32.xlu0 %v4393_v51, %s4632_s0 }
0x1898   :  { %v1822_v52 = vpop.permute.xlu1 %1821 }
0x1899   :  { %v1824_v53 = vmul.f32 %v4391_v43, %v1822_v52 }
0x189b   :  { %1826 = vrot.lane.b32.xlu1 %v1824_v53, %s4639_s22 }
0x1900   :  { %v1569_v54 = vpop.permute.xlu0 %1568 }
0x1901   :  { %v1571_v55 = vmul.f32 %v4387_v45, %v1569_v54 }
0x1903   :  { %v1694_v57 = vpack.c.bf16 %v1571_v55, %v1571_v55 }
0x1905   :  { %1696 = vrot.lane.b32.xlu0 %v1694_v57, %s4639_s22 }
0x190d   :  { %v1827_v20 = vpop.permute.xlu1 %1826 }
0x190e   :  { %v1829_v59 = vadd.f32 %v1827_v20, %v1819_v58 }
0x1910   :  { %4394 = vtanh.f32 %v1829_v59 }
0x191a   :  { %v4395_v60 = vpop.eup %4394 }
0x191b   :  { %1832 = vrot.lane.b32.xlu1 %v4395_v60, %s4632_s0 }
0x1977   :  { %v1697_v61 = vpop.permute.xlu0 %1696 }
0x1978   :  { %3990 = vmatmul.mubr.msk.bf16.vlgmr.msra.gmra.mrb[40].mxu0 %vm185_vm2, %v1697_v61 }
0x1979   :  { %4010 = vmatpush3.bf16.msra.mxu0 %v5015_v27  ;;  %4013 = vmatprep.mubr.msk.bf16.mxu0 %vm4638_vm0, %v4637_v0 }
0x197a   :  { %4011 = vmatprep.subr.bf16.mxu0 %v4637_v0 }
0x197d   :  { %4012 = vmatpush3.bf16.msra.mxu0 %v5021_v28 }
0x197e   :  { %4025 = vmatprep.subr.bf16.mxu0 %v4637_v0 }
0x198d   :  { %v1833_v62 = vpop.permute.xlu1 %1832 }
0x198e   :  { %v1835_v63 = vmul.f32 %v4391_v43, %v1833_v62 }
0x1990   :  { %v1836_v1 = vpack.c.bf16 %v1835_v63, %v1835_v63 }
0x1992   :  { %1838 = vrot.lane.b32.xlu1 %v1836_v1, %s4639_s22 }
0x1a04   :  { %v1839_v2 = vpop.permute.xlu1 %1838 }
0x1a05   :  { %4006 = vmatmul.mubr.msk.bf16.vlgmr.msra.gmra.mrb[28].mxu1 %vm185_vm2, %v1839_v2  ;;  %4014 = vmatmul.mubr.msk.bf16.vlgmr.msra.gmra.mrb[44].mxu0 %vm185_vm2, %v1839_v2 }
0x1a06   :  { %4018 = vmatpush3.bf16.msra.mxu1 %v5073_v22  ;;  %4026 = vmatpush3.bf16.msra.mxu0 %v5015_v27 }
0x1a07   :  { %4019 = vmatprep.subr.bf16.mxu1 %v4637_v0  ;;  %4027 = vmatprep.subr.bf16.mxu0 %v4637_v0 }
0x1a08   :  { %4021 = vmatprep.mubr.msk.bf16.mxu1 %vm4638_vm0, %v4637_v0  ;;  %4029 = vmatprep.mubr.msk.bf16.mxu0 %vm4638_vm0, %v4637_v0 }
0x1a0a   :  { %4020 = vmatpush3.bf16.msra.mxu1 %v5083_v23  ;;  %4028 = vmatpush3.bf16.msra.mxu0 %v5021_v28 }
0x1a0b   :  { %4033 = vmatprep.subr.bf16.mxu1 %v4637_v0  ;;  %4041 = vmatprep.subr.bf16.mxu0 %v4637_v0 }
0x1a4b   :  { %v5128_v4 = vpop.f32.mrb[40].mxu0 }
0x1a4c   :  { %v3991_v7 = vpop.f32.mrb[41].mxu0 }
0x1a4d   :  { %v1738_v8 = vpop.f32.mrb[42].mxu0 }
0x1a4e   :  { %v3992_v10 = vpop.f32.mrb[43].mxu0 }
0x1ad8   :  { %v1919_v11 = vpop.f32.mrb[44].mxu0 }
0x1ad9   :  { %v1925_v15 = vadd.f32 %v5092_v36, %v1919_v11  ;;  %v4015_v16 = vpop.f32.mrb[45].mxu0 }
0x1ada   :  { %v1922_v17 = vpop.f32.mrb[46].mxu0 }
0x1adb   :  { %v3579_v18 = vmul.f32 -1.442695, %v1925_v15  ;;  %v4016_v19 = vpop.f32.mrb[47].mxu0 }
0x1add   :  { %4396 = vpow2.f32 %v3579_v18 }
0x1ae7   :  { %v4397_v24 = vpop.eup %4396 }
0x1ae8   :  { %v1929_v25 = vadd.f32 1.0, %v4397_v24 }
0x1aea   :  { %4398 = vrcp.f32 %v1929_v25 }
0x1af4   :  { %v4399_v26 = vpop.eup %4398 }
0x1af5   :  { %v1932_v9 = vmul.f32 2.0, %v4399_v26  ;;  %v1934_v32 = vmul.f32 %v4399_v26, %v1829_v59 }
0x1af7   :  { %v3580_v29 = vadd.f32 -1.0, %v1932_v9 }
0x1af9   :  { %1936 = vrot.lane.b32.xlu0 %v3580_v29, %s4632_s0 }
0x1b6b   :  { %v1937_v31 = vpop.permute.xlu0 %1936 }
0x1b6c   :  { %v1939_v30 = vmul.f32 %v4399_v26, %v1937_v31 }
0x1b6e   :  { %1941 = vrot.lane.b32.xlu1 %v1939_v30, %s4639_s22 }
0x1be0   :  { %v1942_v45 = vpop.permute.xlu1 %1941 }
0x1be1   :  { %v1944_v33 = vadd.f32 %v1942_v45, %v1934_v32 }
0x1be3   :  { %4400 = vtanh.f32 %v1944_v33 }
0x1bed   :  { %v4401_v34 = vpop.eup %4400 }
0x1bee   :  { %1947 = vrot.lane.b32.xlu0 %v4401_v34, %s4632_s0 }
0x1c60   :  { %v1948_v35 = vpop.permute.xlu0 %1947 }
0x1c61   :  { %v1950_v39 = vmul.f32 %v4399_v26, %v1948_v35 }
0x1c63   :  { %v1951_v37 = vpack.c.bf16 %v1950_v39, %v1950_v39 }
0x1c65   :  { %1953 = vrot.lane.b32.xlu1 %v1951_v37, %s4639_s22 }
0x1cd7   :  { %v1954_v38 = vpop.permute.xlu1 %1953 }
0x1cd8   :  { %4022 = vmatmul.mubr.msk.bf16.vlgmr.msra.gmra.mrb[32].mxu1 %vm185_vm2, %v1954_v38  ;;  %4030 = vmatmul.mubr.msk.bf16.vlgmr.msra.gmra.mrb[48].mxu0 %vm185_vm2, %v1954_v38 }
0x1cd9   :  { %4034 = vmatpush3.bf16.msra.mxu1 %v5073_v22  ;;  %4042 = vmatpush3.bf16.msra.mxu0 %v5015_v27 }
0x1cda   :  { %4035 = vmatprep.subr.bf16.mxu1 %v4637_v0  ;;  %4043 = vmatprep.subr.bf16.mxu0 %v4637_v0 }
0x1cdb   :  { %4037 = vmatprep.mubr.msk.bf16.mxu1 %vm4638_vm0, %v4637_v0  ;;  %4045 = vmatprep.mubr.msk.bf16.mxu0 %vm4638_vm0, %v4637_v0 }
0x1cdd   :  { %4036 = vmatpush3.bf16.msra.mxu1 %v5083_v23  ;;  %4044 = vmatpush3.bf16.msra.mxu0 %v5021_v28 }
0x1cde   :  { %4049 = vmatprep.subr.bf16.mxu1 %v4637_v0  ;;  %4057 = vmatprep.subr.bf16.mxu0 %v4637_v0 }
0x1dab   :  { %v2032_v41 = vpop.f32.mrb[48].mxu0 }
0x1dac   :  { %v2038_v42 = vadd.f32 %v5092_v36, %v2032_v41  ;;  %v4031_v47 = vpop.f32.mrb[49].mxu0 }
0x1dad   :  { %v2035_v3 = vpop.f32.mrb[50].mxu0 }
0x1dae   :  { %v3583_v40 = vmul.f32 -1.442695, %v2038_v42  ;;  %v4032_v5 = vpop.f32.mrb[51].mxu0 }
0x1db0   :  { %4402 = vpow2.f32 %v3583_v40 }
0x1dba   :  { %v4403_v43 = vpop.eup %4402 }
0x1dbb   :  { %v2042_v44 = vadd.f32 1.0, %v4403_v43 }
0x1dbd   :  { %4404 = vrcp.f32 %v2042_v44 }
0x1dc7   :  { %v4405_v46 = vpop.eup %4404 }
0x1dc8   :  { %v2045_v48 = vmul.f32 2.0, %v4405_v46  ;;  %v2047_v53 = vmul.f32 %v4405_v46, %v1944_v33 }
0x1dca   :  { %v3584_v49 = vadd.f32 -1.0, %v2045_v48 }
0x1dcc   :  { %2049 = vrot.lane.b32.xlu0 %v3584_v49, %s4632_s0 }
0x1e3e   :  { %v2050_v51 = vpop.permute.xlu0 %2049 }
0x1e3f   :  { %v2052_v52 = vmul.f32 %v4405_v46, %v2050_v51 }
0x1e41   :  { %2054 = vrot.lane.b32.xlu1 %v2052_v52, %s4639_s22 }
0x1eb3   :  { %v2055_v54 = vpop.permute.xlu1 %2054 }
0x1eb4   :  { %v2057_v55 = vadd.f32 %v2055_v54, %v2047_v53 }
0x1eb6   :  { %4406 = vtanh.f32 %v2057_v55 }
0x1ec0   :  { %v4407_v57 = vpop.eup %4406 }
0x1ec1   :  { %2060 = vrot.lane.b32.xlu0 %v4407_v57, %s4632_s0 }
0x1f33   :  { %v2061_v56 = vpop.permute.xlu0 %2060 }
0x1f34   :  { %v2063_v58 = vmul.f32 %v4405_v46, %v2061_v56 }
0x1f36   :  { %v2064_v20 = vpack.c.bf16 %v2063_v58, %v2063_v58 }
0x1f38   :  { %2066 = vrot.lane.b32.xlu1 %v2064_v20, %s4639_s22 }
0x1faa   :  { %v2067_v59 = vpop.permute.xlu1 %2066 }
0x1fab   :  { %4038 = vmatmul.mubr.msk.bf16.vlgmr.msra.gmra.mrb[36].mxu1 %vm185_vm2, %v2067_v59  ;;  %4046 = vmatmul.mubr.msk.bf16.vlgmr.msra.gmra.mrb[52].mxu0 %vm185_vm2, %v2067_v59 }
0x1fac   :  { %4050 = vmatpush3.bf16.msra.mxu1 %v5073_v22  ;;  %4058 = vmatpush3.bf16.msra.mxu0 %v5015_v27 }
0x1fad   :  { %4051 = vmatprep.subr.bf16.mxu1 %v4637_v0  ;;  %4059 = vmatprep.subr.bf16.mxu0 %v4637_v0 }
0x1fae   :  { %4053 = vmatprep.mubr.msk.bf16.mxu1 %vm4638_vm0, %v4637_v0  ;;  %4061 = vmatprep.mubr.msk.bf16.mxu0 %vm4638_vm0, %v4637_v0 }
0x1fb0   :  { %4052 = vmatpush3.bf16.msra.mxu1 %v5083_v23  ;;  %4060 = vmatpush3.bf16.msra.mxu0 %v5021_v28 }
0x1fb1   :  { %4065 = vmatprep.subr.bf16.mxu1 %v4637_v0  ;;  %4073 = vmatprep.subr.bf16.mxu0 %v4637_v0 }
0x207e   :  { %v2145_v60 = vpop.f32.mrb[52].mxu0 }
0x207f   :  { %v2151_v61 = vadd.f32 %v5092_v36, %v2145_v60  ;;  %v4047_v62 = vpop.f32.mrb[53].mxu0 }
0x2080   :  { %v2148_v63 = vpop.f32.mrb[54].mxu0 }
0x2081   :  { %v3587_v1 = vmul.f32 -1.442695, %v2151_v61  ;;  %v4048_v2 = vpop.f32.mrb[55].mxu0 }
0x2083   :  { %4408 = vpow2.f32 %v3587_v1 }
0x208d   :  { %v4409_v7 = vpop.eup %4408 }
0x208e   :  { %v2155_v8 = vadd.f32 1.0, %v4409_v7 }
0x2090   :  { %4410 = vrcp.f32 %v2155_v8 }
0x209a   :  { %v4411_v10 = vpop.eup %4410 }
0x209b   :  { %v2158_v11 = vmul.f32 2.0, %v4411_v10  ;;  %v2160_v18 = vmul.f32 %v4411_v10, %v2057_v55 }
0x209d   :  { %v3588_v15 = vadd.f32 -1.0, %v2158_v11 }
0x209f   :  { %2162 = vrot.lane.b32.xlu0 %v3588_v15, %s4632_s0 }
0x2111   :  { %v2163_v16 = vpop.permute.xlu0 %2162 }
0x2112   :  { %v2165_v17 = vmul.f32 %v4411_v10, %v2163_v16 }
0x2114   :  { %2167 = vrot.lane.b32.xlu1 %v2165_v17, %s4639_s22 }
0x2186   :  { %v2168_v19 = vpop.permute.xlu1 %2167 }
0x2187   :  { %v2170_v24 = vadd.f32 %v2168_v19, %v2160_v18 }
0x2189   :  { %4412 = vtanh.f32 %v2170_v24 }
0x2193   :  { %v4413_v25 = vpop.eup %4412 }
0x2194   :  { %2173 = vrot.lane.b32.xlu0 %v4413_v25, %s4632_s0 }
0x2206   :  { %v2174_v26 = vpop.permute.xlu0 %2173 }
0x2207   :  { %v2176_v9 = vmul.f32 %v4411_v10, %v2174_v26 }
0x2209   :  { %v2177_v29 = vpack.c.bf16 %v2176_v9, %v2176_v9 }
0x220b   :  { %2179 = vrot.lane.b32.xlu1 %v2177_v29, %s4639_s22 }
0x227d   :  { %v2180_v31 = vpop.permute.xlu1 %2179 }
0x227e   :  { %4054 = vmatmul.mubr.msk.bf16.vlgmr.msra.gmra.mrb[40].mxu1 %vm185_vm2, %v2180_v31  ;;  %4062 = vmatmul.mubr.msk.bf16.vlgmr.msra.gmra.mrb[56].mxu0 %vm185_vm2, %v2180_v31 }
0x227f   :  { %4066 = vmatpush3.bf16.msra.mxu1 %v5073_v22  ;;  %4074 = vmatpush3.bf16.msra.mxu0 %v5015_v27 }
0x2280   :  { %4067 = vmatprep.subr.bf16.mxu1 %v4637_v0  ;;  %4075 = vmatprep.subr.bf16.mxu0 %v4637_v0 }
0x2281   :  { %4069 = vmatprep.mubr.msk.bf16.mxu1 %vm4638_vm0, %v4637_v0  ;;  %4077 = vmatprep.mubr.msk.bf16.mxu0 %vm4638_vm0, %v4637_v0 }
0x2283   :  { %4068 = vmatpush3.bf16.msra.mxu1 %v5083_v23  ;;  %4076 = vmatpush3.bf16.msra.mxu0 %v5021_v28 }
0x2284   :  { %4081 = vmatprep.subr.bf16.mxu1 %v4637_v0  ;;  %4089 = vmatprep.subr.bf16.mxu0 %v4637_v0 }
0x2351   :  { %v2258_v30 = vpop.f32.mrb[56].mxu0 }
0x2352   :  { %v2264_v32 = vadd.f32 %v5092_v36, %v2258_v30  ;;  %v4063_v45 = vpop.f32.mrb[57].mxu0 }
0x2353   :  { %v2261_v33 = vpop.f32.mrb[58].mxu0 }
0x2354   :  { %v3591_v34 = vmul.f32 -1.442695, %v2264_v32  ;;  %v4064_v35 = vpop.f32.mrb[59].mxu0 }
0x2356   :  { %4414 = vpow2.f32 %v3591_v34 }
0x2360   :  { %v4415_v39 = vpop.eup %4414 }
0x2361   :  { %v2268_v37 = vadd.f32 1.0, %v4415_v39  ;;  %v4192_v39 = vadd.f32 %v5128_v4, %v4822_v6 }
0x2363   :  { %4416 = vrcp.f32 %v2268_v37  ;;  %v3572_v37 = vmul.f32 -1.442695, %v4192_v39 }
0x236d   :  { %v4417_v38 = vpop.eup %4416 }
0x236e   :  { %v2271_v41 = vmul.f32 2.0, %v4417_v38  ;;  %v2273_v40 = vmul.f32 %v4417_v38, %v2170_v24 }
0x2370   :  { %v3592_v42 = vadd.f32 -1.0, %v2271_v41 }
0x2372   :  { %2275 = vrot.lane.b32.xlu0 %v3592_v42, %s4632_s0 }
0x23e4   :  { %v2276_v47 = vpop.permute.xlu0 %2275 }
0x23e5   :  { %v2278_v3 = vmul.f32 %v4417_v38, %v2276_v47 }
0x23e7   :  { %2280 = vrot.lane.b32.xlu1 %v2278_v3, %s4639_s22 }
0x2459   :  { %v2281_v5 = vpop.permute.xlu1 %2280 }
0x245a   :  { %v2283_v43 = vadd.f32 %v2281_v5, %v2273_v40 }
0x245c   :  { %4418 = vtanh.f32 %v2283_v43 }
0x2466   :  { %v4419_v44 = vpop.eup %4418 }
0x2467   :  { %2286 = vrot.lane.b32.xlu0 %v4419_v44, %s4632_s0 }
0x24d9   :  { %v2287_v46 = vpop.permute.xlu0 %2286 }
0x24da   :  { %v2289_v48 = vmul.f32 %v4417_v38, %v2287_v46 }
0x24dc   :  { %v2290_v49 = vpack.c.bf16 %v2289_v48, %v2289_v48 }
0x24de   :  { %2292 = vrot.lane.b32.xlu1 %v2290_v49, %s4639_s22 }
0x2550   :  { %v2293_v51 = vpop.permute.xlu1 %2292 }
0x2551   :  { %4070 = vmatmul.mubr.msk.bf16.vlgmr.msra.gmra.mrb[44].mxu1 %vm185_vm2, %v2293_v51  ;;  %4078 = vmatmul.mubr.msk.bf16.vlgmr.msra.gmra.mrb[60].mxu0 %vm185_vm2, %v2293_v51 }
0x2552   :  { %4082 = vmatpush3.bf16.msra.mxu1 %v5073_v22  ;;  %4090 = vmatpush3.bf16.msra.mxu0 %v5015_v27 }
0x2553   :  { %4083 = vmatprep.subr.bf16.mxu1 %v4637_v0  ;;  %4091 = vmatprep.subr.bf16.mxu0 %v4637_v0 }
0x2554   :  { %4085 = vmatprep.mubr.msk.bf16.mxu1 %vm4638_vm0, %v4637_v0  ;;  %4093 = vmatprep.mubr.msk.bf16.mxu0 %vm4638_vm0, %v4637_v0 }
0x2556   :  { %4084 = vmatpush3.bf16.msra.mxu1 %v5083_v23  ;;  %4092 = vmatpush3.bf16.msra.mxu0 %v5021_v28 }
0x2557   :  { %4097 = vmatprep.subr.bf16.mxu1 %v4637_v0  ;;  %4105 = vmatprep.subr.bf16.mxu0 %v4637_v0 }
0x2624   :  { %v2371_v52 = vpop.f32.mrb[60].mxu0 }
0x2625   :  { %v2377_v53 = vadd.f32 %v5092_v36, %v2371_v52  ;;  %v4079_v54 = vpop.f32.mrb[61].mxu0 }
0x2626   :  { %v2374_v55 = vpop.f32.mrb[62].mxu0 }
0x2627   :  { %v3595_v57 = vmul.f32 -1.442695, %v2377_v53  ;;  %v4080_v56 = vpop.f32.mrb[63].mxu0 }
0x2629   :  { %4420 = vpow2.f32 %v3595_v57 }
0x2633   :  { %v4421_v58 = vpop.eup %4420 }
0x2634   :  { %v2381_v20 = vadd.f32 1.0, %v4421_v58 }
0x2636   :  { %4422 = vrcp.f32 %v2381_v20 }
0x2640   :  { %v4423_v59 = vpop.eup %4422 }
0x2641   :  { %v2384_v60 = vmul.f32 2.0, %v4423_v59  ;;  %v2386_v1 = vmul.f32 %v4423_v59, %v2283_v43 }
0x2643   :  { %v3596_v61 = vadd.f32 -1.0, %v2384_v60 }
0x2645   :  { %2388 = vrot.lane.b32.xlu0 %v3596_v61, %s4632_s0 }
0x26b7   :  { %v2389_v62 = vpop.permute.xlu0 %2388 }
0x26b8   :  { %v2391_v63 = vmul.f32 %v4423_v59, %v2389_v62 }
0x26ba   :  { %2393 = vrot.lane.b32.xlu1 %v2391_v63, %s4639_s22 }
0x272c   :  { %v2394_v2 = vpop.permute.xlu1 %2393 }
0x272d   :  { %v2396_v7 = vadd.f32 %v2394_v2, %v2386_v1 }
0x272f   :  { %4424 = vtanh.f32 %v2396_v7 }
0x2739   :  { %v4425_v8 = vpop.eup %4424 }
0x273a   :  { %2399 = vrot.lane.b32.xlu0 %v4425_v8, %s4632_s0 }
0x27ac   :  { %v2400_v10 = vpop.permute.xlu0 %2399 }
0x27ad   :  { %v2402_v11 = vmul.f32 %v4423_v59, %v2400_v10 }
0x27af   :  { %v2403_v15 = vpack.c.bf16 %v2402_v11, %v2402_v11 }
0x27b1   :  { %2405 = vrot.lane.b32.xlu1 %v2403_v15, %s4639_s22 }
0x2823   :  { %v2406_v16 = vpop.permute.xlu1 %2405 }
0x2824   :  { %4086 = vmatmul.mubr.msk.bf16.vlgmr.msra.gmra.mrb[48].mxu1 %vm185_vm2, %v2406_v16  ;;  %4094 = vmatmul.mubr.msk.bf16.vlgmr.msra.gmra.mrb[64].mxu0 %vm185_vm2, %v2406_v16 }
0x2825   :  { %4098 = vmatpush3.bf16.msra.mxu1 %v5073_v22  ;;  %4106 = vmatpush3.bf16.msra.mxu0 %v5015_v27 }
0x2826   :  { %4099 = vmatprep.subr.bf16.mxu1 %v4637_v0  ;;  %4107 = vmatprep.subr.bf16.mxu0 %v4637_v0 }
0x2827   :  { %4101 = vmatprep.mubr.msk.bf16.mxu1 %vm4638_vm0, %v4637_v0  ;;  %4109 = vmatprep.mubr.msk.bf16.mxu0 %vm4638_vm0, %v4637_v0 }
0x2829   :  { %4100 = vmatpush3.bf16.msra.mxu1 %v5083_v23  ;;  %4108 = vmatpush3.bf16.msra.mxu0 %v5021_v28 }
0x282a   :  { %4113 = vmatprep.subr.bf16.mxu1 %v4637_v0 }
0x28f7   :  { %v2484_v17 = vpop.f32.mrb[64].mxu0 }
0x28f8   :  { %v2490_v18 = vadd.f32 %v5092_v36, %v2484_v17  ;;  %v4095_v27 = vpop.f32.mrb[65].mxu0 }
0x28f9   :  { %v2487_v19 = vpop.f32.mrb[66].mxu0 }
0x28fa   :  { %v3599_v24 = vmul.f32 -1.442695, %v2490_v18  ;;  %v4096_v25 = vpop.f32.mrb[67].mxu0  ;;  %v5267_v18 = vrot.slane %v5092_v36, 2 }
0x28fc   :  { %4426 = vpow2.f32 %v3599_v24 }
0x2906   :  { %v4427_v26 = vpop.eup %4426 }
0x2907   :  { %v2494_v9 = vadd.f32 1.0, %v4427_v26 }
0x2909   :  { %4428 = vrcp.f32 %v2494_v9 }
0x2913   :  { %v4429_v29 = vpop.eup %4428 }
0x2914   :  { %v2497_v31 = vmul.f32 2.0, %v4429_v29  ;;  %v2499_v45 = vmul.f32 %v4429_v29, %v2396_v7 }
0x2916   :  { %v3600_v30 = vadd.f32 -1.0, %v2497_v31 }
0x2918   :  { %2501 = vrot.lane.b32.xlu0 %v3600_v30, %s4632_s0 }
0x298a   :  { %v2502_v32 = vpop.permute.xlu0 %2501 }
0x298b   :  { %v2504_v28 = vmul.f32 %v4429_v29, %v2502_v32 }
0x298d   :  { %2506 = vrot.lane.b32.xlu1 %v2504_v28, %s4639_s22 }
0x29ff   :  { %v2507_v33 = vpop.permute.xlu1 %2506 }
0x2a00   :  { %v2509_v34 = vadd.f32 %v2507_v33, %v2499_v45 }
0x2a02   :  { %4430 = vtanh.f32 %v2509_v34 }
0x2a03   :  { %4432 = vpow2.f32 %v3572_v37 }
0x2a0c   :  { %v4431_v35 = vpop.eup %4430 }
0x2a0d   :  { %2512 = vrot.lane.b32.xlu0 %v4431_v35, %s4632_s0  ;;  %v4433_v38 = vpop.eup %4432 }
0x2a0e   :  { %v1745_v41 = vadd.f32 1.0, %v4433_v38 }
0x2a10   :  { %4434 = vrcp.f32 %v1745_v41 }
0x2a1a   :  { %v4435_v42 = vpop.eup %4434 }
0x2a1b   :  { %v1748_v5 = vmul.f32 2.0, %v4435_v42  ;;  %v1750_v46 = vmul.f32 %v4435_v42, %v5098_v50 }
0x2a1d   :  { %v3573_v43 = vadd.f32 -1.0, %v1748_v5 }
0x2a7f   :  { %v2513_v47 = vpop.permute.xlu0 %2512 }
0x2a80   :  { %v2515_v3 = vmul.f32 %v4429_v29, %v2513_v47 }
0x2a82   :  { %v2516_v40 = vpack.c.bf16 %v2515_v3, %v2515_v3 }
0x2a84   :  { %2518 = vrot.lane.b32.xlu1 %v2516_v40, %s4639_s22 }
0x2a88   :  { %1752 = vrot.lane.b32.xlu1 %v3573_v43, %s4632_s0 }
0x2af6   :  { %v2519_v44 = vpop.permute.xlu1 %2518 }
0x2af7   :  { %4102 = vmatmul.mubr.msk.bf16.vlgmr.msra.gmra.mrb[52].mxu1 %vm185_vm2, %v2519_v44  ;;  %4110 = vmatmul.mubr.msk.bf16.vlgmr.msra.gmra.mrb[68].mxu0 %vm185_vm2, %v2519_v44 }
0x2af8   :  { %4114 = vmatpush3.bf16.msra.mxu1 %v5073_v22  ;;  %4117 = vmatprep.mubr.msk.bf16.mxu1 %vm4638_vm0, %v4637_v0 }
0x2af9   :  { %4115 = vmatprep.subr.bf16.mxu1 %v4637_v0 }
0x2afa   :  { %v1753_v6 = vpop.permute.xlu1 %1752 }
0x2afb   :  { %v1755_v4 = vmul.f32 %v4435_v42, %v1753_v6 }
0x2afc   :  { %4116 = vmatpush3.bf16.msra.mxu1 %v5083_v23 }
0x2afd   :  { %1757 = vrot.lane.b32.xlu1 %v1755_v4, %s4639_s22  ;;  %4121 = vmatprep.subr.bf16.mxu1 %v4637_v0 }
0x2b6f   :  { %v1758_v48 = vpop.permute.xlu1 %1757 }
0x2b70   :  { %v5242_v49 = vadd.f32 %v1758_v48, %v1750_v46 }
0x2b72   :  { %4436 = vtanh.f32 %v5242_v49 }
0x2b7c   :  { %v4437_v22 = vpop.eup %4436 }
0x2b7d   :  { %1763 = vrot.lane.b32.xlu1 %v4437_v22, %s4632_s0 }
0x2bca   :  { %v2597_v51 = vpop.f32.mrb[68].mxu0 }
0x2bcb   :  { %v2603_v52 = vadd.f32 %v5092_v36, %v2597_v51  ;;  %v4111_v53 = vpop.f32.mrb[69].mxu0 }
0x2bcc   :  { %v2600_v54 = vpop.f32.mrb[70].mxu0 }
0x2bcd   :  { %v3603_v23 = vmul.f32 -1.442695, %v2603_v52  ;;  %v4112_v55 = vpop.f32.mrb[71].mxu0 }
0x2bcf   :  { %4438 = vpow2.f32 %v3603_v23 }
0x2bd9   :  { %v4439_v57 = vpop.eup %4438 }
0x2bda   :  { %v2607_v56 = vadd.f32 1.0, %v4439_v57 }
0x2bdc   :  { %4440 = vrcp.f32 %v2607_v56 }
0x2be6   :  { %v4441_v50 = vpop.eup %4440 }
0x2be7   :  { %v2610_v58 = vmul.f32 2.0, %v4441_v50  ;;  %v2612_v1 = vmul.f32 %v4441_v50, %v2509_v34 }
0x2be9   :  { %v3604_v20 = vadd.f32 -1.0, %v2610_v58 }
0x2beb   :  { %2614 = vrot.lane.b32.xlu0 %v3604_v20, %s4632_s0 }
0x2bef   :  { %v1764_v59 = vpop.permute.xlu1 %1763 }
0x2bf0   :  { %v1766_v60 = vmul.f32 %v4435_v42, %v1764_v59 }
0x2bf2   :  { %v2676_v61 = vpack.c.bf16 %v1766_v60, %v1766_v60 }
0x2bf4   :  { %2678 = vrot.lane.b32.xlu1 %v2676_v61, %s4639_s22 }
0x2c5d   :  { %v2615_v62 = vpop.permute.xlu0 %2614 }
0x2c5e   :  { %v2617_v63 = vmul.f32 %v4441_v50, %v2615_v62 }
0x2c60   :  { %2619 = vrot.lane.b32.xlu0 %v2617_v63, %s4639_s22 }
0x2c66   :  { %v2679_v17 = vpop.permute.xlu1 %2678 }
0x2cd2   :  { %v2620_v2 = vpop.permute.xlu0 %2619 }
0x2cd3   :  { %v2622_v7 = vadd.f32 %v2620_v2, %v2612_v1 }
0x2cd5   :  { %4442 = vtanh.f32 %v2622_v7 }
0x2cdf   :  { %v4443_v8 = vpop.eup %4442 }
0x2ce0   :  { %2625 = vrot.lane.b32.xlu0 %v4443_v8, %s4632_s0 }
0x2d52   :  { %v2626_v10 = vpop.permute.xlu0 %2625 }
0x2d53   :  { %v2628_v11 = vmul.f32 %v4441_v50, %v2626_v10 }
0x2d55   :  { %v2629_v15 = vpack.c.bf16 %v2628_v11, %v2628_v11 }
0x2d57   :  { %2631 = vrot.lane.b32.xlu0 %v2629_v15, %s4639_s22 }
0x2dc9   :  { %v2632_v16 = vpop.permute.xlu0 %2631 }
0x2dca   :  { %4118 = vmatmul.mubr.msk.bf16.vlgmr.msra.gmra.mrb[56].mxu1 %vm185_vm2, %v2632_v16 }
0x2dcb   :  { %4122 = vmatpush3.bf16.msra.mxu1 %v5067_v21  ;;  %4125 = vmatprep.mubr.msk.bf16.mxu1 %vm4638_vm0, %v4637_v0 }
0x2dcc   :  { %4123 = vmatprep.subr.bf16.mxu1 %v4637_v0 }
0x2dcf   :  { %4124 = vmatpush3.bf16.msra.mxu1 %v5079_v14 }
0x2dd0   :  { %4129 = vmatprep.subr.bf16.mxu1 %v4637_v0 }
0x2dd2   :  { %4126 = vmatmul.mubr.msk.bf16.vlgmr.msra.gmra.mrb[28].mxu1 %vm185_vm2, %v2679_v17 }
0x2dd3   :  { %4130 = vmatpush3.bf16.msra.mxu1 %v5067_v21  ;;  %4133 = vmatprep.mubr.msk.bf16.mxu1 %vm4638_vm0, %v4637_v0 }
0x2dd4   :  { %4131 = vmatprep.subr.bf16.mxu1 %v4637_v0 }
0x2dd7   :  { %4132 = vmatpush3.bf16.msra.mxu1 %v5079_v14 }
0x2dd8   :  { %4137 = vmatprep.subr.bf16.mxu1 %v4637_v0 }
0x2ea5   :  { %v2717_v27 = vpop.f32.mrb[28].mxu1 }
0x2ea6   :  { %v4193_v19 = vadd.f32 %v2717_v27, %v5267_v18  ;;  %v4127_v24 = vpop.f32.mrb[29].mxu1 }
0x2ea7   :  { %v2720_v25 = vpop.f32.mrb[30].mxu1 }
0x2ea8   :  { %v3607_v26 = vmul.f32 -1.442695, %v4193_v19  ;;  %v4128_v9 = vpop.f32.mrb[31].mxu1 }
0x2eaa   :  { %4444 = vpow2.f32 %v3607_v26 }
0x2eb4   :  { %v4445_v29 = vpop.eup %4444 }
0x2eb5   :  { %v2727_v31 = vadd.f32 1.0, %v4445_v29 }
0x2eb7   :  { %4446 = vrcp.f32 %v2727_v31 }
0x2ec1   :  { %v4447_v30 = vpop.eup %4446 }
0x2ec2   :  { %v2730_v32 = vmul.f32 2.0, %v4447_v30  ;;  %v2732_v36 = vmul.f32 %v4447_v30, %v5242_v49 }
0x2ec4   :  { %v3608_v28 = vadd.f32 -1.0, %v2730_v32 }
0x2ec6   :  { %2734 = vrot.lane.b32.xlu0 %v3608_v28, %s4632_s0 }
0x2f38   :  { %v2735_v45 = vpop.permute.xlu0 %2734 }
0x2f39   :  { %v2737_v33 = vmul.f32 %v4447_v30, %v2735_v45 }
0x2f3b   :  { %2739 = vrot.lane.b32.xlu1 %v2737_v33, %s4639_s22 }
0x2fad   :  { %v2740_v34 = vpop.permute.xlu1 %2739 }
0x2fae   :  { %v2742_v35 = vadd.f32 %v2740_v34, %v2732_v36 }
0x2fb0   :  { %4448 = vtanh.f32 %v2742_v35 }
0x2fba   :  { %v4449_v39 = vpop.eup %4448 }
0x2fbb   :  { %2745 = vrot.lane.b32.xlu0 %v4449_v39, %s4632_s0 }
0x302d   :  { %v2746_v37 = vpop.permute.xlu0 %2745 }
0x302e   :  { %v5274_v38 = vmul.f32 %v4447_v30, %v2746_v37 }
0x3030   :  { %v2755_v41 = vpack.c.bf16 %v5274_v38, %v5274_v38 }
0x3032   :  { %2757 = vrot.lane.b32.xlu1 %v2755_v41, %s4639_s22 }
0x30a4   :  { %v2758_v42 = vpop.permute.xlu1 %2757 }
0x30a5   :  { %4134 = vmatmul.mubr.msk.bf16.vlgmr.msra.gmra.mrb[32].mxu1 %vm185_vm2, %v2758_v42 }
0x30a6   :  { %4138 = vmatpush3.bf16.msra.mxu1 %v5067_v21  ;;  %4141 = vmatprep.mubr.msk.bf16.mxu1 %vm4638_vm0, %v4637_v0 }
0x30a7   :  { %4139 = vmatprep.subr.bf16.mxu1 %v4637_v0 }
0x30aa   :  { %4140 = vmatpush3.bf16.msra.mxu1 %v5079_v14 }
0x30ab   :  { %4145 = vmatprep.subr.bf16.mxu1 %v4637_v0 }
0x3178   :  { %v2796_v47 = vpop.f32.mrb[32].mxu1 }
0x3179   :  { %v4194_v3 = vadd.f32 %v2796_v47, %v5267_v18  ;;  %v4135_v40 = vpop.f32.mrb[33].mxu1 }
0x317a   :  { %v2799_v5 = vpop.f32.mrb[34].mxu1 }
0x317b   :  { %v3610_v43 = vmul.f32 -1.442695, %v4194_v3  ;;  %v4136_v44 = vpop.f32.mrb[35].mxu1 }
0x317c   :  { %v5334_v44 = vld [vmem:[#allocation8 + $0x48] sm:$0xff]  }
0x317d   :  { %4450 = vpow2.f32 %v3610_v43  ;;  %v5328_v43 = vld [vmem:[#allocation8 + $0x40] sm:$0xff]  }
0x3187   :  { %v4451_v6 = vpop.eup %4450 }
0x3188   :  { %v2806_v4 = vadd.f32 1.0, %v4451_v6 }
0x318a   :  { %4452 = vrcp.f32 %v2806_v4 }
0x3194   :  { %v4453_v46 = vpop.eup %4452 }
0x3195   :  { %v2809_v48 = vmul.f32 2.0, %v4453_v46  ;;  %v2811_v52 = vmul.f32 %v4453_v46, %v2742_v35 }
0x3197   :  { %v3611_v49 = vadd.f32 -1.0, %v2809_v48 }
0x3199   :  { %2813 = vrot.lane.b32.xlu0 %v3611_v49, %s4632_s0 }
0x320b   :  { %v2814_v22 = vpop.permute.xlu0 %2813 }
0x320c   :  { %v2816_v51 = vmul.f32 %v4453_v46, %v2814_v22 }
0x320e   :  { %2818 = vrot.lane.b32.xlu1 %v2816_v51, %s4639_s22 }
0x3280   :  { %v2819_v53 = vpop.permute.xlu1 %2818 }
0x3281   :  { %v2821_v54 = vadd.f32 %v2819_v53, %v2811_v52 }
0x3283   :  { %4454 = vtanh.f32 %v2821_v54 }
0x328d   :  { %v4455_v23 = vpop.eup %4454 }
0x328e   :  { %2824 = vrot.lane.b32.xlu0 %v4455_v23, %s4632_s0 }
0x3300   :  { %v2825_v55 = vpop.permute.xlu0 %2824 }
0x3301   :  { %v5290_v57 = vmul.f32 %v4453_v46, %v2825_v55 }
0x3303   :  { %v2833_v56 = vpack.c.bf16 %v5290_v57, %v5290_v57 }
0x3305   :  { %2835 = vrot.lane.b32.xlu1 %v2833_v56, %s4639_s22 }
0x3377   :  { %v2836_v50 = vpop.permute.xlu1 %2835 }
0x3378   :  { %4142 = vmatmul.mubr.msk.bf16.vlgmr.msra.gmra.mrb[36].mxu1 %vm185_vm2, %v2836_v50 }
0x3379   :  { %4146 = vmatpush3.bf16.msra.mxu1 %v5067_v21  ;;  %4149 = vmatprep.mubr.msk.bf16.mxu1 %vm4638_vm0, %v4637_v0 }
0x337a   :  { %4147 = vmatprep.subr.bf16.mxu1 %v4637_v0 }
0x337d   :  { %4148 = vmatpush3.bf16.msra.mxu1 %v5079_v14 }
0x337e   :  { %4153 = vmatprep.subr.bf16.mxu1 %v4637_v0 }
0x344b   :  { %v2874_v58 = vpop.f32.mrb[36].mxu1 }
0x344c   :  { %v4195_v20 = vadd.f32 %v2874_v58, %v5267_v18  ;;  %v4143_v59 = vpop.f32.mrb[37].mxu1 }
0x344d   :  { %v2877_v60 = vpop.f32.mrb[38].mxu1 }
0x344e   :  { %v3613_v61 = vmul.f32 -1.442695, %v4195_v20  ;;  %v4144_v62 = vpop.f32.mrb[39].mxu1 }
0x3450   :  { %4456 = vpow2.f32 %v3613_v61 }
0x345a   :  { %v4457_v63 = vpop.eup %4456 }
0x345b   :  { %v2884_v1 = vadd.f32 1.0, %v4457_v63 }
0x345d   :  { %4458 = vrcp.f32 %v2884_v1 }
0x3467   :  { %v4459_v2 = vpop.eup %4458 }
0x3468   :  { %v2887_v7 = vmul.f32 2.0, %v4459_v2  ;;  %v2889_v15 = vmul.f32 %v4459_v2, %v2821_v54 }
0x346a   :  { %v3614_v8 = vadd.f32 -1.0, %v2887_v7 }
0x346c   :  { %2891 = vrot.lane.b32.xlu0 %v3614_v8, %s4632_s0 }
0x34de   :  { %v2892_v10 = vpop.permute.xlu0 %2891 }
0x34df   :  { %v2894_v11 = vmul.f32 %v4459_v2, %v2892_v10 }
0x34e1   :  { %2896 = vrot.lane.b32.xlu1 %v2894_v11, %s4639_s22 }
0x3553   :  { %v2897_v16 = vpop.permute.xlu1 %2896 }
0x3554   :  { %v2899_v17 = vadd.f32 %v2897_v16, %v2889_v15 }
0x3556   :  { %4460 = vtanh.f32 %v2899_v17 }
0x3560   :  { %v4461_v27 = vpop.eup %4460 }
0x3561   :  { %2902 = vrot.lane.b32.xlu0 %v4461_v27, %s4632_s0 }
0x35d3   :  { %v2903_v19 = vpop.permute.xlu0 %2902 }
0x35d4   :  { %v5306_v24 = vmul.f32 %v4459_v2, %v2903_v19 }
0x35d6   :  { %v2911_v25 = vpack.c.bf16 %v5306_v24, %v5306_v24 }
0x35d8   :  { %2913 = vrot.lane.b32.xlu1 %v2911_v25, %s4639_s22 }
0x364a   :  { %v2914_v26 = vpop.permute.xlu1 %2913 }
0x364b   :  { %4150 = vmatmul.mubr.msk.bf16.vlgmr.msra.gmra.mrb[40].mxu1 %vm185_vm2, %v2914_v26 }
0x364c   :  { %4154 = vmatpush3.bf16.msra.mxu1 %v5067_v21  ;;  %4157 = vmatprep.mubr.msk.bf16.mxu1 %vm4638_vm0, %v4637_v0 }
0x364d   :  { %4155 = vmatprep.subr.bf16.mxu1 %v4637_v0 }
0x3650   :  { %4156 = vmatpush3.bf16.msra.mxu1 %v5079_v14 }
0x3651   :  { %4161 = vmatprep.subr.bf16.mxu1 %v4637_v0 }
0x371e   :  { %v2952_v9 = vpop.f32.mrb[40].mxu1 }
0x371f   :  { %v4196_v29 = vadd.f32 %v2952_v9, %v5267_v18  ;;  %v4151_v31 = vpop.f32.mrb[41].mxu1 }
0x3720   :  { %v2955_v30 = vpop.f32.mrb[42].mxu1 }
0x3721   :  { %v3616_v32 = vmul.f32 -1.442695, %v4196_v29  ;;  %v4152_v28 = vpop.f32.mrb[43].mxu1 }
0x3723   :  { %4462 = vpow2.f32 %v3616_v32 }
0x372d   :  { %v4463_v45 = vpop.eup %4462 }
0x372e   :  { %v2962_v33 = vadd.f32 1.0, %v4463_v45 }
0x3730   :  { %4464 = vrcp.f32 %v2962_v33 }
0x373a   :  { %v4465_v21 = vpop.eup %4464 }
0x373b   :  { %v2965_v36 = vmul.f32 2.0, %v4465_v21  ;;  %v2967_v39 = vmul.f32 %v4465_v21, %v2899_v17 }
0x373d   :  { %v3617_v34 = vadd.f32 -1.0, %v2965_v36 }
0x373f   :  { %2969 = vrot.lane.b32.xlu0 %v3617_v34, %s4632_s0 }
0x37b1   :  { %v2970_v35 = vpop.permute.xlu0 %2969 }
0x37b2   :  { %v2972_v14 = vmul.f32 %v4465_v21, %v2970_v35 }
0x37b4   :  { %2974 = vrot.lane.b32.xlu1 %v2972_v14, %s4639_s22 }
0x3826   :  { %v2975_v37 = vpop.permute.xlu1 %2974 }
0x3827   :  { %v2977_v41 = vadd.f32 %v2975_v37, %v2967_v39 }
0x3829   :  { %4466 = vtanh.f32 %v2977_v41 }
0x3833   :  { %v4467_v42 = vpop.eup %4466 }
0x3834   :  { %2980 = vrot.lane.b32.xlu0 %v4467_v42, %s4632_s0 }
0x38a6   :  { %v2981_v47 = vpop.permute.xlu0 %2980 }
0x38a7   :  { %v5322_v3 = vmul.f32 %v4465_v21, %v2981_v47 }
0x38a9   :  { %v2989_v40 = vpack.c.bf16 %v5322_v3, %v5322_v3 }
0x38ab   :  { %2991 = vrot.lane.b32.xlu1 %v2989_v40, %s4639_s22 }
0x391d   :  { %v2992_v5 = vpop.permute.xlu1 %2991 }
0x391e   :  { %4158 = vmatmul.mubr.msk.bf16.vlgmr.msra.gmra.mrb[44].mxu1 %vm185_vm2, %v2992_v5 }
0x391f   :  { %4162 = vmatpush3.bf16.msra.mxu1 %v5328_v43  ;;  %4165 = vmatprep.mubr.msk.bf16.mxu1 %vm4638_vm0, %v4637_v0 }
0x3920   :  { %4163 = vmatprep.subr.bf16.mxu1 %v4637_v0 }
0x3923   :  { %4164 = vmatpush3.bf16.msra.mxu1 %v5334_v44 }
0x3924   :  { %4169 = vmatprep.subr.bf16.mxu1 %v4637_v0 }
0x39f1   :  { %v3030_v6 = vpop.f32.mrb[44].mxu1 }
0x39f2   :  { %v4197_v4 = vadd.f32 %v3030_v6, %v5267_v18  ;;  %v4159_v46 = vpop.f32.mrb[45].mxu1 }
0x39f3   :  { %v3033_v48 = vpop.f32.mrb[46].mxu1 }
0x39f4   :  { %v3619_v49 = vmul.f32 -1.442695, %v4197_v4  ;;  %v4160_v22 = vpop.f32.mrb[47].mxu1 }
0x39f6   :  { %4468 = vpow2.f32 %v3619_v49 }
0x3a00   :  { %v4469_v51 = vpop.eup %4468 }
0x3a01   :  { %v3040_v52 = vadd.f32 1.0, %v4469_v51 }
0x3a03   :  { %4470 = vrcp.f32 %v3040_v52 }
0x3a0d   :  { %v4471_v53 = vpop.eup %4470 }
0x3a0e   :  { %v3043_v54 = vmul.f32 2.0, %v4471_v53  ;;  %v3045_v50 = vmul.f32 %v4471_v53, %v2977_v41 }
0x3a10   :  { %v3620_v23 = vadd.f32 -1.0, %v3043_v54 }
0x3a12   :  { %3047 = vrot.lane.b32.xlu0 %v3620_v23, %s4632_s0 }
0x3a84   :  { %v3048_v55 = vpop.permute.xlu0 %3047 }
0x3a85   :  { %v3050_v56 = vmul.f32 %v4471_v53, %v3048_v55 }
0x3a87   :  { %3052 = vrot.lane.b32.xlu1 %v3050_v56, %s4639_s22 }
0x3af9   :  { %v3053_v58 = vpop.permute.xlu1 %3052 }
0x3afa   :  { %v3055_v20 = vadd.f32 %v3053_v58, %v3045_v50 }
0x3afc   :  { %4472 = vtanh.f32 %v3055_v20 }
0x3b06   :  { %v4473_v59 = vpop.eup %4472 }
0x3b07   :  { %3058 = vrot.lane.b32.xlu0 %v4473_v59, %s4632_s0 }
0x3b79   :  { %v3059_v60 = vpop.permute.xlu0 %3058 }
0x3b7a   :  { %v5342_v61 = vmul.f32 %v4471_v53, %v3059_v60 }
0x3b7c   :  { %v3067_v62 = vpack.c.bf16 %v5342_v61, %v5342_v61 }
0x3b7e   :  { %3069 = vrot.lane.b32.xlu1 %v3067_v62, %s4639_s22 }
0x3bf0   :  { %v3070_v63 = vpop.permute.xlu1 %3069 }
0x3bf1   :  { %4166 = vmatmul.mubr.msk.bf16.vlgmr.msra.gmra.mrb[48].mxu1 %vm185_vm2, %v3070_v63 }
0x3bf2   :  { %4170 = vmatpush3.bf16.msra.mxu1 %v5328_v43  ;;  %4173 = vmatprep.mubr.msk.bf16.mxu1 %vm4638_vm0, %v4637_v0 }
0x3bf3   :  { %4171 = vmatprep.subr.bf16.mxu1 %v4637_v0 }
0x3bf6   :  { %4172 = vmatpush3.bf16.msra.mxu1 %v5334_v44 }
0x3bf7   :  { %4177 = vmatprep.subr.bf16.mxu1 %v4637_v0 }
0x3cc4   :  { %v3108_v1 = vpop.f32.mrb[48].mxu1 }
0x3cc5   :  { %v4198_v2 = vadd.f32 %v3108_v1, %v5267_v18  ;;  %v4167_v7 = vpop.f32.mrb[49].mxu1 }
0x3cc6   :  { %v3111_v8 = vpop.f32.mrb[50].mxu1 }
0x3cc7   :  { %v3622_v10 = vmul.f32 -1.442695, %v4198_v2  ;;  %v4168_v11 = vpop.f32.mrb[51].mxu1 }
0x3cc8   :  { %v4293_v11 = vld [vmem:[#allocation9 + $0x24] ss:$16 sps:$4 sm:$0xff]  }
0x3cc9   :  { %4474 = vpow2.f32 %v3622_v10  ;;  %v4290_v10 = vld [vmem:[#allocation9 + $0x4] ss:$16 sps:$4 sm:$0xff]  }
0x3cca   :  { %3376 = vmatprep.subr.bf16.mxu0 %v4290_v10 }
0x3cd3   :  { %v4475_v15 = vpop.eup %4474 }
0x3cd4   :  { %v3118_v16 = vadd.f32 1.0, %v4475_v15  ;;  %v4640_v15 = vmov 0  }
0x3cd5   :  { %3408 = vmatprep.mubr.bf16.mxu0 %v4640_v15 }
0x3cd6   :  { %4476 = vrcp.f32 %v3118_v16  ;;  %v4291_v16 = vld [vmem:[#allocation9 + $0x20] ss:$16 sps:$4 sm:$0xff]  }
0x3ce0   :  { %v4477_v17 = vpop.eup %4476 }
0x3ce1   :  { %v3121_v27 = vmul.f32 2.0, %v4477_v17  ;;  %v3123_v9 = vmul.f32 %v4477_v17, %v3055_v20 }
0x3ce3   :  { %v3623_v19 = vadd.f32 -1.0, %v3121_v27 }
0x3ce5   :  { %3125 = vrot.lane.b32.xlu0 %v3623_v19, %s4632_s0 }
0x3d57   :  { %v3126_v25 = vpop.permute.xlu0 %3125 }
0x3d58   :  { %v3128_v26 = vmul.f32 %v4477_v17, %v3126_v25 }
0x3d5a   :  { %3130 = vrot.lane.b32.xlu1 %v3128_v26, %s4639_s22 }
0x3dcc   :  { %v3131_v29 = vpop.permute.xlu1 %3130 }
0x3dcd   :  { %v3133_v31 = vadd.f32 %v3131_v29, %v3123_v9  ;;  %v4294_v29 = vld [vmem:[#allocation9 + $0x8] ss:$16 sps:$4 sm:$0xff]  }
0x3dcf   :  { %4478 = vtanh.f32 %v3133_v31 }
0x3dd9   :  { %v4479_v30 = vpop.eup %4478 }
0x3dda   :  { %3136 = vrot.lane.b32.xlu0 %v4479_v30, %s4632_s0  ;;  %v4299_v30 = vld [vmem:[#allocation9 + $0x2c] ss:$16 sps:$4 sm:$0xff]  }
0x3e4c   :  { %v3137_v32 = vpop.permute.xlu0 %3136 }
0x3e4d   :  { %v5358_v28 = vmul.f32 %v4477_v17, %v3137_v32  ;;  %v4296_v17 = vld [vmem:[#allocation9 + $0xc] ss:$16 sps:$4 sm:$0xff]   ;;  %v4297_v32 = vld [vmem:[#allocation9 + $0x28] ss:$16 sps:$4 sm:$0xff]  }
0x3e4f   :  { %v3145_v45 = vpack.c.bf16 %v5358_v28, %v5358_v28 }
0x3e51   :  { %3147 = vrot.lane.b32.xlu1 %v3145_v45, %s4639_s22  ;;  %v3319_v45 = vsub.s32 1, %v4761_v12 }
0x3ec3   :  { %v3148_v33 = vpop.permute.xlu1 %3147 }
0x3ec4   :  { %4174 = vmatmul.mubr.msk.bf16.vlgmr.msra.gmra.mrb[52].mxu1 %vm185_vm2, %v3148_v33  ;;  %v3311_v33 = vld [vmem:[%s5428_s5] sm:$0xf]  ;;  %s4641_s5 = smov [#allocation11]  }
0x3ec5   :  { %4178 = vmatpush3.bf16.msra.mxu1 %v5328_v43  ;;  %4181 = vmatprep.mubr.msk.bf16.mxu1 %vm4638_vm0, %v4637_v0  ;;  %s3496_s27 = sshll.u32 %s4641_s5, 4  ;;  %s3497_s27 = int_to_ptr.vmem [resolvable:$true] %s3496_s27 }
0x3ec6   :  { %4179 = vmatprep.subr.bf16.mxu1 %v4637_v0  ;;  %s4599_s28 = scalar_lea.vmem %s3497_s27, 512  ;;  %p4604_p5 = scmp.lt.s32.totalorder %s3497_s27, %s3497_s27 }
0x3ec7   :  { %p4600_p4 = scmp.ne.s32.totalorder %s3497_s27, %s4599_s28  ;;  %p4605_p6 = scmp.lt.s32.totalorder %s4599_s28, %s4599_s28 }
0x3ec9   :  { %4180 = vmatpush3.bf16.msra.mxu1 %v5334_v44  ;;  %p4606_p7 = por %p4605_p6, %p4604_p5 }
0x3ecb   :  { %p4607_p8 = pnand %p4606_p7, %p4600_p4 }
0x3f97   :  { %v3186_v21 = vpop.f32.mrb[52].mxu1 }
0x3f98   :  { %v4199_v36 = vadd.f32 %v3186_v21, %v5267_v18  ;;  %v4175_v34 = vpop.f32.mrb[53].mxu1 }
0x3f99   :  { %v3189_v35 = vpop.f32.mrb[54].mxu1 }
0x3f9a   :  { %v3625_v14 = vmul.f32 -1.442695, %v4199_v36  ;;  %v4176_v39 = vpop.f32.mrb[55].mxu1  ;;  %v3323_v36 = vsub.s32 2, %v4761_v12  ;;  %v3327_v35 = vsub.s32 3, %v4761_v12 }
0x3f9b   :  { %v3316_v39 = vrot.slane %v3311_v33, %v102_v13 }
0x3f9c   :  { %4480 = vpow2.f32 %v3625_v14 }
0x3fa6   :  { %v4481_v37 = vpop.eup %4480 }
0x3fa7   :  { %v3196_v41 = vadd.f32 1.0, %v4481_v37  ;;  %v3320_v37 = vrot.slane %v3311_v33, %v3319_v45 }
0x3fa9   :  { %4482 = vrcp.f32 %v3196_v41  ;;  %v3324_v41 = vrot.slane %v3311_v33, %v3323_v36 }
0x3fb3   :  { %v4483_v42 = vpop.eup %4482 }
0x3fb4   :  { %v3199_v47 = vmul.f32 2.0, %v4483_v42  ;;  %v3201_v43 = vmul.f32 %v4483_v42, %v3133_v31 }
0x3fb6   :  { %v3626_v40 = vadd.f32 -1.0, %v3199_v47 }
0x3fb8   :  { %3203 = vrot.lane.b32.xlu0 %v3626_v40, %s4632_s0 }
0x402a   :  { %v3204_v5 = vpop.permute.xlu0 %3203 }
0x402b   :  { %v3206_v0 = vmul.f32 %v4483_v42, %v3204_v5 }
0x402d   :  { %3208 = vrot.lane.b32.xlu1 %v3206_v0, %s4639_s22 }
0x409f   :  { %v3209_v44 = vpop.permute.xlu1 %3208 }
0x40a0   :  { %v3211_v6 = vadd.f32 %v3209_v44, %v3201_v43 }
0x40a2   :  { %4484 = vtanh.f32 %v3211_v6 }
0x40ac   :  { %v4485_v4 = vpop.eup %4484 }
0x40ad   :  { %3214 = vrot.lane.b32.xlu0 %v4485_v4, %s4632_s0 }
0x411f   :  { %v3215_v46 = vpop.permute.xlu0 %3214 }
0x4120   :  { %v3217_v48 = vmul.f32 %v4483_v42, %v3215_v46  ;;  %v3328_v42 = vrot.slane %v3311_v33, %v3327_v35 }
0x4122   :  { %v3223_v49 = vpack.c.bf16 %v3217_v48, %v3217_v48 }
0x4124   :  { %3225 = vrot.lane.b32.xlu1 %v3223_v49, %s4639_s22 }
0x4196   :  { %v3226_v22 = vpop.permute.xlu1 %3225 }
0x4197   :  { %4182 = vmatmul.mubr.msk.bf16.vlgmr.msra.gmra.mrb[56].mxu1 %vm185_vm2, %v3226_v22 }
0x426a   :  { %v3264_v51 = vpop.f32.mrb[56].mxu1 }
0x426b   :  { %v4200_v52 = vadd.f32 %v3264_v51, %v5267_v18  ;;  %v4183_v53 = vpop.f32.mrb[57].mxu1 }
0x426c   :  { %v3267_v54 = vpop.f32.mrb[58].mxu1 }
0x426d   :  { %v3628_v23 = vmul.f32 -1.442695, %v4200_v52  ;;  %v4184_v55 = vpop.f32.mrb[59].mxu1 }
0x426f   :  { %4486 = vpow2.f32 %v3628_v23 }
0x4279   :  { %v4487_v56 = vpop.eup %4486 }
0x427a   :  { %v3274_v50 = vadd.f32 1.0, %v4487_v56 }
0x427c   :  { %4488 = vrcp.f32 %v3274_v50 }
0x4286   :  { %v4489_v58 = vpop.eup %4488 }
0x4287   :  { %v3277_v20 = vmul.f32 2.0, %v4489_v58  ;;  %v3279_v18 = vmul.f32 %v4489_v58, %v3211_v6 }
0x4289   :  { %v3629_v59 = vadd.f32 -1.0, %v3277_v20 }
0x428b   :  { %3281 = vrot.lane.b32.xlu0 %v3629_v59, %s4632_s0 }
0x42fd   :  { %v3282_v60 = vpop.permute.xlu0 %3281 }
0x42fe   :  { %v3284_v62 = vmul.f32 %v4489_v58, %v3282_v60 }
0x4300   :  { %3286 = vrot.lane.b32.xlu1 %v3284_v62, %s4639_s22 }
0x4304   :  { %2750 = vrot.lane.b32.xlu1 %v5274_v38, %s4639_s22 }
0x4308   :  { %2907 = vrot.lane.b32.xlu1 %v5306_v24, %s4639_s22 }
0x430c   :  { %3063 = vrot.lane.b32.xlu1 %v5342_v61, %s4639_s22  ;;  %v4288_v61 = vld [vmem:[#allocation9] ss:$16 sps:$4 sm:$0xff]  }
0x430d   :  { %3377 = vmatpush1.bf16.msra.mxu0 %v4288_v61 }
0x430e   :  { %3378 = vmatprep.subr.bf16.mxu0 %v4293_v11 }
0x4310   :  { %3219 = vrot.lane.b32.xlu1 %v3217_v48, %s4639_s22 }
0x4311   :  { %3379 = vmatpush1.bf16.msra.mxu0 %v4291_v16 }
0x4312   :  { %3417 = vmatprep.subr.bf16.mxu0 %v4296_v17 }
0x4372   :  { %v3287_v63 = vpop.permute.xlu1 %3286 }
0x4373   :  { %v3289_v1 = vadd.f32 %v3287_v63, %v3279_v18 }
0x4375   :  { %4490 = vtanh.f32 %v3289_v1 }
0x4376   :  { %v2751_v2 = vpop.permute.xlu1 %2750 }
0x4377   :  { %2754 = vst.msk [vmem:[#allocation2] sm:$0x1] %vm2753_vm3, %v2751_v2 }
0x437a   :  { %v2908_v7 = vpop.permute.xlu1 %2907 }
0x437b   :  { %2910 = vst.msk [vmem:[#allocation2 + $0x2] sm:$0x1] %vm2753_vm3, %v2908_v7 }
0x437e   :  { %v3064_v38 = vpop.permute.xlu1 %3063 }
0x437f   :  { %v4491_v8 = vpop.eup %4490  ;;  %3066 = vst.msk [vmem:[#allocation2 + $0x4] sm:$0x1] %vm2753_vm3, %v3064_v38 }
0x4380   :  { %3292 = vrot.lane.b32.xlu0 %v4491_v8, %s4632_s0 }
0x4382   :  { %v3220_v24 = vpop.permute.xlu1 %3219 }
0x4383   :  { %3222 = vst.msk [vmem:[#allocation2 + $0x6] sm:$0x1] %vm2753_vm3, %v3220_v24 }
0x4384   :  { %2829 = vrot.lane.b32.xlu0 %v5290_v57, %s4639_s22 }
0x4388   :  { %2985 = vrot.lane.b32.xlu0 %v5322_v3, %s4639_s22 }
0x438c   :  { %3141 = vrot.lane.b32.xlu0 %v5358_v28, %s4639_s22 }
0x43f2   :  { %v3293_v27 = vpop.permute.xlu0 %3292 }
0x43f3   :  { %v3295_v57 = vmul.f32 %v4489_v58, %v3293_v27 }
0x43f5   :  { %3297 = vrot.lane.b32.xlu0 %v3295_v57, %s4639_s22 }
0x43f6   :  { %v2830_v3 = vpop.permute.xlu0 %2829 }
0x43f7   :  { %2832 = vst.msk [vmem:[#allocation2 + $0x1] sm:$0x1] %vm2753_vm3, %v2830_v3 }
0x43fa   :  { %v2986_v19 = vpop.permute.xlu0 %2985 }
0x43fb   :  { %2988 = vst.msk [vmem:[#allocation2 + $0x3] sm:$0x1] %vm2753_vm3, %v2986_v19 }
0x43fe   :  { %v3142_v25 = vpop.permute.xlu0 %3141 }
0x43ff   :  { %3144 = vst.msk [vmem:[#allocation2 + $0x5] sm:$0x1] %vm2753_vm3, %v3142_v25 }
0x4467   :  { %v3298_v26 = vpop.permute.xlu0 %3297 }
0x4468   :  { %3300 = vst.msk [vmem:[#allocation2 + $0x7] sm:$0x1] %vm2753_vm3, %v3298_v26 }
0x446f   :  { %v3301_v9 = vld [vmem:[#allocation2] sm:$0xff] }
0x4470   :  { %v3302_v31 = vpack.c.bf16 %v3301_v9, %v3301_v9 }
0x4472   :  { %3638 = vmatmul.mubr.msk.bf16.vlgmr.msra.gmra.mrb[72].mxu0 %vm185_vm2, %v3302_v31 }
0x4473   :  { %3418 = vmatpush1.bf16.msra.mxu0 %v4294_v29  ;;  %3449 = vmatprep.mubr.bf16.mxu0 %v4640_v15 }
0x4474   :  { %3419 = vmatprep.subr.bf16.mxu0 %v4299_v30 }
0x4477   :  { %3420 = vmatpush1.bf16.msra.mxu0 %v4297_v32 }
0x447a   :  { %3639 = vmatmul.mubr.msk.bf16.vlgmr.msra.gmra.mrb[76].mxu0 %vm185_vm2, %v3302_v31 }
0x4545   :  { %v3410_v28 = vpop.f32.mrb[72].mxu0 }
0x4546   :  { %v3412_v21 = vpop.f32.mrb[73].mxu0  ;;  %v3411_v47 = vadd.f32 %v3410_v28, %v3316_v39 }
0x4547   :  { %v3414_v34 = vpop.f32.mrb[74].mxu0  ;;  %v3413_v40 = vadd.f32 %v3412_v21, %v3320_v37 }
0x4548   :  { %v3415_v14 = vpop.f32.mrb[75].mxu0 }
0x4549   :  { %v3458_v46 = vmax.f32 %v3411_v47, %v3413_v40 }
0x454d   :  { %v3451_v5 = vpop.f32.mrb[76].mxu0 }
0x454e   :  { %v3452_v0 = vadd.f32 %v3451_v5, %v3324_v41  ;;  %v3453_v43 = vpop.f32.mrb[77].mxu0 }
0x454f   :  { %v3454_v44 = vadd.f32 %v3453_v43, %v3328_v42  ;;  %v3455_v6 = vpop.f32.mrb[78].mxu0 }
0x4550   :  { %v3456_v4 = vpop.f32.mrb[79].mxu0 }
0x4551   :  { %v3459_v48 = vmax.f32 %v3452_v0, %v3454_v44 }
0x4553   :  { %v3460_v49 = vmax.f32 %v3458_v46, %v3459_v48 }
0x4555   :  { %3461 = vmax.xlane.f32.xlu1 %v3460_v49 }
0x45e2   :  { %v3462_v22 = vpop.xlane.xlu1 %3461 }
0x45e3   :  { %v3463_v51 = vsub.f32 %v3411_v47, %v3462_v22  ;;  %v3464_v52 = vsub.f32 %v3413_v40, %v3462_v22  ;;  %v3465_v12 = vsub.f32 %v3452_v0, %v3462_v22  ;;  %v3466_v13 = vsub.f32 %v3454_v44, %v3462_v22 }
0x45e5   :  { %v3467_v53 = vmul.f32 1.442695, %v3463_v51  ;;  %v3469_v54 = vmul.f32 1.442695, %v3464_v52  ;;  %v3471_v23 = vmul.f32 1.442695, %v3465_v12 }
0x45e6   :  { %v3473_v55 = vmul.f32 1.442695, %v3466_v13 }
0x45e7   :  { %4492 = vpow2.f32 %v3467_v53 }
0x45e8   :  { %4494 = vpow2.f32 %v3469_v54 }
0x45e9   :  { %4496 = vpow2.f32 %v3471_v23 }
0x45ea   :  { %4498 = vpow2.f32 %v3473_v55 }
0x45f1   :  { %v4493_v56 = vpop.eup %4492 }
0x45f2   :  { %v4495_v50 = vpop.eup %4494 }
0x45f3   :  { %v3475_v58 = vadd.f32 %v4495_v50, %v4493_v56  ;;  %v4497_v20 = vpop.eup %4496 }
0x45f4   :  { %v4499_v60 = vpop.eup %4498 }
0x45f5   :  { %v3476_v59 = vadd.f32 %v4497_v20, %v3475_v58 }
0x45f7   :  { %v3477_v62 = vadd.f32 %v4499_v60, %v3476_v59 }
0x45f9   :  { %3478 = vadd.xlane.f32.xlu0 %v3477_v62 }
0x4686   :  { %v3479_v18 = vpop.xlane.xlu0 %3478 }
0x4687   :  { %4500 = vlog2.f32 %v3479_v18 }
0x4691   :  { %v4501_v63 = vpop.eup %4500 }
0x4692   :  { %v3481_v1 = vmul.f32 0.6931472, %v4501_v63 }
0x4694   :  { %v3482_v2 = vsub.f32 %v3463_v51, %v3481_v1  ;;  %v3483_v7 = vsub.f32 %v3464_v52, %v3481_v1  ;;  %v3484_v38 = vsub.f32 %v3465_v12, %v3481_v1  ;;  %v3485_v8 = vsub.f32 %v3466_v13, %v3481_v1 }
0x4696   :  { %3486 = vst [vmem:[#allocation11] sm:$0xff] %v3482_v2  ;;  %3487 = vst [vmem:[#allocation11 + $0x8] sm:$0xff] %v3483_v7 }
0x4697   :  { %3488 = vst [vmem:[#allocation11 + $0x10] sm:$0xff] %v3484_v38  ;;  %3489 = vst [vmem:[#allocation11 + $0x18] sm:$0xff] %v3485_v8 }
0x4698   :  { %4610 = shalt.err (!%p4607_p8)
}
0x4699   :  { %s4611_s0 = scalar_lea.hbm %s5429_s6, 512 }
0x469a   :  { %p4612_p9 = scmp.ne.s32.totalorder %s5429_s6, %s4611_s0  ;;  %p4615_p10 = scmp.lt.u32.totalorder %s4611_s0, %s5429_s6 }
0x469c   :  { %p4617_p11 = pnand %p4615_p10, %p4612_p9 }
0x469e   :  { %4620 = shalt.err (!%p4617_p11)
}
0x469f   :  { %3499 = dma.vmem_to_hbm [thread:$0]  %s3497_s27, 512, %s5429_s6, [#allocation5]  }
0x46a0   :  { %4627 = dma.done.wait [#allocation5], 512  }
0x46a1   :  { %4628 = vsyncadd [#allocation5], 4294966784 }
0x46a2   :  { %3503 = vsyncpa [#allocation4], 1 }
0x46a3   :  { %3504 = vsyncpa [#allocation7], 1 }
0x46a4   :  { %3505 = vsyncpa [#allocation10], 1 }
0x46a5   :  { %3506 = vsyncpa [#allocation5], 1 }

</bundles_post_ra>
